<compile_context>
chip_gen: v7x
topology: tpu7x:2x2x1
jax: 0.10.0
libtpu: 0.0.40
codegen_flags: <defaults>
</compile_context>

<pallas_src>
import math

import jax
import jax.numpy as jnp
from jax.experimental import pallas as pl
from jax.experimental.pallas import tpu as pltpu


# ----------------------------- in-kernel helpers -----------------------------

def _layernorm(v, g, b, eps=1e-5):
    mu = jnp.mean(v, axis=-1, keepdims=True)
    var = jnp.mean(jnp.square(v - mu), axis=-1, keepdims=True)
    return (v - mu) * jax.lax.rsqrt(var + eps) * g + b


def _gelu(v):
    # tanh-approximate GELU: jnp.tanh lowers to the EUP slot (frees the VALU).
    c = math.sqrt(2.0 / math.pi)
    return 0.5 * v * (1.0 + jnp.tanh(c * (v + 0.044715 * v * v * v)))


def _softmax(s):
    m = jnp.max(s, axis=-1, keepdims=True)
    e = jnp.exp(s - m)
    # EUP approximate reciprocal instead of a VALU divide.
    return e * pl.reciprocal(jnp.sum(e, axis=-1, keepdims=True), approx=True)


# --------------------------------- kernel ------------------------------------

def _make_kernel(num_heads_cross):
    H = num_heads_cross
    bf16 = jnp.bfloat16
    f32 = jnp.float32

    def kernel(x_ref, txt_ref,
               w_conv_ref, b_conv_ref, w_lin_ref, b_lin_ref,
               n1_g_ref, n1_b_ref, n2_g_ref, n2_b_ref,
               san_g_ref, san_b_ref, can_g_ref, can_b_ref,
               sa_wqkv_ref, sa_add_ref, sa_wo_ref, sa_bo_ref,
               ca_wq_ref, ca_qadd_ref, ca_wkv_ref, ca_kvadd_ref,
               ca_wo_ref, ca_bo_ref,
               scale_ref,
               out_ref):
        x = x_ref[...]                       # [Bb, N, C] f32
        Bb, N, C = x.shape
        d = C // H
        txt_in = txt_ref[...]                # [Bb, L_in, E] bf16 (cast in wrapper)
        S = w_conv_ref.shape[0]              # L_out

        # ---- text_project: Conv1d(L_in->L_out, k=1) + GELU + Linear(E->C) + LeakyReLU
        # The [L_out, L_in] bf16 conv weight (<1 vreg) is broadcast over the batch so
        # the contraction stays in the proven batched-3D einsum form.
        wc = jnp.broadcast_to(w_conv_ref[...][None], (Bb,) + w_conv_ref.shape)
        t = jnp.einsum("boi,bie->boe", wc, txt_in,
                       preferred_element_type=f32)                    # [Bb, S, E]
        t = _gelu(t + b_conv_ref[...][None])
        t = jnp.dot(t.reshape(Bb * S, -1).astype(bf16), w_lin_ref[...],
                    preferred_element_type=f32) + b_lin_ref[...]      # [Bb*S, C]
        t = jnp.where(t >= 0.0, t, 0.01 * t)                          # LeakyReLU(0.01)
        txt = t.reshape(Bb, S, C)

        # ---------------- self-attention block (1 head) ----------------
        # One fused [C, 3C] projection; PE and the 1/sqrt(C) softmax scale are folded
        # into the weight / additive term at prepare_params time.
        vis2 = _layernorm(x, n1_g_ref[...], n1_b_ref[...])            # [Bb, N, C]
        qkv = jnp.dot(vis2.reshape(Bb * N, C).astype(bf16), sa_wqkv_ref[...],
                      preferred_element_type=f32).reshape(Bb, N, 3 * C)
        qkv = qkv + sa_add_ref[...][None]                             # [N,3C] pe + bias
        qp, kp, vp = qkv[:, :, :C], qkv[:, :, C:2 * C], qkv[:, :, 2 * C:]
        s = jnp.einsum("bqd,bkd->bqk", qp.astype(bf16), kp.astype(bf16),
                       preferred_element_type=f32)                    # [Bb, N, N]
        p = _softmax(s)
        o = jnp.einsum("bqk,bkd->bqd", p.astype(bf16), vp.astype(bf16),
                       preferred_element_type=f32)                    # [Bb, N, C]
        att = jnp.dot(o.reshape(Bb * N, C).astype(bf16), sa_wo_ref[...],
                      preferred_element_type=f32) + sa_bo_ref[...]
        vis2 = _layernorm(att.reshape(Bb, N, C), san_g_ref[...], san_b_ref[...])
        vis = x + vis2

        # ---------------- cross-attention block (H heads) ----------------
        # Full-width GEMM projections ([C, C] for q on vis2, fused [C, 2C] for k|v on
        # txt; PE + bias + 1/sqrt(d) scale folded in).  Heads are lane slices of the
        # projected activations in a statically unrolled loop.
        vis2 = _layernorm(vis, n2_g_ref[...], n2_b_ref[...])
        qc = jnp.dot(vis2.reshape(Bb * N, C).astype(bf16), ca_wq_ref[...],
                     preferred_element_type=f32).reshape(Bb, N, C)
        qc = qc + ca_qadd_ref[...][None]                              # pe_q + bq (scaled)
        kv = jnp.dot(txt.reshape(Bb * S, C).astype(bf16), ca_wkv_ref[...],
                     preferred_element_type=f32).reshape(Bb, S, 2 * C)
        kv = kv + ca_kvadd_ref[...][None]                             # pe_k + bk | bv
        kc, vc = kv[:, :, :C], kv[:, :, C:]

        heads = []
        for h in range(H):                                            # static unroll
            sl = slice(h * d, (h + 1) * d)
            sh = jnp.einsum("bqd,bkd->bqk", qc[:, :, sl].astype(bf16),
                            kc[:, :, sl].astype(bf16),
                            preferred_element_type=f32)               # [Bb, N, S]
            ph = _softmax(sh)
            heads.append(jnp.einsum("bqk,bkd->bqd", ph.astype(bf16),
                                    vc[:, :, sl].astype(bf16),
                                    preferred_element_type=f32))      # [Bb, N, d]
        o = jnp.concatenate(heads, axis=-1)                           # [Bb, N, C]
        att = jnp.dot(o.reshape(Bb * N, C).astype(bf16), ca_wo_ref[...],
                      preferred_element_type=f32) + ca_bo_ref[...]
        vis2 = _layernorm(att.reshape(Bb, N, C), can_g_ref[...], can_b_ref[...])

        out_ref[...] = vis + scale_ref[0, 0] * vis2

    return kernel


# ------------------------------ wrapper / glue --------------------------------

_PARAM_ORDER = (
    "w_conv", "b_conv", "w_lin", "b_lin",
    "n1_g", "n1_b", "n2_g", "n2_b", "san_g", "san_b", "can_g", "can_b",
    "sa_wqkv", "sa_add", "sa_wo", "sa_bo",
    "ca_wq", "ca_qadd", "ca_wkv", "ca_kvadd", "ca_wo", "ca_bo",
    "scale",
)


def _auto_batch_block(B, N, C, L_in, L_out, E, H, vmem_budget_bytes=16 << 20):
    """Cap the per-grid-step batch so the resident working set (the [bb, N, N] f32
    self-attention scores dominate as N grows) stays within a conservative VMEM
    budget.  16 MiB fits even v5e's default scoped limit and leaves headroom on
    v7x's 64 MiB physical / 32 MiB scoped VMEM."""
    lane = 128

    def pad(n):
        return ((n + lane - 1) // lane) * lane

    def est(bb):
        f = 4
        scores = bb * N * pad(N) * f + bb * H * N * pad(L_out) * f
        acts = bb * N * (pad(3 * C) + 6 * pad(C)) * f
        txt_ws = bb * (L_in * pad(E) + L_out * (pad(E) + pad(3 * C))) * f
        io = 4 * bb * N * pad(C) * f          # x + out, double-buffered
        return scores + acts + txt_ws + io

    bb = B
    while bb > 1 and est(bb) > vmem_budget_bytes:
        bb -= 1
    while B % bb:
        bb -= 1
    return bb


def guide_decoder_layer(x, txt, params, num_heads_cross=4, batch_block=None):
    B, N, C = x.shape
    _, L_in, E = txt.shape
    L_out = params["b_conv"].shape[0]

    if batch_block is None:
        batch_block = _auto_batch_block(B, N, C, L_in, L_out, E, num_heads_cross)
    batch_block = max(1, min(batch_block, B))
    while B % batch_block:
        batch_block -= 1
    grid = (B // batch_block,)

    # txt is only ever consumed as bf16 inside the kernel -> halve the DMA bytes.
    txt_bf16 = txt.astype(jnp.bfloat16)

    def batch_spec(shape):
        nd = len(shape)
        return pl.BlockSpec((batch_block,) + tuple(shape[1:]),
                            lambda b, _nd=nd: (b,) + (0,) * (_nd - 1))

    def const_spec(a):
        nd = a.ndim
        return pl.BlockSpec(a.shape, lambda b, _nd=nd: (0,) * _nd)

    in_specs = [batch_spec(x.shape), batch_spec(txt_bf16.shape)]
    for name in _PARAM_ORDER:
        if name == "scale":
            in_specs.append(pl.BlockSpec(memory_space=pltpu.MemorySpace.SMEM))
        else:
            in_specs.append(const_spec(params[name]))

    kernel = _make_kernel(num_heads_cross)
    return pl.pallas_call(
        kernel,
        out_shape=jax.ShapeDtypeStruct((B, N, C), jnp.float32),
        grid_spec=pltpu.PrefetchScalarGridSpec(
            num_scalar_prefetch=0,
            grid=grid,
            in_specs=in_specs,
            out_specs=pl.BlockSpec((batch_block, N, C), lambda b: (b, 0, 0)),
        ),
        compiler_params=pltpu.CompilerParams(dimension_semantics=("parallel",)),
    )(x, txt_bf16, *[params[name] for name in _PARAM_ORDER])


def positional_encoding(length, d_model):
    pos = jnp.arange(length, dtype=jnp.float32)[:, None]
    div = jnp.exp(jnp.arange(0, d_model, 2, dtype=jnp.float32)
                  * (-math.log(10000.0) / d_model))
    pe = jnp.zeros((length, d_model), jnp.float32)
    pe = pe.at[:, 0::2].set(jnp.sin(pos * div))
    pe = pe.at[:, 1::2].set(jnp.cos(pos * div))
    return pe


def init_torch_params(key, C, L_in, L_out, E):
    """Parameters in torch layout (Conv1d / Linear / MultiheadAttention conventions)."""
    ks = jax.random.split(key, 8)

    def uni(k, shape, fan_in):
        s = 1.0 / math.sqrt(fan_in)
        return jax.random.uniform(k, shape, jnp.float32, -s, s)

    p = {}
    # text_project: Conv1d(L_in -> L_out, k=1), Linear(E -> C)
    p["conv_w"] = uni(ks[0], (L_out, L_in, 1), L_in)
    p["conv_b"] = uni(ks[1], (L_out,), L_in)
    p["lin_w"] = uni(ks[2], (C, E), E)
    p["lin_b"] = uni(ks[3], (C,), E)
    # layer norms (PyTorch default init)
    for name in ("norm1", "norm2", "self_attn_norm", "cross_attn_norm"):
        p[f"{name}_w"] = jnp.ones((C,), jnp.float32)
        p[f"{name}_b"] = jnp.zeros((C,), jnp.float32)
    # self attention (1 head): packed in_proj [3C, C], out_proj [C, C]
    p["sa_in_w"] = uni(ks[4], (3 * C, C), C)
    p["sa_in_b"] = jnp.zeros((3 * C,), jnp.float32)
    p["sa_out_w"] = uni(ks[5], (C, C), C)
    p["sa_out_b"] = jnp.zeros((C,), jnp.float32)
    # cross attention (4 heads)
    p["ca_in_w"] = uni(ks[6], (3 * C, C), C)
    p["ca_in_b"] = jnp.zeros((3 * C,), jnp.float32)
    p["ca_out_w"] = uni(ks[7], (C, C), C)
    p["ca_out_b"] = jnp.zeros((C,), jnp.float32)
    # learnable residual scale, initialized to 0.01 as in the module
    p["scale"] = jnp.array(0.01, jnp.float32)
    return p


def prepare_params(p, N, num_heads_cross=4):
    """Wrapper-side layout plumbing: pre-split / pre-transpose the torch weights,
    fold the positional encodings and softmax scales through the linear q/k
    projections, and cast matmul weights to bf16 (accumulation stays f32)."""
    bf16, f32 = jnp.bfloat16, jnp.float32
    C = p["norm1_w"].shape[0]
    L_out = p["conv_w"].shape[0]
    H = num_heads_cross
    d = C // H
    vis_pe = positional_encoding(N, C)
    txt_pe = positional_encoding(L_out, C)

    q = {}
    # text_project
    q["w_conv"] = p["conv_w"][:, :, 0].astype(bf16)                   # [L_out, L_in]
    q["b_conv"] = p["conv_b"].reshape(-1, 1).astype(f32)              # [L_out, 1]
    q["w_lin"] = p["lin_w"].T.astype(bf16)                            # [E, C]
    q["b_lin"] = p["lin_b"].reshape(1, -1).astype(f32)
    # layer norms
    q["n1_g"], q["n1_b"] = p["norm1_w"].reshape(1, -1), p["norm1_b"].reshape(1, -1)
    q["n2_g"], q["n2_b"] = p["norm2_w"].reshape(1, -1), p["norm2_b"].reshape(1, -1)
    q["san_g"], q["san_b"] = (p["self_attn_norm_w"].reshape(1, -1),
                              p["self_attn_norm_b"].reshape(1, -1))
    q["can_g"], q["can_b"] = (p["cross_attn_norm_w"].reshape(1, -1),
                              p["cross_attn_norm_b"].reshape(1, -1))

    # ---- self attention (1 head, head_dim = C): fused q|k|v, pe + 1/sqrt(C) folded
    s_self = 1.0 / math.sqrt(C)
    wq, wk, wv = jnp.split(p["sa_in_w"], 3, axis=0)                   # each [C, C]
    bq, bk, bv = jnp.split(p["sa_in_b"], 3)
    q["sa_wqkv"] = jnp.concatenate([wq.T * s_self, wk.T, wv.T], axis=1).astype(bf16)
    add_q = (vis_pe @ wq.T + bq[None, :]) * s_self                    # [N, C]
    add_k = vis_pe @ wk.T + bk[None, :]                               # [N, C]
    add_v = jnp.broadcast_to(bv[None, :], (N, C))
    q["sa_add"] = jnp.concatenate([add_q, add_k, add_v], axis=1).astype(f32)  # [N, 3C]
    q["sa_wo"] = p["sa_out_w"].T.astype(bf16)
    q["sa_bo"] = p["sa_out_b"].reshape(1, -1).astype(f32)

    # ---- cross attention (H heads, head_dim = d): full-width GEMMs,
    #      pe + 1/sqrt(d) folded, k|v fused (both read txt)
    s_cross = 1.0 / math.sqrt(d)
    cwq, cwk, cwv = jnp.split(p["ca_in_w"], 3, axis=0)
    cbq, cbk, cbv = jnp.split(p["ca_in_b"], 3)
    q["ca_wq"] = (cwq.T * s_cross).astype(bf16)                               # [C, C]
    q["ca_qadd"] = ((vis_pe @ cwq.T + cbq[None, :]) * s_cross).astype(f32)    # [N, C]
    q["ca_wkv"] = jnp.concatenate([cwk.T, cwv.T], axis=1).astype(bf16)        # [C, 2C]
    q["ca_kvadd"] = jnp.concatenate(
        [txt_pe @ cwk.T + cbk[None, :], jnp.broadcast_to(cbv[None, :], (L_out, C))],
        axis=1).astype(f32)                                                   # [L_out, 2C]
    q["ca_wo"] = p["ca_out_w"].T.astype(bf16)
    q["ca_bo"] = p["ca_out_b"].reshape(1, -1).astype(f32)

    q["scale"] = p["scale"].reshape(1, 1).astype(f32)
    return q


# --------------------------- pure-JAX f32 reference ---------------------------

def reference_forward(x, txt, p, num_heads_cross=4):
    C = x.shape[-1]
    N = x.shape[1]
    L_out = p["conv_w"].shape[0]
    vis_pe = positional_encoding(N, C)
    txt_pe = positional_encoding(L_out, C)

    def ln(v, g, b, eps=1e-5):
        mu = v.mean(-1, keepdims=True)
        var = ((v - mu) ** 2).mean(-1, keepdims=True)
        return (v - mu) / jnp.sqrt(var + eps) * g + b

    # text_project (exact erf GELU, f32)
    t = jnp.einsum("oi,bie->boe", p["conv_w"][:, :, 0], txt) + p["conv_b"][None, :, None]
    t = jax.nn.gelu(t, approximate=False)
    t = t @ p["lin_w"].T + p["lin_b"]
    txtp = jnp.where(t >= 0, t, 0.01 * t)

    def mha(qi, ki, vi, in_w, in_b, out_w, out_b, nh):
        dh = C // nh
        wq, wk, wv = jnp.split(in_w, 3, axis=0)
        bq, bk, bv = jnp.split(in_b, 3)
        qp, kp, vp = qi @ wq.T + bq, ki @ wk.T + bk, vi @ wv.T + bv
        B_, Tq, _ = qp.shape
        Tk = kp.shape[1]
        qh = qp.reshape(B_, Tq, nh, dh).transpose(0, 2, 1, 3)
        kh = kp.reshape(B_, Tk, nh, dh).transpose(0, 2, 1, 3)
        vh = vp.reshape(B_, Tk, nh, dh).transpose(0, 2, 1, 3)
        s = jnp.einsum("bhqd,bhkd->bhqk", qh, kh) / math.sqrt(dh)
        a = jax.nn.softmax(s, axis=-1)
        o = jnp.einsum("bhqk,bhkd->bhqd", a, vh).transpose(0, 2, 1, 3).reshape(B_, Tq, C)
        return o @ out_w.T + out_b

    vis2 = ln(x, p["norm1_w"], p["norm1_b"])
    qk = vis2 + vis_pe[None]
    sa = mha(qk, qk, vis2, p["sa_in_w"], p["sa_in_b"], p["sa_out_w"], p["sa_out_b"], 1)
    vis2 = ln(sa, p["self_attn_norm_w"], p["self_attn_norm_b"])
    vis = x + vis2
    vis2 = ln(vis, p["norm2_w"], p["norm2_b"])
    ca = mha(vis2 + vis_pe[None], txtp + txt_pe[None], txtp,
             p["ca_in_w"], p["ca_in_b"], p["ca_out_w"], p["ca_out_b"], num_heads_cross)
    vis2 = ln(ca, p["cross_attn_norm_w"], p["cross_attn_norm_b"])
    return vis + p["scale"] * vis2


if __name__ == "__main__":
    B, N, C = 2, 64, 32            # x: [B, N, C1] visual tokens
    L_in, L_out, E = 24, 8, 64     # txt: [B, L_in, embed_dim]

    key = jax.random.PRNGKey(0)
    kx, kt, kp = jax.random.split(key, 3)
    x = jax.random.normal(kx, (B, N, C), jnp.float32)
    txt = jax.random.normal(kt, (B, L_in, E), jnp.float32)

    torch_params = init_torch_params(kp, C, L_in, L_out, E)
    params = prepare_params(torch_params, N=N, num_heads_cross=4)

    out = guide_decoder_layer(x, txt, params, num_heads_cross=4)
    out = jax.block_until_ready(out)
    assert out.shape == (B, N, C) and out.dtype == jnp.float32
    assert bool(jnp.all(jnp.isfinite(out)))

    # End-to-end tolerance vs. the f32 / erf-GELU / exact-softmax reference
    # (bf16 MXU inputs + tanh-GELU + approx reciprocal are the only deviations).
    ref = jax.block_until_ready(reference_forward(x, txt, torch_params, 4))
    rel_err = float(jnp.linalg.norm(out - ref) / jnp.linalg.norm(ref))
    assert rel_err < 5e-2, f"relative error too large: {rel_err}"

    print("KERNEL_OK")
</pallas_src>

<mosaic_0001>
module attributes {stable_mosaic.version = 11 : i64} {
  func.func @kernel(%arg0: i32, %arg1: memref<2x64x32xf32, #tpu.memory_space<vmem>>, %arg2: memref<2x24x64xbf16, #tpu.memory_space<vmem>>, %arg3: memref<8x24xbf16, #tpu.memory_space<vmem>>, %arg4: memref<8x1xf32, #tpu.memory_space<vmem>>, %arg5: memref<64x32xbf16, #tpu.memory_space<vmem>>, %arg6: memref<1x32xf32, #tpu.memory_space<vmem>>, %arg7: memref<1x32xf32, #tpu.memory_space<vmem>>, %arg8: memref<1x32xf32, #tpu.memory_space<vmem>>, %arg9: memref<1x32xf32, #tpu.memory_space<vmem>>, %arg10: memref<1x32xf32, #tpu.memory_space<vmem>>, %arg11: memref<1x32xf32, #tpu.memory_space<vmem>>, %arg12: memref<1x32xf32, #tpu.memory_space<vmem>>, %arg13: memref<1x32xf32, #tpu.memory_space<vmem>>, %arg14: memref<1x32xf32, #tpu.memory_space<vmem>>, %arg15: memref<32x96xbf16, #tpu.memory_space<vmem>>, %arg16: memref<64x96xf32, #tpu.memory_space<vmem>>, %arg17: memref<32x32xbf16, #tpu.memory_space<vmem>>, %arg18: memref<1x32xf32, #tpu.memory_space<vmem>>, %arg19: memref<32x32xbf16, #tpu.memory_space<vmem>>, %arg20: memref<64x32xf32, #tpu.memory_space<vmem>>, %arg21: memref<32x64xbf16, #tpu.memory_space<vmem>>, %arg22: memref<8x64xf32, #tpu.memory_space<vmem>>, %arg23: memref<32x32xbf16, #tpu.memory_space<vmem>>, %arg24: memref<1x32xf32, #tpu.memory_space<vmem>>, %arg25: memref<1x1xf32, #tpu.memory_space<smem>>, %arg26: memref<2x64x32xf32, #tpu.memory_space<vmem>>) attributes {dimension_semantics = [#tpu.dimension_semantics<parallel>], iteration_bounds = array<i64: 1>, scalar_prefetch = 0 : i64, scratch_operands = 0 : i64, tpu.core_type = #tpu.core_type<tc>, window_params = [{transform_indices = @transform_0, window_bounds = array<i64: 2, 64, 32>}, {transform_indices = @transform_1, window_bounds = array<i64: 2, 24, 64>}, {pipeline_mode = #tpu.pipeline_mode<synchronous>, transform_indices = @transform_2, window_bounds = array<i64: 8, 24>}, {pipeline_mode = #tpu.pipeline_mode<synchronous>, transform_indices = @transform_3, window_bounds = array<i64: 8, 1>}, {pipeline_mode = #tpu.pipeline_mode<synchronous>, transform_indices = @transform_4, window_bounds = array<i64: 64, 32>}, {pipeline_mode = #tpu.pipeline_mode<synchronous>, transform_indices = @transform_5, window_bounds = array<i64: 1, 32>}, {pipeline_mode = #tpu.pipeline_mode<synchronous>, transform_indices = @transform_6, window_bounds = array<i64: 1, 32>}, {pipeline_mode = #tpu.pipeline_mode<synchronous>, transform_indices = @transform_7, window_bounds = array<i64: 1, 32>}, {pipeline_mode = #tpu.pipeline_mode<synchronous>, transform_indices = @transform_8, window_bounds = array<i64: 1, 32>}, {pipeline_mode = #tpu.pipeline_mode<synchronous>, transform_indices = @transform_9, window_bounds = array<i64: 1, 32>}, {pipeline_mode = #tpu.pipeline_mode<synchronous>, transform_indices = @transform_10, window_bounds = array<i64: 1, 32>}, {pipeline_mode = #tpu.pipeline_mode<synchronous>, transform_indices = @transform_11, window_bounds = array<i64: 1, 32>}, {pipeline_mode = #tpu.pipeline_mode<synchronous>, transform_indices = @transform_12, window_bounds = array<i64: 1, 32>}, {pipeline_mode = #tpu.pipeline_mode<synchronous>, transform_indices = @transform_13, window_bounds = array<i64: 1, 32>}, {pipeline_mode = #tpu.pipeline_mode<synchronous>, transform_indices = @transform_14, window_bounds = array<i64: 32, 96>}, {pipeline_mode = #tpu.pipeline_mode<synchronous>, transform_indices = @transform_15, window_bounds = array<i64: 64, 96>}, {pipeline_mode = #tpu.pipeline_mode<synchronous>, transform_indices = @transform_16, window_bounds = array<i64: 32, 32>}, {pipeline_mode = #tpu.pipeline_mode<synchronous>, transform_indices = @transform_17, window_bounds = array<i64: 1, 32>}, {pipeline_mode = #tpu.pipeline_mode<synchronous>, transform_indices = @transform_18, window_bounds = array<i64: 32, 32>}, {pipeline_mode = #tpu.pipeline_mode<synchronous>, transform_indices = @transform_19, window_bounds = array<i64: 64, 32>}, {pipeline_mode = #tpu.pipeline_mode<synchronous>, transform_indices = @transform_20, window_bounds = array<i64: 32, 64>}, {pipeline_mode = #tpu.pipeline_mode<synchronous>, transform_indices = @transform_21, window_bounds = array<i64: 8, 64>}, {pipeline_mode = #tpu.pipeline_mode<synchronous>, transform_indices = @transform_22, window_bounds = array<i64: 32, 32>}, {pipeline_mode = #tpu.pipeline_mode<synchronous>, transform_indices = @transform_23, window_bounds = array<i64: 1, 32>}, {transform_indices = @transform_24, window_bounds = array<i64: 1, 1>}, {transform_indices = @transform_25, window_bounds = array<i64: 2, 64, 32>}]} {
    %c0 = arith.constant 0 : index
    %c0_0 = arith.constant 0 : index
    %c0_1 = arith.constant 0 : index
    %0 = vector.load %arg1[%c0, %c0_0, %c0_1] : memref<2x64x32xf32, #tpu.memory_space<vmem>>, vector<2x64x32xf32>
    %c0_2 = arith.constant 0 : index
    %c0_3 = arith.constant 0 : index
    %c0_4 = arith.constant 0 : index
    %1 = vector.load %arg2[%c0_2, %c0_3, %c0_4] : memref<2x24x64xbf16, #tpu.memory_space<vmem>>, vector<2x24x64xbf16>
    %c0_5 = arith.constant 0 : index
    %c0_6 = arith.constant 0 : index
    %2 = vector.load %arg3[%c0_5, %c0_6] : memref<8x24xbf16, #tpu.memory_space<vmem>>, vector<8x24xbf16>
    %3 = vector.shape_cast %2 : vector<8x24xbf16> to vector<1x8x24xbf16>
    %4 = vector.shape_cast %3 : vector<1x8x24xbf16> to vector<1x8x24xbf16>
    %5 = vector.broadcast %4 : vector<1x8x24xbf16> to vector<2x8x24xbf16>
    "tpu.trace_start"() <{level = 10 : i32, message = "boi,bie->boe"}> : () -> ()
    %cst = arith.constant dense<0.000000e+00> : vector<2x8x64xf32>
    %6 = tpu.matmul %5, %1, %cst {dimension_numbers = #tpu.dot_dimension_numbers<[2], [1], [1], [2], [0, 0, 0, 1, 1, 2], [0], [0]>} : vector<2x8x24xbf16>, vector<2x24x64xbf16>, vector<2x8x64xf32> -> vector<2x8x64xf32>
    "tpu.trace_stop"() : () -> ()
    %c0_7 = arith.constant 0 : index
    %c0_8 = arith.constant 0 : index
    %7 = vector.load %arg4[%c0_7, %c0_8] : memref<8x1xf32, #tpu.memory_space<vmem>>, vector<8x1xf32>
    %8 = vector.shape_cast %7 : vector<8x1xf32> to vector<1x8x1xf32>
    %9 = vector.broadcast %8 : vector<1x8x1xf32> to vector<2x8x64xf32>
    %10 = arith.addf %6, %9 : vector<2x8x64xf32>
    %cst_9 = arith.constant 5.000000e-01 : f32
    %11 = vector.broadcast %cst_9 : f32 to vector<2x8x64xf32>
    %12 = arith.mulf %11, %10 : vector<2x8x64xf32>
    %cst_10 = arith.constant 4.471500e-02 : f32
    %13 = vector.broadcast %cst_10 : f32 to vector<2x8x64xf32>
    %14 = arith.mulf %13, %10 : vector<2x8x64xf32>
    %15 = arith.mulf %14, %10 : vector<2x8x64xf32>
    %16 = arith.mulf %15, %10 : vector<2x8x64xf32>
    %17 = arith.addf %10, %16 : vector<2x8x64xf32>
    %cst_11 = arith.constant 0.797884583 : f32
    %18 = vector.broadcast %cst_11 : f32 to vector<2x8x64xf32>
    %19 = arith.mulf %18, %17 : vector<2x8x64xf32>
    %20 = math.tanh %19 : vector<2x8x64xf32>
    %cst_12 = arith.constant 1.000000e+00 : f32
    %21 = vector.broadcast %cst_12 : f32 to vector<2x8x64xf32>
    %22 = arith.addf %21, %20 : vector<2x8x64xf32>
    %23 = arith.mulf %12, %22 : vector<2x8x64xf32>
    %24 = vector.shape_cast %23 : vector<2x8x64xf32> to vector<16x64xf32>
    %25 = arith.truncf %24 : vector<16x64xf32> to vector<16x64xbf16>
    %c0_13 = arith.constant 0 : index
    %c0_14 = arith.constant 0 : index
    %26 = vector.load %arg5[%c0_13, %c0_14] : memref<64x32xbf16, #tpu.memory_space<vmem>>, vector<64x32xbf16>
    %cst_15 = arith.constant dense<0.000000e+00> : vector<16x32xf32>
    %27 = tpu.matmul %25, %26, %cst_15 {dimension_numbers = #tpu.dot_dimension_numbers<[1], [0], [0], [1], [0, 0, 1, 1], [], []>} : vector<16x64xbf16>, vector<64x32xbf16>, vector<16x32xf32> -> vector<16x32xf32>
    %c0_16 = arith.constant 0 : index
    %c0_17 = arith.constant 0 : index
    %28 = vector.load %arg6[%c0_16, %c0_17] : memref<1x32xf32, #tpu.memory_space<vmem>>, vector<1x32xf32>
    %29 = vector.broadcast %28 : vector<1x32xf32> to vector<16x32xf32>
    %30 = arith.addf %27, %29 : vector<16x32xf32>
    %cst_18 = arith.constant 0.000000e+00 : f32
    %31 = vector.broadcast %cst_18 : f32 to vector<16x32xf32>
    %32 = arith.cmpf oge, %30, %31 : vector<16x32xf32>
    %cst_19 = arith.constant 0.00999999977 : f32
    %33 = vector.broadcast %cst_19 : f32 to vector<16x32xf32>
    %34 = arith.mulf %33, %30 : vector<16x32xf32>
    %35 = arith.select %32, %30, %34 : vector<16x32xi1>, vector<16x32xf32>
    %36 = vector.shape_cast %35 : vector<16x32xf32> to vector<2x8x32xf32>
    %c0_20 = arith.constant 0 : index
    %c0_21 = arith.constant 0 : index
    %37 = vector.load %arg7[%c0_20, %c0_21] : memref<1x32xf32, #tpu.memory_space<vmem>>, vector<1x32xf32>
    %c0_22 = arith.constant 0 : index
    %c0_23 = arith.constant 0 : index
    %38 = vector.load %arg8[%c0_22, %c0_23] : memref<1x32xf32, #tpu.memory_space<vmem>>, vector<1x32xf32>
    %cst_24 = arith.constant dense<0.000000e+00> : vector<2x64xf32>
    %39 = vector.multi_reduction <add>, %0, %cst_24 [2] : vector<2x64x32xf32> to vector<2x64xf32>
    %40 = vector.shape_cast %39 : vector<2x64xf32> to vector<2x64x1xf32>
    %cst_25 = arith.constant 3.200000e+01 : f32
    %41 = vector.broadcast %cst_25 : f32 to vector<2x64x1xf32>
    %42 = arith.divf %40, %41 : vector<2x64x1xf32>
    %43 = vector.broadcast %42 : vector<2x64x1xf32> to vector<2x64x32xf32>
    %44 = arith.subf %0, %43 : vector<2x64x32xf32>
    %45 = arith.mulf %44, %44 : vector<2x64x32xf32>
    %cst_26 = arith.constant dense<0.000000e+00> : vector<2x64xf32>
    %46 = vector.multi_reduction <add>, %45, %cst_26 [2] : vector<2x64x32xf32> to vector<2x64xf32>
    %47 = vector.shape_cast %46 : vector<2x64xf32> to vector<2x64x1xf32>
    %cst_27 = arith.constant 3.200000e+01 : f32
    %48 = vector.broadcast %cst_27 : f32 to vector<2x64x1xf32>
    %49 = arith.divf %47, %48 : vector<2x64x1xf32>
    %50 = vector.broadcast %42 : vector<2x64x1xf32> to vector<2x64x32xf32>
    %51 = arith.subf %0, %50 : vector<2x64x32xf32>
    %cst_28 = arith.constant 9.99999974E-6 : f32
    %52 = vector.broadcast %cst_28 : f32 to vector<2x64x1xf32>
    %53 = arith.addf %49, %52 : vector<2x64x1xf32>
    %54 = math.rsqrt %53 : vector<2x64x1xf32>
    %55 = vector.broadcast %54 : vector<2x64x1xf32> to vector<2x64x32xf32>
    %56 = arith.mulf %51, %55 : vector<2x64x32xf32>
    %57 = vector.shape_cast %37 : vector<1x32xf32> to vector<1x1x32xf32>
    %58 = vector.broadcast %57 : vector<1x1x32xf32> to vector<2x64x32xf32>
    %59 = arith.mulf %56, %58 : vector<2x64x32xf32>
    %60 = vector.shape_cast %38 : vector<1x32xf32> to vector<1x1x32xf32>
    %61 = vector.broadcast %60 : vector<1x1x32xf32> to vector<2x64x32xf32>
    %62 = arith.addf %59, %61 : vector<2x64x32xf32>
    %63 = vector.shape_cast %62 : vector<2x64x32xf32> to vector<128x32xf32>
    %64 = arith.truncf %63 : vector<128x32xf32> to vector<128x32xbf16>
    %c0_29 = arith.constant 0 : index
    %c0_30 = arith.constant 0 : index
    %65 = vector.load %arg15[%c0_29, %c0_30] : memref<32x96xbf16, #tpu.memory_space<vmem>>, vector<32x96xbf16>
    %cst_31 = arith.constant dense<0.000000e+00> : vector<128x96xf32>
    %66 = tpu.matmul %64, %65, %cst_31 {dimension_numbers = #tpu.dot_dimension_numbers<[1], [0], [0], [1], [0, 0, 1, 1], [], []>} : vector<128x32xbf16>, vector<32x96xbf16>, vector<128x96xf32> -> vector<128x96xf32>
    %67 = vector.shape_cast %66 : vector<128x96xf32> to vector<2x64x96xf32>
    %c0_32 = arith.constant 0 : index
    %c0_33 = arith.constant 0 : index
    %68 = vector.load %arg16[%c0_32, %c0_33] : memref<64x96xf32, #tpu.memory_space<vmem>>, vector<64x96xf32>
    %69 = vector.shape_cast %68 : vector<64x96xf32> to vector<1x64x96xf32>
    %70 = vector.broadcast %69 : vector<1x64x96xf32> to vector<2x64x96xf32>
    %71 = arith.addf %67, %70 : vector<2x64x96xf32>
    %72 = vector.extract_strided_slice %71 {offsets = [0, 0, 0], sizes = [2, 64, 32], strides = [1, 1, 1]} : vector<2x64x96xf32> to vector<2x64x32xf32>
    %73 = vector.extract_strided_slice %71 {offsets = [0, 0, 32], sizes = [2, 64, 32], strides = [1, 1, 1]} : vector<2x64x96xf32> to vector<2x64x32xf32>
    %74 = vector.extract_strided_slice %71 {offsets = [0, 0, 64], sizes = [2, 64, 32], strides = [1, 1, 1]} : vector<2x64x96xf32> to vector<2x64x32xf32>
    %75 = arith.truncf %72 : vector<2x64x32xf32> to vector<2x64x32xbf16>
    %76 = arith.truncf %73 : vector<2x64x32xf32> to vector<2x64x32xbf16>
    "tpu.trace_start"() <{level = 10 : i32, message = "bqd,bkd->bqk"}> : () -> ()
    %cst_34 = arith.constant dense<0.000000e+00> : vector<2x64x64xf32>
    %77 = tpu.matmul %75, %76, %cst_34 {dimension_numbers = #tpu.dot_dimension_numbers<[2], [2], [1], [1], [0, 0, 0, 1, 1, 1], [0], [0]>} : vector<2x64x32xbf16>, vector<2x64x32xbf16>, vector<2x64x64xf32> -> vector<2x64x64xf32>
    "tpu.trace_stop"() : () -> ()
    %cst_35 = arith.constant dense<0xFF800000> : vector<2x64xf32>
    %78 = vector.multi_reduction <maximumf>, %77, %cst_35 [2] : vector<2x64x64xf32> to vector<2x64xf32>
    %79 = vector.shape_cast %78 : vector<2x64xf32> to vector<2x64x1xf32>
    %80 = vector.broadcast %79 : vector<2x64x1xf32> to vector<2x64x64xf32>
    %81 = arith.subf %77, %80 : vector<2x64x64xf32>
    %82 = math.exp %81 : vector<2x64x64xf32>
    %cst_36 = arith.constant dense<0.000000e+00> : vector<2x64xf32>
    %83 = vector.multi_reduction <add>, %82, %cst_36 [2] : vector<2x64x64xf32> to vector<2x64xf32>
    %84 = vector.shape_cast %83 : vector<2x64xf32> to vector<2x64x1xf32>
    %85 = tpu.reciprocal %84 {approx = true} : vector<2x64x1xf32> -> vector<2x64x1xf32>
    %86 = vector.broadcast %85 : vector<2x64x1xf32> to vector<2x64x64xf32>
    %87 = arith.mulf %82, %86 : vector<2x64x64xf32>
    %88 = arith.truncf %87 : vector<2x64x64xf32> to vector<2x64x64xbf16>
    %89 = arith.truncf %74 : vector<2x64x32xf32> to vector<2x64x32xbf16>
    "tpu.trace_start"() <{level = 10 : i32, message = "bqk,bkd->bqd"}> : () -> ()
    %cst_37 = arith.constant dense<0.000000e+00> : vector<2x64x32xf32>
    %90 = tpu.matmul %88, %89, %cst_37 {dimension_numbers = #tpu.dot_dimension_numbers<[2], [1], [1], [2], [0, 0, 0, 1, 1, 2], [0], [0]>} : vector<2x64x64xbf16>, vector<2x64x32xbf16>, vector<2x64x32xf32> -> vector<2x64x32xf32>
    "tpu.trace_stop"() : () -> ()
    %91 = vector.shape_cast %90 : vector<2x64x32xf32> to vector<128x32xf32>
    %92 = arith.truncf %91 : vector<128x32xf32> to vector<128x32xbf16>
    %c0_38 = arith.constant 0 : index
    %c0_39 = arith.constant 0 : index
    %93 = vector.load %arg17[%c0_38, %c0_39] : memref<32x32xbf16, #tpu.memory_space<vmem>>, vector<32x32xbf16>
    %cst_40 = arith.constant dense<0.000000e+00> : vector<128x32xf32>
    %94 = tpu.matmul %92, %93, %cst_40 {dimension_numbers = #tpu.dot_dimension_numbers<[1], [0], [0], [1], [0, 0, 1, 1], [], []>} : vector<128x32xbf16>, vector<32x32xbf16>, vector<128x32xf32> -> vector<128x32xf32>
    %c0_41 = arith.constant 0 : index
    %c0_42 = arith.constant 0 : index
    %95 = vector.load %arg18[%c0_41, %c0_42] : memref<1x32xf32, #tpu.memory_space<vmem>>, vector<1x32xf32>
    %96 = vector.broadcast %95 : vector<1x32xf32> to vector<128x32xf32>
    %97 = arith.addf %94, %96 : vector<128x32xf32>
    %98 = vector.shape_cast %97 : vector<128x32xf32> to vector<2x64x32xf32>
    %c0_43 = arith.constant 0 : index
    %c0_44 = arith.constant 0 : index
    %99 = vector.load %arg11[%c0_43, %c0_44] : memref<1x32xf32, #tpu.memory_space<vmem>>, vector<1x32xf32>
    %c0_45 = arith.constant 0 : index
    %c0_46 = arith.constant 0 : index
    %100 = vector.load %arg12[%c0_45, %c0_46] : memref<1x32xf32, #tpu.memory_space<vmem>>, vector<1x32xf32>
    %cst_47 = arith.constant dense<0.000000e+00> : vector<2x64xf32>
    %101 = vector.multi_reduction <add>, %98, %cst_47 [2] : vector<2x64x32xf32> to vector<2x64xf32>
    %102 = vector.shape_cast %101 : vector<2x64xf32> to vector<2x64x1xf32>
    %cst_48 = arith.constant 3.200000e+01 : f32
    %103 = vector.broadcast %cst_48 : f32 to vector<2x64x1xf32>
    %104 = arith.divf %102, %103 : vector<2x64x1xf32>
    %105 = vector.broadcast %104 : vector<2x64x1xf32> to vector<2x64x32xf32>
    %106 = arith.subf %98, %105 : vector<2x64x32xf32>
    %107 = arith.mulf %106, %106 : vector<2x64x32xf32>
    %cst_49 = arith.constant dense<0.000000e+00> : vector<2x64xf32>
    %108 = vector.multi_reduction <add>, %107, %cst_49 [2] : vector<2x64x32xf32> to vector<2x64xf32>
    %109 = vector.shape_cast %108 : vector<2x64xf32> to vector<2x64x1xf32>
    %cst_50 = arith.constant 3.200000e+01 : f32
    %110 = vector.broadcast %cst_50 : f32 to vector<2x64x1xf32>
    %111 = arith.divf %109, %110 : vector<2x64x1xf32>
    %112 = vector.broadcast %104 : vector<2x64x1xf32> to vector<2x64x32xf32>
    %113 = arith.subf %98, %112 : vector<2x64x32xf32>
    %cst_51 = arith.constant 9.99999974E-6 : f32
    %114 = vector.broadcast %cst_51 : f32 to vector<2x64x1xf32>
    %115 = arith.addf %111, %114 : vector<2x64x1xf32>
    %116 = math.rsqrt %115 : vector<2x64x1xf32>
    %117 = vector.broadcast %116 : vector<2x64x1xf32> to vector<2x64x32xf32>
    %118 = arith.mulf %113, %117 : vector<2x64x32xf32>
    %119 = vector.shape_cast %99 : vector<1x32xf32> to vector<1x1x32xf32>
    %120 = vector.broadcast %119 : vector<1x1x32xf32> to vector<2x64x32xf32>
    %121 = arith.mulf %118, %120 : vector<2x64x32xf32>
    %122 = vector.shape_cast %100 : vector<1x32xf32> to vector<1x1x32xf32>
    %123 = vector.broadcast %122 : vector<1x1x32xf32> to vector<2x64x32xf32>
    %124 = arith.addf %121, %123 : vector<2x64x32xf32>
    %125 = arith.addf %0, %124 : vector<2x64x32xf32>
    %c0_52 = arith.constant 0 : index
    %c0_53 = arith.constant 0 : index
    %126 = vector.load %arg9[%c0_52, %c0_53] : memref<1x32xf32, #tpu.memory_space<vmem>>, vector<1x32xf32>
    %c0_54 = arith.constant 0 : index
    %c0_55 = arith.constant 0 : index
    %127 = vector.load %arg10[%c0_54, %c0_55] : memref<1x32xf32, #tpu.memory_space<vmem>>, vector<1x32xf32>
    %cst_56 = arith.constant dense<0.000000e+00> : vector<2x64xf32>
    %128 = vector.multi_reduction <add>, %125, %cst_56 [2] : vector<2x64x32xf32> to vector<2x64xf32>
    %129 = vector.shape_cast %128 : vector<2x64xf32> to vector<2x64x1xf32>
    %cst_57 = arith.constant 3.200000e+01 : f32
    %130 = vector.broadcast %cst_57 : f32 to vector<2x64x1xf32>
    %131 = arith.divf %129, %130 : vector<2x64x1xf32>
    %132 = vector.broadcast %131 : vector<2x64x1xf32> to vector<2x64x32xf32>
    %133 = arith.subf %125, %132 : vector<2x64x32xf32>
    %134 = arith.mulf %133, %133 : vector<2x64x32xf32>
    %cst_58 = arith.constant dense<0.000000e+00> : vector<2x64xf32>
    %135 = vector.multi_reduction <add>, %134, %cst_58 [2] : vector<2x64x32xf32> to vector<2x64xf32>
    %136 = vector.shape_cast %135 : vector<2x64xf32> to vector<2x64x1xf32>
    %cst_59 = arith.constant 3.200000e+01 : f32
    %137 = vector.broadcast %cst_59 : f32 to vector<2x64x1xf32>
    %138 = arith.divf %136, %137 : vector<2x64x1xf32>
    %139 = vector.broadcast %131 : vector<2x64x1xf32> to vector<2x64x32xf32>
    %140 = arith.subf %125, %139 : vector<2x64x32xf32>
    %cst_60 = arith.constant 9.99999974E-6 : f32
    %141 = vector.broadcast %cst_60 : f32 to vector<2x64x1xf32>
    %142 = arith.addf %138, %141 : vector<2x64x1xf32>
    %143 = math.rsqrt %142 : vector<2x64x1xf32>
    %144 = vector.broadcast %143 : vector<2x64x1xf32> to vector<2x64x32xf32>
    %145 = arith.mulf %140, %144 : vector<2x64x32xf32>
    %146 = vector.shape_cast %126 : vector<1x32xf32> to vector<1x1x32xf32>
    %147 = vector.broadcast %146 : vector<1x1x32xf32> to vector<2x64x32xf32>
    %148 = arith.mulf %145, %147 : vector<2x64x32xf32>
    %149 = vector.shape_cast %127 : vector<1x32xf32> to vector<1x1x32xf32>
    %150 = vector.broadcast %149 : vector<1x1x32xf32> to vector<2x64x32xf32>
    %151 = arith.addf %148, %150 : vector<2x64x32xf32>
    %152 = vector.shape_cast %151 : vector<2x64x32xf32> to vector<128x32xf32>
    %153 = arith.truncf %152 : vector<128x32xf32> to vector<128x32xbf16>
    %c0_61 = arith.constant 0 : index
    %c0_62 = arith.constant 0 : index
    %154 = vector.load %arg19[%c0_61, %c0_62] : memref<32x32xbf16, #tpu.memory_space<vmem>>, vector<32x32xbf16>
    %cst_63 = arith.constant dense<0.000000e+00> : vector<128x32xf32>
    %155 = tpu.matmul %153, %154, %cst_63 {dimension_numbers = #tpu.dot_dimension_numbers<[1], [0], [0], [1], [0, 0, 1, 1], [], []>} : vector<128x32xbf16>, vector<32x32xbf16>, vector<128x32xf32> -> vector<128x32xf32>
    %156 = vector.shape_cast %155 : vector<128x32xf32> to vector<2x64x32xf32>
    %c0_64 = arith.constant 0 : index
    %c0_65 = arith.constant 0 : index
    %157 = vector.load %arg20[%c0_64, %c0_65] : memref<64x32xf32, #tpu.memory_space<vmem>>, vector<64x32xf32>
    %158 = vector.shape_cast %157 : vector<64x32xf32> to vector<1x64x32xf32>
    %159 = vector.broadcast %158 : vector<1x64x32xf32> to vector<2x64x32xf32>
    %160 = arith.addf %156, %159 : vector<2x64x32xf32>
    %161 = vector.shape_cast %36 : vector<2x8x32xf32> to vector<16x32xf32>
    %162 = arith.truncf %161 : vector<16x32xf32> to vector<16x32xbf16>
    %c0_66 = arith.constant 0 : index
    %c0_67 = arith.constant 0 : index
    %163 = vector.load %arg21[%c0_66, %c0_67] : memref<32x64xbf16, #tpu.memory_space<vmem>>, vector<32x64xbf16>
    %cst_68 = arith.constant dense<0.000000e+00> : vector<16x64xf32>
    %164 = tpu.matmul %162, %163, %cst_68 {dimension_numbers = #tpu.dot_dimension_numbers<[1], [0], [0], [1], [0, 0, 1, 1], [], []>} : vector<16x32xbf16>, vector<32x64xbf16>, vector<16x64xf32> -> vector<16x64xf32>
    %165 = vector.shape_cast %164 : vector<16x64xf32> to vector<2x8x64xf32>
    %c0_69 = arith.constant 0 : index
    %c0_70 = arith.constant 0 : index
    %166 = vector.load %arg22[%c0_69, %c0_70] : memref<8x64xf32, #tpu.memory_space<vmem>>, vector<8x64xf32>
    %167 = vector.shape_cast %166 : vector<8x64xf32> to vector<1x8x64xf32>
    %168 = vector.broadcast %167 : vector<1x8x64xf32> to vector<2x8x64xf32>
    %169 = arith.addf %165, %168 : vector<2x8x64xf32>
    %170 = vector.extract_strided_slice %169 {offsets = [0, 0, 0], sizes = [2, 8, 32], strides = [1, 1, 1]} : vector<2x8x64xf32> to vector<2x8x32xf32>
    %171 = vector.extract_strided_slice %169 {offsets = [0, 0, 32], sizes = [2, 8, 32], strides = [1, 1, 1]} : vector<2x8x64xf32> to vector<2x8x32xf32>
    %172 = vector.extract_strided_slice %160 {offsets = [0, 0, 0], sizes = [2, 64, 8], strides = [1, 1, 1]} : vector<2x64x32xf32> to vector<2x64x8xf32>
    %173 = arith.truncf %172 : vector<2x64x8xf32> to vector<2x64x8xbf16>
    %174 = vector.extract_strided_slice %170 {offsets = [0, 0, 0], sizes = [2, 8, 8], strides = [1, 1, 1]} : vector<2x8x32xf32> to vector<2x8x8xf32>
    %175 = arith.truncf %174 : vector<2x8x8xf32> to vector<2x8x8xbf16>
    "tpu.trace_start"() <{level = 10 : i32, message = "bqd,bkd->bqk"}> : () -> ()
    %cst_71 = arith.constant dense<0.000000e+00> : vector<2x64x8xf32>
    %176 = tpu.matmul %173, %175, %cst_71 {dimension_numbers = #tpu.dot_dimension_numbers<[2], [2], [1], [1], [0, 0, 0, 1, 1, 1], [0], [0]>} : vector<2x64x8xbf16>, vector<2x8x8xbf16>, vector<2x64x8xf32> -> vector<2x64x8xf32>
    "tpu.trace_stop"() : () -> ()
    %cst_72 = arith.constant dense<0xFF800000> : vector<2x64xf32>
    %177 = vector.multi_reduction <maximumf>, %176, %cst_72 [2] : vector<2x64x8xf32> to vector<2x64xf32>
    %178 = vector.shape_cast %177 : vector<2x64xf32> to vector<2x64x1xf32>
    %179 = vector.broadcast %178 : vector<2x64x1xf32> to vector<2x64x8xf32>
    %180 = arith.subf %176, %179 : vector<2x64x8xf32>
    %181 = math.exp %180 : vector<2x64x8xf32>
    %cst_73 = arith.constant dense<0.000000e+00> : vector<2x64xf32>
    %182 = vector.multi_reduction <add>, %181, %cst_73 [2] : vector<2x64x8xf32> to vector<2x64xf32>
    %183 = vector.shape_cast %182 : vector<2x64xf32> to vector<2x64x1xf32>
    %184 = tpu.reciprocal %183 {approx = true} : vector<2x64x1xf32> -> vector<2x64x1xf32>
    %185 = vector.broadcast %184 : vector<2x64x1xf32> to vector<2x64x8xf32>
    %186 = arith.mulf %181, %185 : vector<2x64x8xf32>
    %187 = arith.truncf %186 : vector<2x64x8xf32> to vector<2x64x8xbf16>
    %188 = vector.extract_strided_slice %171 {offsets = [0, 0, 0], sizes = [2, 8, 8], strides = [1, 1, 1]} : vector<2x8x32xf32> to vector<2x8x8xf32>
    %189 = arith.truncf %188 : vector<2x8x8xf32> to vector<2x8x8xbf16>
    "tpu.trace_start"() <{level = 10 : i32, message = "bqk,bkd->bqd"}> : () -> ()
    %cst_74 = arith.constant dense<0.000000e+00> : vector<2x64x8xf32>
    %190 = tpu.matmul %187, %189, %cst_74 {dimension_numbers = #tpu.dot_dimension_numbers<[2], [1], [1], [2], [0, 0, 0, 1, 1, 2], [0], [0]>} : vector<2x64x8xbf16>, vector<2x8x8xbf16>, vector<2x64x8xf32> -> vector<2x64x8xf32>
    "tpu.trace_stop"() : () -> ()
    %191 = vector.extract_strided_slice %160 {offsets = [0, 0, 8], sizes = [2, 64, 8], strides = [1, 1, 1]} : vector<2x64x32xf32> to vector<2x64x8xf32>
    %192 = arith.truncf %191 : vector<2x64x8xf32> to vector<2x64x8xbf16>
    %193 = vector.extract_strided_slice %170 {offsets = [0, 0, 8], sizes = [2, 8, 8], strides = [1, 1, 1]} : vector<2x8x32xf32> to vector<2x8x8xf32>
    %194 = arith.truncf %193 : vector<2x8x8xf32> to vector<2x8x8xbf16>
    "tpu.trace_start"() <{level = 10 : i32, message = "bqd,bkd->bqk"}> : () -> ()
    %cst_75 = arith.constant dense<0.000000e+00> : vector<2x64x8xf32>
    %195 = tpu.matmul %192, %194, %cst_75 {dimension_numbers = #tpu.dot_dimension_numbers<[2], [2], [1], [1], [0, 0, 0, 1, 1, 1], [0], [0]>} : vector<2x64x8xbf16>, vector<2x8x8xbf16>, vector<2x64x8xf32> -> vector<2x64x8xf32>
    "tpu.trace_stop"() : () -> ()
    %cst_76 = arith.constant dense<0xFF800000> : vector<2x64xf32>
    %196 = vector.multi_reduction <maximumf>, %195, %cst_76 [2] : vector<2x64x8xf32> to vector<2x64xf32>
    %197 = vector.shape_cast %196 : vector<2x64xf32> to vector<2x64x1xf32>
    %198 = vector.broadcast %197 : vector<2x64x1xf32> to vector<2x64x8xf32>
    %199 = arith.subf %195, %198 : vector<2x64x8xf32>
    %200 = math.exp %199 : vector<2x64x8xf32>
    %cst_77 = arith.constant dense<0.000000e+00> : vector<2x64xf32>
    %201 = vector.multi_reduction <add>, %200, %cst_77 [2] : vector<2x64x8xf32> to vector<2x64xf32>
    %202 = vector.shape_cast %201 : vector<2x64xf32> to vector<2x64x1xf32>
    %203 = tpu.reciprocal %202 {approx = true} : vector<2x64x1xf32> -> vector<2x64x1xf32>
    %204 = vector.broadcast %203 : vector<2x64x1xf32> to vector<2x64x8xf32>
    %205 = arith.mulf %200, %204 : vector<2x64x8xf32>
    %206 = arith.truncf %205 : vector<2x64x8xf32> to vector<2x64x8xbf16>
    %207 = vector.extract_strided_slice %171 {offsets = [0, 0, 8], sizes = [2, 8, 8], strides = [1, 1, 1]} : vector<2x8x32xf32> to vector<2x8x8xf32>
    %208 = arith.truncf %207 : vector<2x8x8xf32> to vector<2x8x8xbf16>
    "tpu.trace_start"() <{level = 10 : i32, message = "bqk,bkd->bqd"}> : () -> ()
    %cst_78 = arith.constant dense<0.000000e+00> : vector<2x64x8xf32>
    %209 = tpu.matmul %206, %208, %cst_78 {dimension_numbers = #tpu.dot_dimension_numbers<[2], [1], [1], [2], [0, 0, 0, 1, 1, 2], [0], [0]>} : vector<2x64x8xbf16>, vector<2x8x8xbf16>, vector<2x64x8xf32> -> vector<2x64x8xf32>
    "tpu.trace_stop"() : () -> ()
    %210 = vector.extract_strided_slice %160 {offsets = [0, 0, 16], sizes = [2, 64, 8], strides = [1, 1, 1]} : vector<2x64x32xf32> to vector<2x64x8xf32>
    %211 = arith.truncf %210 : vector<2x64x8xf32> to vector<2x64x8xbf16>
    %212 = vector.extract_strided_slice %170 {offsets = [0, 0, 16], sizes = [2, 8, 8], strides = [1, 1, 1]} : vector<2x8x32xf32> to vector<2x8x8xf32>
    %213 = arith.truncf %212 : vector<2x8x8xf32> to vector<2x8x8xbf16>
    "tpu.trace_start"() <{level = 10 : i32, message = "bqd,bkd->bqk"}> : () -> ()
    %cst_79 = arith.constant dense<0.000000e+00> : vector<2x64x8xf32>
    %214 = tpu.matmul %211, %213, %cst_79 {dimension_numbers = #tpu.dot_dimension_numbers<[2], [2], [1], [1], [0, 0, 0, 1, 1, 1], [0], [0]>} : vector<2x64x8xbf16>, vector<2x8x8xbf16>, vector<2x64x8xf32> -> vector<2x64x8xf32>
    "tpu.trace_stop"() : () -> ()
    %cst_80 = arith.constant dense<0xFF800000> : vector<2x64xf32>
    %215 = vector.multi_reduction <maximumf>, %214, %cst_80 [2] : vector<2x64x8xf32> to vector<2x64xf32>
    %216 = vector.shape_cast %215 : vector<2x64xf32> to vector<2x64x1xf32>
    %217 = vector.broadcast %216 : vector<2x64x1xf32> to vector<2x64x8xf32>
    %218 = arith.subf %214, %217 : vector<2x64x8xf32>
    %219 = math.exp %218 : vector<2x64x8xf32>
    %cst_81 = arith.constant dense<0.000000e+00> : vector<2x64xf32>
    %220 = vector.multi_reduction <add>, %219, %cst_81 [2] : vector<2x64x8xf32> to vector<2x64xf32>
    %221 = vector.shape_cast %220 : vector<2x64xf32> to vector<2x64x1xf32>
    %222 = tpu.reciprocal %221 {approx = true} : vector<2x64x1xf32> -> vector<2x64x1xf32>
    %223 = vector.broadcast %222 : vector<2x64x1xf32> to vector<2x64x8xf32>
    %224 = arith.mulf %219, %223 : vector<2x64x8xf32>
    %225 = arith.truncf %224 : vector<2x64x8xf32> to vector<2x64x8xbf16>
    %226 = vector.extract_strided_slice %171 {offsets = [0, 0, 16], sizes = [2, 8, 8], strides = [1, 1, 1]} : vector<2x8x32xf32> to vector<2x8x8xf32>
    %227 = arith.truncf %226 : vector<2x8x8xf32> to vector<2x8x8xbf16>
    "tpu.trace_start"() <{level = 10 : i32, message = "bqk,bkd->bqd"}> : () -> ()
    %cst_82 = arith.constant dense<0.000000e+00> : vector<2x64x8xf32>
    %228 = tpu.matmul %225, %227, %cst_82 {dimension_numbers = #tpu.dot_dimension_numbers<[2], [1], [1], [2], [0, 0, 0, 1, 1, 2], [0], [0]>} : vector<2x64x8xbf16>, vector<2x8x8xbf16>, vector<2x64x8xf32> -> vector<2x64x8xf32>
    "tpu.trace_stop"() : () -> ()
    %229 = vector.extract_strided_slice %160 {offsets = [0, 0, 24], sizes = [2, 64, 8], strides = [1, 1, 1]} : vector<2x64x32xf32> to vector<2x64x8xf32>
    %230 = arith.truncf %229 : vector<2x64x8xf32> to vector<2x64x8xbf16>
    %231 = vector.extract_strided_slice %170 {offsets = [0, 0, 24], sizes = [2, 8, 8], strides = [1, 1, 1]} : vector<2x8x32xf32> to vector<2x8x8xf32>
    %232 = arith.truncf %231 : vector<2x8x8xf32> to vector<2x8x8xbf16>
    "tpu.trace_start"() <{level = 10 : i32, message = "bqd,bkd->bqk"}> : () -> ()
    %cst_83 = arith.constant dense<0.000000e+00> : vector<2x64x8xf32>
    %233 = tpu.matmul %230, %232, %cst_83 {dimension_numbers = #tpu.dot_dimension_numbers<[2], [2], [1], [1], [0, 0, 0, 1, 1, 1], [0], [0]>} : vector<2x64x8xbf16>, vector<2x8x8xbf16>, vector<2x64x8xf32> -> vector<2x64x8xf32>
    "tpu.trace_stop"() : () -> ()
    %cst_84 = arith.constant dense<0xFF800000> : vector<2x64xf32>
    %234 = vector.multi_reduction <maximumf>, %233, %cst_84 [2] : vector<2x64x8xf32> to vector<2x64xf32>
    %235 = vector.shape_cast %234 : vector<2x64xf32> to vector<2x64x1xf32>
    %236 = vector.broadcast %235 : vector<2x64x1xf32> to vector<2x64x8xf32>
    %237 = arith.subf %233, %236 : vector<2x64x8xf32>
    %238 = math.exp %237 : vector<2x64x8xf32>
    %cst_85 = arith.constant dense<0.000000e+00> : vector<2x64xf32>
    %239 = vector.multi_reduction <add>, %238, %cst_85 [2] : vector<2x64x8xf32> to vector<2x64xf32>
    %240 = vector.shape_cast %239 : vector<2x64xf32> to vector<2x64x1xf32>
    %241 = tpu.reciprocal %240 {approx = true} : vector<2x64x1xf32> -> vector<2x64x1xf32>
    %242 = vector.broadcast %241 : vector<2x64x1xf32> to vector<2x64x8xf32>
    %243 = arith.mulf %238, %242 : vector<2x64x8xf32>
    %244 = arith.truncf %243 : vector<2x64x8xf32> to vector<2x64x8xbf16>
    %245 = vector.extract_strided_slice %171 {offsets = [0, 0, 24], sizes = [2, 8, 8], strides = [1, 1, 1]} : vector<2x8x32xf32> to vector<2x8x8xf32>
    %246 = arith.truncf %245 : vector<2x8x8xf32> to vector<2x8x8xbf16>
    "tpu.trace_start"() <{level = 10 : i32, message = "bqk,bkd->bqd"}> : () -> ()
    %cst_86 = arith.constant dense<0.000000e+00> : vector<2x64x8xf32>
    %247 = tpu.matmul %244, %246, %cst_86 {dimension_numbers = #tpu.dot_dimension_numbers<[2], [1], [1], [2], [0, 0, 0, 1, 1, 2], [0], [0]>} : vector<2x64x8xbf16>, vector<2x8x8xbf16>, vector<2x64x8xf32> -> vector<2x64x8xf32>
    "tpu.trace_stop"() : () -> ()
    %248 = tpu.concatenate %190, %209, %228, %247 in 2 : vector<2x64x8xf32>, vector<2x64x8xf32>, vector<2x64x8xf32>, vector<2x64x8xf32> -> vector<2x64x32xf32>
    %249 = vector.shape_cast %248 : vector<2x64x32xf32> to vector<128x32xf32>
    %250 = arith.truncf %249 : vector<128x32xf32> to vector<128x32xbf16>
    %c0_87 = arith.constant 0 : index
    %c0_88 = arith.constant 0 : index
    %251 = vector.load %arg23[%c0_87, %c0_88] : memref<32x32xbf16, #tpu.memory_space<vmem>>, vector<32x32xbf16>
    %cst_89 = arith.constant dense<0.000000e+00> : vector<128x32xf32>
    %252 = tpu.matmul %250, %251, %cst_89 {dimension_numbers = #tpu.dot_dimension_numbers<[1], [0], [0], [1], [0, 0, 1, 1], [], []>} : vector<128x32xbf16>, vector<32x32xbf16>, vector<128x32xf32> -> vector<128x32xf32>
    %c0_90 = arith.constant 0 : index
    %c0_91 = arith.constant 0 : index
    %253 = vector.load %arg24[%c0_90, %c0_91] : memref<1x32xf32, #tpu.memory_space<vmem>>, vector<1x32xf32>
    %254 = vector.broadcast %253 : vector<1x32xf32> to vector<128x32xf32>
    %255 = arith.addf %252, %254 : vector<128x32xf32>
    %256 = vector.shape_cast %255 : vector<128x32xf32> to vector<2x64x32xf32>
    %c0_92 = arith.constant 0 : index
    %c0_93 = arith.constant 0 : index
    %257 = vector.load %arg13[%c0_92, %c0_93] : memref<1x32xf32, #tpu.memory_space<vmem>>, vector<1x32xf32>
    %c0_94 = arith.constant 0 : index
    %c0_95 = arith.constant 0 : index
    %258 = vector.load %arg14[%c0_94, %c0_95] : memref<1x32xf32, #tpu.memory_space<vmem>>, vector<1x32xf32>
    %cst_96 = arith.constant dense<0.000000e+00> : vector<2x64xf32>
    %259 = vector.multi_reduction <add>, %256, %cst_96 [2] : vector<2x64x32xf32> to vector<2x64xf32>
    %260 = vector.shape_cast %259 : vector<2x64xf32> to vector<2x64x1xf32>
    %cst_97 = arith.constant 3.200000e+01 : f32
    %261 = vector.broadcast %cst_97 : f32 to vector<2x64x1xf32>
    %262 = arith.divf %260, %261 : vector<2x64x1xf32>
    %263 = vector.broadcast %262 : vector<2x64x1xf32> to vector<2x64x32xf32>
    %264 = arith.subf %256, %263 : vector<2x64x32xf32>
    %265 = arith.mulf %264, %264 : vector<2x64x32xf32>
    %cst_98 = arith.constant dense<0.000000e+00> : vector<2x64xf32>
    %266 = vector.multi_reduction <add>, %265, %cst_98 [2] : vector<2x64x32xf32> to vector<2x64xf32>
    %267 = vector.shape_cast %266 : vector<2x64xf32> to vector<2x64x1xf32>
    %cst_99 = arith.constant 3.200000e+01 : f32
    %268 = vector.broadcast %cst_99 : f32 to vector<2x64x1xf32>
    %269 = arith.divf %267, %268 : vector<2x64x1xf32>
    %270 = vector.broadcast %262 : vector<2x64x1xf32> to vector<2x64x32xf32>
    %271 = arith.subf %256, %270 : vector<2x64x32xf32>
    %cst_100 = arith.constant 9.99999974E-6 : f32
    %272 = vector.broadcast %cst_100 : f32 to vector<2x64x1xf32>
    %273 = arith.addf %269, %272 : vector<2x64x1xf32>
    %274 = math.rsqrt %273 : vector<2x64x1xf32>
    %275 = vector.broadcast %274 : vector<2x64x1xf32> to vector<2x64x32xf32>
    %276 = arith.mulf %271, %275 : vector<2x64x32xf32>
    %277 = vector.shape_cast %257 : vector<1x32xf32> to vector<1x1x32xf32>
    %278 = vector.broadcast %277 : vector<1x1x32xf32> to vector<2x64x32xf32>
    %279 = arith.mulf %276, %278 : vector<2x64x32xf32>
    %280 = vector.shape_cast %258 : vector<1x32xf32> to vector<1x1x32xf32>
    %281 = vector.broadcast %280 : vector<1x1x32xf32> to vector<2x64x32xf32>
    %282 = arith.addf %279, %281 : vector<2x64x32xf32>
    %c0_101 = arith.constant 0 : index
    %c0_102 = arith.constant 0 : index
    %283 = memref.load %arg25[%c0_101, %c0_102] : memref<1x1xf32, #tpu.memory_space<smem>>
    %284 = vector.broadcast %283 : f32 to vector<2x64x32xf32>
    %285 = arith.mulf %284, %282 : vector<2x64x32xf32>
    %286 = arith.addf %125, %285 : vector<2x64x32xf32>
    %c0_103 = arith.constant 0 : index
    %c0_104 = arith.constant 0 : index
    %c0_105 = arith.constant 0 : index
    %287 = vector.load %arg26[%c0_103, %c0_104, %c0_105] : memref<2x64x32xf32, #tpu.memory_space<vmem>>, vector<2x64x32xf32>
    tpu.vector_store %arg26[%c0_103, %c0_104, %c0_105], %286 {strides = array<i32>} : memref<2x64x32xf32, #tpu.memory_space<vmem>>, vector<2x64x32xf32>,
    return
  }
  func.func @transform_0(%arg0: i32) -> (i32, i32, i32) {
    %c0_i32 = arith.constant 0 : i32
    %c0_i32_0 = arith.constant 0 : i32
    %c0_i32_1 = arith.constant 0 : i32
    return %arg0, %c0_i32, %c0_i32_0 : i32, i32, i32
  }
  func.func @transform_1(%arg0: i32) -> (i32, i32, i32) {
    %c0_i32 = arith.constant 0 : i32
    %c0_i32_0 = arith.constant 0 : i32
    %c0_i32_1 = arith.constant 0 : i32
    return %arg0, %c0_i32, %c0_i32_0 : i32, i32, i32
  }
  func.func @transform_2(%arg0: i32) -> (i32, i32) {
    %c0_i32 = arith.constant 0 : i32
    %c0_i32_0 = arith.constant 0 : i32
    %c0_i32_1 = arith.constant 0 : i32
    return %c0_i32, %c0_i32_0 : i32, i32
  }
  func.func @transform_3(%arg0: i32) -> (i32, i32) {
    %c0_i32 = arith.constant 0 : i32
    %c0_i32_0 = arith.constant 0 : i32
    %c0_i32_1 = arith.constant 0 : i32
    return %c0_i32, %c0_i32_0 : i32, i32
  }
  func.func @transform_4(%arg0: i32) -> (i32, i32) {
    %c0_i32 = arith.constant 0 : i32
    %c0_i32_0 = arith.constant 0 : i32
    %c0_i32_1 = arith.constant 0 : i32
    return %c0_i32, %c0_i32_0 : i32, i32
  }
  func.func @transform_5(%arg0: i32) -> (i32, i32) {
    %c0_i32 = arith.constant 0 : i32
    %c0_i32_0 = arith.constant 0 : i32
    %c0_i32_1 = arith.constant 0 : i32
    return %c0_i32, %c0_i32_0 : i32, i32
  }
  func.func @transform_6(%arg0: i32) -> (i32, i32) {
    %c0_i32 = arith.constant 0 : i32
    %c0_i32_0 = arith.constant 0 : i32
    %c0_i32_1 = arith.constant 0 : i32
    return %c0_i32, %c0_i32_0 : i32, i32
  }
  func.func @transform_7(%arg0: i32) -> (i32, i32) {
    %c0_i32 = arith.constant 0 : i32
    %c0_i32_0 = arith.constant 0 : i32
    %c0_i32_1 = arith.constant 0 : i32
    return %c0_i32, %c0_i32_0 : i32, i32
  }
  func.func @transform_8(%arg0: i32) -> (i32, i32) {
    %c0_i32 = arith.constant 0 : i32
    %c0_i32_0 = arith.constant 0 : i32
    %c0_i32_1 = arith.constant 0 : i32
    return %c0_i32, %c0_i32_0 : i32, i32
  }
  func.func @transform_9(%arg0: i32) -> (i32, i32) {
    %c0_i32 = arith.constant 0 : i32
    %c0_i32_0 = arith.constant 0 : i32
    %c0_i32_1 = arith.constant 0 : i32
    return %c0_i32, %c0_i32_0 : i32, i32
  }
  func.func @transform_10(%arg0: i32) -> (i32, i32) {
    %c0_i32 = arith.constant 0 : i32
    %c0_i32_0 = arith.constant 0 : i32
    %c0_i32_1 = arith.constant 0 : i32
    return %c0_i32, %c0_i32_0 : i32, i32
  }
  func.func @transform_11(%arg0: i32) -> (i32, i32) {
    %c0_i32 = arith.constant 0 : i32
    %c0_i32_0 = arith.constant 0 : i32
    %c0_i32_1 = arith.constant 0 : i32
    return %c0_i32, %c0_i32_0 : i32, i32
  }
  func.func @transform_12(%arg0: i32) -> (i32, i32) {
    %c0_i32 = arith.constant 0 : i32
    %c0_i32_0 = arith.constant 0 : i32
    %c0_i32_1 = arith.constant 0 : i32
    return %c0_i32, %c0_i32_0 : i32, i32
  }
  func.func @transform_13(%arg0: i32) -> (i32, i32) {
    %c0_i32 = arith.constant 0 : i32
    %c0_i32_0 = arith.constant 0 : i32
    %c0_i32_1 = arith.constant 0 : i32
    return %c0_i32, %c0_i32_0 : i32, i32
  }
  func.func @transform_14(%arg0: i32) -> (i32, i32) {
    %c0_i32 = arith.constant 0 : i32
    %c0_i32_0 = arith.constant 0 : i32
    %c0_i32_1 = arith.constant 0 : i32
    return %c0_i32, %c0_i32_0 : i32, i32
  }
  func.func @transform_15(%arg0: i32) -> (i32, i32) {
    %c0_i32 = arith.constant 0 : i32
    %c0_i32_0 = arith.constant 0 : i32
    %c0_i32_1 = arith.constant 0 : i32
    return %c0_i32, %c0_i32_0 : i32, i32
  }
  func.func @transform_16(%arg0: i32) -> (i32, i32) {
    %c0_i32 = arith.constant 0 : i32
    %c0_i32_0 = arith.constant 0 : i32
    %c0_i32_1 = arith.constant 0 : i32
    return %c0_i32, %c0_i32_0 : i32, i32
  }
  func.func @transform_17(%arg0: i32) -> (i32, i32) {
    %c0_i32 = arith.constant 0 : i32
    %c0_i32_0 = arith.constant 0 : i32
    %c0_i32_1 = arith.constant 0 : i32
    return %c0_i32, %c0_i32_0 : i32, i32
  }
  func.func @transform_18(%arg0: i32) -> (i32, i32) {
    %c0_i32 = arith.constant 0 : i32
    %c0_i32_0 = arith.constant 0 : i32
    %c0_i32_1 = arith.constant 0 : i32
    return %c0_i32, %c0_i32_0 : i32, i32
  }
  func.func @transform_19(%arg0: i32) -> (i32, i32) {
    %c0_i32 = arith.constant 0 : i32
    %c0_i32_0 = arith.constant 0 : i32
    %c0_i32_1 = arith.constant 0 : i32
    return %c0_i32, %c0_i32_0 : i32, i32
  }
  func.func @transform_20(%arg0: i32) -> (i32, i32) {
    %c0_i32 = arith.constant 0 : i32
    %c0_i32_0 = arith.constant 0 : i32
    %c0_i32_1 = arith.constant 0 : i32
    return %c0_i32, %c0_i32_0 : i32, i32
  }
  func.func @transform_21(%arg0: i32) -> (i32, i32) {
    %c0_i32 = arith.constant 0 : i32
    %c0_i32_0 = arith.constant 0 : i32
    %c0_i32_1 = arith.constant 0 : i32
    return %c0_i32, %c0_i32_0 : i32, i32
  }
  func.func @transform_22(%arg0: i32) -> (i32, i32) {
    %c0_i32 = arith.constant 0 : i32
    %c0_i32_0 = arith.constant 0 : i32
    %c0_i32_1 = arith.constant 0 : i32
    return %c0_i32, %c0_i32_0 : i32, i32
  }
  func.func @transform_23(%arg0: i32) -> (i32, i32) {
    %c0_i32 = arith.constant 0 : i32
    %c0_i32_0 = arith.constant 0 : i32
    %c0_i32_1 = arith.constant 0 : i32
    return %c0_i32, %c0_i32_0 : i32, i32
  }
  func.func @transform_24(%arg0: i32) -> (i32, i32) {
    %c0_i32 = arith.constant 0 : i32
    %c0_i32_0 = arith.constant 0 : i32
    %c0_i32_1 = arith.constant 0 : i32
    return %c0_i32, %c0_i32_0 : i32, i32
  }
  func.func @transform_25(%arg0: i32) -> (i32, i32, i32) {
    %c0_i32 = arith.constant 0 : i32
    %c0_i32_0 = arith.constant 0 : i32
    %c0_i32_1 = arith.constant 0 : i32
    return %arg0, %c0_i32, %c0_i32_0 : i32, i32, i32
  }
}

</mosaic_0001>

<bundles_post_ra>
// kernel: tpu_custom_call.1
= control target key start
LH: loop header
LB: loop body
LE: loop exit
PB: predicated region body
PF: predicated region fallthrough
CT: control target
= control target key end

     0   :  { %vm331_vm0 = vcmask 261120   ;;  %v6345_v3 = vmov 0.0   ;;  %vm6346_vm1 = vmmov 0   ;;  %v6347_v10 = vmov 0   ;;  %s9054_s0 = inlined_call_operand.vmem [shape: f32[2,64,32], index: 0, kind: input, shape index: {}]   ;;  %s9055_s1 = inlined_call_operand.vmem [shape: bf16[2,24,64], index: 1, kind: input, shape index: {}]   ;;  %s9056_s2 = inlined_call_operand.vmem [shape: bf16[8,24], index: 2, kind: input, shape index: {}]   ;;  %s9057_s3 = inlined_call_operand.vmem [shape: f32[8,1], index: 3, kind: input, shape index: {}]   ;;  %s9058_s4 = inlined_call_operand.vmem [shape: bf16[64,32], index: 4, kind: input, shape index: {}]   ;;  %s9059_s14 = inlined_call_operand.vmem [shape: bf16[32,96], index: 14, kind: input, shape index: {}]   ;;  %s9060_s6 = inlined_call_operand.vmem [shape: f32[1,32], index: 6, kind: input, shape index: {}]   ;;  %s9061_s7 = inlined_call_operand.vmem [shape: f32[1,32], index: 7, kind: input, shape index: {}]   ;;  %s9062_s5 = inlined_call_operand.vmem [shape: f32[1,32], index: 5, kind: input, shape index: {}]   ;;  %s9063_s15 = inlined_call_operand.vmem [shape: f32[64,96], index: 15, kind: input, shape index: {}]   ;;  %s9064_s16 = inlined_call_operand.vmem [shape: bf16[32,32], index: 16, kind: input, shape index: {}]   ;;  %s9065_s20 = inlined_call_operand.vmem [shape: bf16[32,64], index: 20, kind: input, shape index: {}]   ;;  %s9066_s18 = inlined_call_operand.vmem [shape: bf16[32,32], index: 18, kind: input, shape index: {}]   ;;  %s9067_s17 = inlined_call_operand.vmem [shape: f32[1,32], index: 17, kind: input, shape index: {}]   ;;  %s9068_s21 = inlined_call_operand.vmem [shape: f32[8,64], index: 21, kind: input, shape index: {}]   ;;  %s9069_s10 = inlined_call_operand.vmem [shape: f32[1,32], index: 10, kind: input, shape index: {}]   ;;  %s9070_s11 = inlined_call_operand.vmem [shape: f32[1,32], index: 11, kind: input, shape index: {}]   ;;  %s9071_s8 = inlined_call_operand.vmem [shape: f32[1,32], index: 8, kind: input, shape index: {}]   ;;  %s9072_s9 = inlined_call_operand.vmem [shape: f32[1,32], index: 9, kind: input, shape index: {}]   ;;  %s9073_s19 = inlined_call_operand.vmem [shape: f32[64,32], index: 19, kind: input, shape index: {}]   ;;  %s9074_s22 = inlined_call_operand.vmem [shape: bf16[32,32], index: 22, kind: input, shape index: {}]   ;;  %s9075_s23 = inlined_call_operand.vmem [shape: f32[1,32], index: 23, kind: input, shape index: {}]   ;;  %s9076_s12 = inlined_call_operand.vmem [shape: f32[1,32], index: 12, kind: input, shape index: {}]   ;;  %s9077_s13 = inlined_call_operand.vmem [shape: f32[1,32], index: 13, kind: input, shape index: {}]   ;;  %s9078_s24 = inlined_call_operand.<no memory space> [shape: f32[1,1], index: 24, kind: input, shape index: {}]   ;;  %s9079_s25 = inlined_call_operand.vmem [shape: f32[2,64,32], index: 25, kind: output, shape index: {}]  }
   0x1   :  { %9101 = sst [smem:[#allocation35_spill]] %s9054_s0  ;;  %5360 = vmatprep.subr.bf16.mxu0 %v6345_v3  ;;  %5368 = vmatprep.subr.bf16.mxu1 %v6345_v3  ;;  %vm124_vm2 = vcmask 1043456   ;;  %vm120_vm3 = vcmask 195584   ;;  %vm278_vm4 = vcmask 523264   ;;  %vm2245_vm7 = vcmask 64512  }
   0x2   :  { %9102 = sst [smem:[#allocation36_spill]] %s9055_s1  ;;  %5364 = vmatprep.mubr.msk.bf16.mxu0 %vm6346_vm1, %v6345_v3  ;;  %5372 = vmatprep.mubr.msk.bf16.mxu1 %vm6346_vm1, %v6345_v3  ;;  %vm4556_vm8 = vcmask 130048  }
   0x3   :  { %9103 = sst [smem:[#allocation37_spill]] %s9056_s2  ;;  %5738 = vset.pattern.permute.xlu0 %v6347_v10  ;;  %s9112_s29 = sld [smem:[#allocation36_spill]] }
   0x4   :  { %9104 = sst [smem:[#allocation38_spill]] %s9057_s3  ;;  %s6354_s2 = smov 80  }
   0x5   :  { %9105 = sst [smem:[#allocation39_spill]] %s9058_s4  ;;  %s9114_s3 = sld [smem:[#allocation38_spill]] }
   0x6   :  { %9106 = sst [smem:[#allocation40_spill]] %s9059_s14  ;;  %s6348_s4 = smov 96  }
   0x7   :  { %9107 = sst [smem:[#allocation41_spill]] %s9060_s6  ;;  %s9111_s6 = sld [smem:[#allocation35_spill]] }
   0x8   :  { %9108 = sst [smem:[#allocation42_spill]] %s9061_s7  ;;  %s9113_s7 = sld [smem:[#allocation37_spill]] }
   0x9   :  { %9109 = sst [smem:[#allocation43_spill]] %s9062_s5  ;;  %v5859_v12 = vld [vmem:[%s9112_s29] sm:$0xff]   ;;  %v5860_v13 = vld [vmem:[%s9112_s29 + $0xc] sm:$0xff]   ;;  %v5861_v16 = vld [vmem:[%s9112_s29 + $0x8] ss:$0 sps:$4 sm:$0xff]   ;;  %s9115_s5 = sld [smem:[#allocation39_spill]] }
   0xa   :  { %9110 = sst [smem:[#allocation44_spill]] %s9063_s15  ;;  %5361 = vmatpush3.bf16.msra.mxu0 %v5859_v12  ;;  %5369 = vmatpush3.bf16.msra.mxu1 %v5860_v13  ;;  %v5862_v19 = vld [vmem:[%s9112_s29 + $0x14] ss:$0 sps:$4 sm:$0xff]   ;;  %v126_v20 = vsel %vm124_vm2, %v5861_v16, 0  ;;  %s9116_s30 = sld [smem:[#allocation40_spill]] }
   0xb   :  { %5362 = vmatprep.subr.bf16.mxu0 %v6345_v3  ;;  %5370 = vmatprep.subr.bf16.mxu1 %v6345_v3  ;;  %v178_v21 = vsel %vm124_vm2, %v5862_v19, 0  ;;  %v105_v41 = vld [vmem:[%s9114_s3] sm:$0xff]  ;;  %s9118_s28 = sld [smem:[#allocation42_spill]]  ;;  %s9119_s0 = sld [smem:[#allocation43_spill]] }
   0xc   :  { %s6353_s29 = smov 104   ;;  %s6357_s3 = smov 16  }
   0xd   :  { %v6492_v0 = vld [vmem:[%s9111_s6 + $0x10] sm:$0xff]  ;;  %v6497_v1 = vld [vmem:[%s9111_s6] sm:$0xff]  ;;  %v6502_v2 = vld [vmem:[%s9111_s6 + $0x18] sm:$0xff] }
   0xe   :  { %v338_v4 = vsel %vm331_vm0, %v6492_v0, 0.0  ;;  %v332_v5 = vsel %vm331_vm0, %v6497_v1, 0.0  ;;  %v6513_v6 = vld [vmem:[%s9111_s6 + $0x8] sm:$0xff]  ;;  %v341_v7 = vsel %vm331_vm0, %v6502_v2, 0.0  ;;  %v6531_v11 = vld [vmem:[%s9111_s6 + $0x20] sm:$0xff]  ;;  %v6549_v17 = vld [vmem:[%s9111_s6 + $0x38] sm:$0xff]  ;;  %5363 = vmatpush3.bf16.msra.mxu0 %v126_v20  ;;  %5371 = vmatpush3.bf16.msra.mxu1 %v178_v21 }
   0xf   :  { %339 = vadd.xlane.f32.xlu1 %v338_v4  ;;  %333 = vadd.xlane.f32.xlu0 %v332_v5  ;;  %v335_v8 = vsel %vm331_vm0, %v6513_v6, 0.0  ;;  %v6526_v9 = vld [vmem:[%s9111_s6 + $0x28] sm:$0xff]  ;;  %v344_v15 = vsel %vm331_vm0, %v6531_v11, 0.0  ;;  %v6554_v18 = vld [vmem:[%s9111_s6 + $0x30] sm:$0xff]  ;;  %v353_v22 = vsel %vm331_vm0, %v6549_v17, 0.0  ;;  %v6575_v25 = vld [vmem:[%s9111_s6 + $0x40] sm:$0xff] }
  0x10   :  { %v347_v14 = vsel %vm331_vm0, %v6526_v9, 0.0  ;;  %v350_v23 = vsel %vm331_vm0, %v6554_v18, 0.0  ;;  %v6570_v24 = vld [vmem:[%s9111_s6 + $0x48] sm:$0xff]  ;;  %v104_v26 = vld [vmem:[%s9113_s7] sm:$0xf]  ;;  %5376 = vmatprep.subr.bf16.mxu1 %v6345_v3  ;;  %v356_v28 = vsel %vm331_vm0, %v6575_v25, 0.0 }
  0x11   :  { %v359_v27 = vsel %vm331_vm0, %v6570_v24, 0.0  ;;  %5365 = vmatmul.mubr.msk.bf16.vlgmr.msra.gmra.mrb[0].mxu0 %vm120_vm3, %v104_v26  ;;  %5373 = vmatmul.mubr.msk.bf16.vlgmr.msra.gmra.mrb[0].mxu1 %vm120_vm3, %v104_v26  ;;  %v6590_v29 = vld [vmem:[%s9111_s6 + $0x58] sm:$0xff]  ;;  %v6595_v30 = vld [vmem:[%s9111_s6 + $0x50] sm:$0xff]  ;;  %v6606_v33 = vld [vmem:[%s9111_s6 + $0x60] sm:$0xff]  ;;  %s6356_s7 = smov 8  }
  0x12   :  { %5384 = vmatprep.mubr.msk.bf16.mxu1 %vm6346_vm1, %v6345_v3  ;;  %v365_v31 = vsel %vm331_vm0, %v6590_v29, 0.0  ;;  %v362_v32 = vsel %vm331_vm0, %v6595_v30, 0.0  ;;  %v6611_v34 = vld [vmem:[%s9111_s6 + $0x68] sm:$0xff]  ;;  %v368_v35 = vsel %vm331_vm0, %v6606_v33, 0.0  ;;  %v6620_v37 = vld [vmem:[%s9111_s6 + $0x70] sm:$0xff]  ;;  %v6625_v38 = vld [vmem:[%s9111_s6 + $0x78] sm:$0xff] }
  0x13   :  { %342 = vadd.xlane.f32.xlu1 %v341_v7  ;;  %336 = vadd.xlane.f32.xlu0 %v335_v8  ;;  %v371_v36 = vsel %vm331_vm0, %v6611_v34, 0.0  ;;  %v374_v39 = vsel %vm331_vm0, %v6620_v37, 0.0  ;;  %v377_v40 = vsel %vm331_vm0, %v6625_v38, 0.0  ;;  %v5863_v42 = vld [vmem:[%s9115_s5] sm:$0xff]   ;;  %v5864_v43 = vld [vmem:[%s9115_s5 + $0x8] sm:$0xff]   ;;  %v5865_v44 = vld [vmem:[%s9115_s5 + $0x10] sm:$0xff]  }
  0x14   :  { %5377 = vmatpush3.bf16.msra.mxu1 %v5863_v42  ;;  %v5866_v45 = vld [vmem:[%s9115_s5 + $0x18] sm:$0xff]   ;;  %s9117_s5 = sld [smem:[#allocation41_spill]] }
  0x15   :  { %5378 = vmatprep.subr.bf16.mxu1 %v6345_v3 }
  0x17   :  { %348 = vadd.xlane.f32.xlu1 %v347_v14  ;;  %345 = vadd.xlane.f32.xlu0 %v344_v15 }
  0x18   :  { %5379 = vmatpush3.bf16.msra.mxu1 %v5864_v43 }
  0x19   :  { %5380 = vmatprep.subr.bf16.mxu1 %v6345_v3 }
  0x1b   :  { %354 = vadd.xlane.f32.xlu1 %v353_v22  ;;  %351 = vadd.xlane.f32.xlu0 %v350_v23 }
  0x1c   :  { %5381 = vmatpush3.bf16.msra.mxu1 %v5865_v44 }
  0x1d   :  { %5382 = vmatprep.subr.bf16.mxu1 %v6345_v3 }
  0x1f   :  { %360 = vadd.xlane.f32.xlu1 %v359_v27  ;;  %357 = vadd.xlane.f32.xlu0 %v356_v28 }
  0x20   :  { %5383 = vmatpush3.bf16.msra.mxu1 %v5866_v45 }
  0x23   :  { %366 = vadd.xlane.f32.xlu1 %v365_v31  ;;  %363 = vadd.xlane.f32.xlu0 %v362_v32 }
  0x27   :  { %369 = vadd.xlane.f32.xlu0 %v368_v35  ;;  %372 = vadd.xlane.f32.xlu1 %v371_v36 }
  0x2b   :  { %375 = vadd.xlane.f32.xlu0 %v374_v39  ;;  %378 = vadd.xlane.f32.xlu1 %v377_v40 }
  0x41   :  { %108 = vperm.xlu0 %5738, %v105_v41  }
  0x9c   :  { %v340_v46 = vpop.xlane.xlu1 %339  ;;  %v334_v47 = vpop.xlane.xlu0 %333 }
  0x9d   :  { %v383_v48 = vmul.f32 0.03125, %v340_v46  ;;  %v381_v49 = vmul.f32 0.03125, %v334_v47 }
  0x9f   :  { %v6650_v50 = vsub.f32 %v6497_v1, %v381_v49  ;;  %v6653_v53 = vsub.f32 %v6492_v0, %v383_v48 }
  0xa0   :  { %v343_v51 = vpop.xlane.xlu1 %342  ;;  %v337_v52 = vpop.xlane.xlu0 %336 }
  0xa1   :  { %v384_v54 = vmul.f32 0.03125, %v343_v51  ;;  %v382_v55 = vmul.f32 0.03125, %v337_v52  ;;  %v413_v56 = vmul.f32 %v6650_v50, %v6650_v50  ;;  %v415_v63 = vmul.f32 %v6653_v53, %v6653_v53 }
  0xa3   :  { %v6658_v57 = vsub.f32 %v6513_v6, %v382_v55  ;;  %v429_v58 = vsel %vm331_vm0, %v413_v56, 0.0  ;;  %v6662_v61 = vsub.f32 %v6502_v2, %v384_v54  ;;  %v435_v6 = vsel %vm331_vm0, %v415_v63, 0.0 }
  0xa4   :  { %v349_v59 = vpop.xlane.xlu1 %348  ;;  %430 = vadd.xlane.f32.xlu1 %v429_v58  ;;  %v346_v60 = vpop.xlane.xlu0 %345 }
  0xa5   :  { %v414_v62 = vmul.f32 %v6658_v57, %v6658_v57  ;;  %v385_v0 = vmul.f32 0.03125, %v346_v60  ;;  %v386_v5 = vmul.f32 0.03125, %v349_v59  ;;  %v416_v2 = vmul.f32 %v6662_v61, %v6662_v61 }
  0xa7   :  { %v432_v1 = vsel %vm331_vm0, %v414_v62, 0.0  ;;  %v6671_v7 = vsub.f32 %v6531_v11, %v385_v0  ;;  %v6676_v12 = vsub.f32 %v6526_v9, %v386_v5  ;;  %v438_v13 = vsel %vm331_vm0, %v416_v2, 0.0 }
  0xa8   :  { %v355_v4 = vpop.xlane.xlu1 %354  ;;  %433 = vadd.xlane.f32.xlu1 %v432_v1  ;;  %v352_v8 = vpop.xlane.xlu0 %351 }
  0xa9   :  { %v417_v14 = vmul.f32 %v6671_v7, %v6671_v7  ;;  %v387_v15 = vmul.f32 0.03125, %v352_v8  ;;  %v388_v16 = vmul.f32 0.03125, %v355_v4  ;;  %v418_v22 = vmul.f32 %v6676_v12, %v6676_v12 }
  0xab   :  { %v441_v20 = vsel %vm331_vm0, %v417_v14, 0.0  ;;  %v6683_v21 = vsub.f32 %v6554_v18, %v387_v15  ;;  %v6691_v26 = vsub.f32 %v6549_v17, %v388_v16  ;;  %v444_v28 = vsel %vm331_vm0, %v418_v22, 0.0 }
  0xac   :  { %v361_v10 = vpop.xlane.xlu1 %360  ;;  %436 = vadd.xlane.f32.xlu1 %v435_v6  ;;  %v358_v9 = vpop.xlane.xlu0 %357 }
  0xad   :  { %v419_v18 = vmul.f32 %v6683_v21, %v6683_v21  ;;  %v389_v31 = vmul.f32 0.03125, %v358_v9  ;;  %v420_v39 = vmul.f32 %v6691_v26, %v6691_v26 }
  0xaf   :  { %v447_v36 = vsel %vm331_vm0, %v419_v18, 0.0  ;;  %v6701_v17 = vsub.f32 %v6575_v25, %v389_v31  ;;  %v450_v41 = vsel %vm331_vm0, %v420_v39, 0.0 }
  0xb0   :  { %v367_v19 = vpop.xlane.xlu1 %366  ;;  %439 = vadd.xlane.f32.xlu1 %v438_v13  ;;  %v364_v35 = vpop.xlane.xlu0 %363 }
  0xb1   :  { %v392_v11 = vmul.f32 0.03125, %v367_v19  ;;  %v421_v42 = vmul.f32 %v6701_v17, %v6701_v17  ;;  %v391_v43 = vmul.f32 0.03125, %v364_v35 }
  0xb3   :  { %v6688_v23 = vsub.f32 %v6590_v29, %v392_v11  ;;  %v390_v29 = vmul.f32 0.03125, %v361_v10  ;;  %v453_v45 = vsel %vm331_vm0, %v421_v42, 0.0  ;;  %v6713_v25 = vsub.f32 %v6595_v30, %v391_v43 }
  0xb4   :  { %442 = vadd.xlane.f32.xlu1 %v441_v20  ;;  %v370_v44 = vpop.xlane.xlu0 %369  ;;  %v373_v48 = vpop.xlane.xlu1 %372 }
  0xb5   :  { %v424_v27 = vmul.f32 %v6688_v23, %v6688_v23  ;;  %v6706_v40 = vsub.f32 %v6570_v24, %v390_v29  ;;  %v393_v47 = vmul.f32 0.03125, %v370_v44  ;;  %v394_v51 = vmul.f32 0.03125, %v373_v48 }
  0xb6   :  { %v423_v52 = vmul.f32 %v6713_v25, %v6713_v25 }
  0xb7   :  { %v462_v32 = vsel %vm331_vm0, %v424_v27, 0.0  ;;  %v422_v46 = vmul.f32 %v6706_v40, %v6706_v40  ;;  %v6719_v49 = vsub.f32 %v6606_v33, %v393_v47  ;;  %v6724_v30 = vsub.f32 %v6611_v34, %v394_v51  ;;  %v5867_v33 = vld [vmem:[%s9116_s30] sm:$0xff]  }
  0xb8   :  { %463 = vadd.xlane.f32.xlu0 %v462_v32  ;;  %445 = vadd.xlane.f32.xlu1 %v444_v28  ;;  %v376_v54 = vpop.xlane.xlu0 %375  ;;  %v459_v55 = vsel %vm331_vm0, %v423_v52, 0.0  ;;  %v379_v59 = vpop.xlane.xlu1 %378 }
  0xb9   :  { %v456_v24 = vsel %vm331_vm0, %v422_v46, 0.0  ;;  %v425_v56 = vmul.f32 %v6719_v49, %v6719_v49  ;;  %v395_v58 = vmul.f32 0.03125, %v376_v54  ;;  %v396_v63 = vmul.f32 0.03125, %v379_v59  ;;  %5388 = vmatprep.subr.bf16.mxu1 %v5867_v33 }
  0xba   :  { %v426_v34 = vmul.f32 %v6724_v30, %v6724_v30 }
  0xbb   :  { %v465_v60 = vsel %vm331_vm0, %v425_v56, 0.0  ;;  %v6734_v62 = vsub.f32 %v6620_v37, %v395_v58  ;;  %v6739_v0 = vsub.f32 %v6625_v38, %v396_v63 }
  0xbc   :  { %448 = vadd.xlane.f32.xlu1 %v447_v36  ;;  %v468_v1 = vsel %vm331_vm0, %v426_v34, 0.0 }
  0xbd   :  { %v427_v4 = vmul.f32 %v6734_v62, %v6734_v62  ;;  %v428_v37 = vmul.f32 %v6739_v0, %v6739_v0 }
  0xbf   :  { %v471_v5 = vsel %vm331_vm0, %v427_v4, 0.0  ;;  %v474_v6 = vsel %vm331_vm0, %v428_v37, 0.0 }
  0xc0   :  { %451 = vadd.xlane.f32.xlu1 %v450_v41  ;;  %v109_v2 = vpop.permute.xlu0 %108 }
  0xc4   :  { %454 = vadd.xlane.f32.xlu1 %v453_v45 }
  0xc8   :  { %457 = vadd.xlane.f32.xlu1 %v456_v24  ;;  %v5868_v24 = vld [vmem:[%s9116_s30 + $0x8] sm:$0xff]   ;;  %s9120_s30 = sld [smem:[#allocation44_spill]] }
  0xcc   :  { %460 = vadd.xlane.f32.xlu1 %v459_v55 }
  0xd0   :  { %466 = vadd.xlane.f32.xlu1 %v465_v60 }
  0xd4   :  { %469 = vadd.xlane.f32.xlu1 %v468_v1 }
  0xd8   :  { %472 = vadd.xlane.f32.xlu1 %v471_v5 }
  0xdc   :  { %475 = vadd.xlane.f32.xlu1 %v474_v6  ;;  %v6756_v6 = vld [vmem:[%s9117_s5] ss:$0 sm:$0xff] }
  0xe4   :  { %v162_v8 = vpop.f32.mrb[0].mxu0  ;;  %v214_v10 = vpop.f32.mrb[0].mxu1 }
  0xe5   :  { %v163_v38 = vadd.f32 %v162_v8, %v109_v2  ;;  %v215_v13 = vadd.f32 %v214_v10, %v109_v2  ;;  %v5366_v14 = vpop.f32.mrb[1].mxu0  ;;  %v5374_v15 = vpop.f32.mrb[1].mxu1 }
  0xe6   :  { %v165_v16 = vpop.f32.mrb[2].mxu0  ;;  %v217_v19 = vpop.f32.mrb[2].mxu1 }
  0xe7   :  { %v222_v11 = vmul.f32 0.044715, %v163_v38  ;;  %v223_v20 = vmul.f32 0.044715, %v215_v13  ;;  %v5367_v22 = vpop.f32.mrb[3].mxu0  ;;  %v5375_v9 = vpop.f32.mrb[3].mxu1 }
  0xe8   :  { %v220_v39 = vmul.f32 0.5, %v163_v38  ;;  %v221_v42 = vmul.f32 0.5, %v215_v13 }
  0xe9   :  { %v224_v27 = vmul.f32 %v222_v11, %v163_v38  ;;  %v225_v28 = vmul.f32 %v223_v20, %v215_v13 }
  0xeb   :  { %v226_v18 = vmul.f32 %v224_v27, %v163_v38  ;;  %v227_v31 = vmul.f32 %v225_v28, %v215_v13 }
  0xed   :  { %v228_v32 = vadd.f32 %v226_v18, %v163_v38  ;;  %v229_v35 = vadd.f32 %v227_v31, %v215_v13 }
  0xef   :  { %v230_v29 = vmul.f32 0.7978846, %v228_v32  ;;  %v231_v36 = vmul.f32 0.7978846, %v229_v35 }
  0xf1   :  { %5877 = vtanh.f32 %v230_v29 }
  0xf2   :  { %5879 = vtanh.f32 %v231_v36 }
  0xfb   :  { %v5878_v41 = vpop.eup %5877 }
  0xfc   :  { %v5880_v43 = vpop.eup %5879  ;;  %v234_v44 = vadd.f32 1.0, %v5878_v41 }
  0xfd   :  { %v235_v45 = vadd.f32 1.0, %v5880_v43 }
  0xfe   :  { %v236_v46 = vmul.f32 %v234_v44, %v220_v39 }
  0xff   :  { %v237_v47 = vmul.f32 %v235_v45, %v221_v42 }
 0x101   :  { %v238_v48 = vpack.c.bf16 %v237_v47, %v236_v46 }
 0x103   :  { %5385 = vmatmul.mubr.msk.bf16.vlgmr.msra.gmra.mrb[4].mxu1 %vm278_vm4, %v238_v48 }
 0x104   :  { %5389 = vmatpush3.bf16.msra.mxu1 %v5867_v33 }
 0x105   :  { %5390 = vmatprep.subr.bf16.mxu1 %v5868_v24 }
 0x108   :  { %5391 = vmatpush3.bf16.msra.mxu1 %v5868_v24 }
 0x131   :  { %v431_v51 = vpop.xlane.xlu1 %430 }
 0x132   :  { %v477_v52 = vmul.f32 0.03125, %v431_v51 }
 0x134   :  { %v493_v54 = vadd.f32 1e-05, %v477_v52 }
 0x135   :  { %v434_v55 = vpop.xlane.xlu1 %433 }
 0x136   :  { %5881 = vrsqrt.f32 %v493_v54  ;;  %v478_v56 = vmul.f32 0.03125, %v434_v55 }
 0x138   :  { %v494_v58 = vadd.f32 1e-05, %v478_v56 }
 0x139   :  { %v437_v59 = vpop.xlane.xlu1 %436 }
 0x13a   :  { %5883 = vrsqrt.f32 %v494_v58  ;;  %v479_v60 = vmul.f32 0.03125, %v437_v59 }
 0x13c   :  { %v495_v63 = vadd.f32 1e-05, %v479_v60 }
 0x13d   :  { %v440_v34 = vpop.xlane.xlu1 %439 }
 0x13e   :  { %5885 = vrsqrt.f32 %v495_v63  ;;  %v480_v1 = vmul.f32 0.03125, %v440_v34 }
 0x140   :  { %v5882_v4 = vpop.eup %5881  ;;  %v496_v5 = vadd.f32 1e-05, %v480_v1 }
 0x141   :  { %v443_v37 = vpop.xlane.xlu1 %442  ;;  %v525_v33 = vmul.f32 %v5882_v4, %v6650_v50  ;;  %v6763_v50 = vld [vmem:[%s9118_s28] ss:$0 sm:$0xff] }
 0x142   :  { %5887 = vrsqrt.f32 %v496_v5  ;;  %v481_v2 = vmul.f32 0.03125, %v443_v37 }
 0x143   :  { %v547_v14 = vmul.f32 %v6756_v6, %v525_v33 }
 0x144   :  { %v5884_v8 = vpop.eup %5883  ;;  %v497_v10 = vadd.f32 1e-05, %v481_v2 }
 0x145   :  { %v446_v38 = vpop.xlane.xlu1 %445  ;;  %v526_v13 = vmul.f32 %v5884_v8, %v6658_v57  ;;  %v569_v9 = vadd.f32 %v6763_v50, %v547_v14  ;;  %v464_v29 = vpop.xlane.xlu0 %463 }
 0x146   :  { %5889 = vrsqrt.f32 %v497_v10  ;;  %v482_v15 = vmul.f32 0.03125, %v446_v38  ;;  %v488_v42 = vmul.f32 0.03125, %v464_v29 }
 0x147   :  { %v548_v16 = vmul.f32 %v6756_v6, %v526_v13 }
 0x148   :  { %v5886_v19 = vpop.eup %5885  ;;  %v498_v11 = vadd.f32 1e-05, %v482_v15  ;;  %v504_v51 = vadd.f32 1e-05, %v488_v42 }
 0x149   :  { %v527_v20 = vmul.f32 %v5886_v19, %v6653_v53  ;;  %v449_v22 = vpop.xlane.xlu1 %448  ;;  %v570_v57 = vadd.f32 %v6763_v50, %v548_v16 }
 0x14a   :  { %5891 = vrsqrt.f32 %v498_v11  ;;  %v483_v27 = vmul.f32 0.03125, %v449_v22 }
 0x14b   :  { %v585_v28 = vpack.c.bf16 %v570_v57, %v569_v9  ;;  %v549_v32 = vmul.f32 %v6756_v6, %v527_v20 }
 0x14c   :  { %v5888_v18 = vpop.eup %5887  ;;  %v499_v31 = vadd.f32 1e-05, %v483_v27 }
 0x14d   :  { %v528_v35 = vmul.f32 %v5888_v18, %v6662_v61  ;;  %v452_v36 = vpop.xlane.xlu1 %451  ;;  %5392 = vmatprep.mubr.msk.bf16.mxu1 %vm331_vm0, %v585_v28  ;;  %v571_v45 = vadd.f32 %v6763_v50, %v549_v32 }
 0x14e   :  { %5893 = vrsqrt.f32 %v499_v31  ;;  %v484_v53 = vmul.f32 0.03125, %v452_v36 }
 0x14f   :  { %v550_v39 = vmul.f32 %v6756_v6, %v528_v35 }
 0x150   :  { %v5890_v41 = vpop.eup %5889  ;;  %v500_v43 = vadd.f32 1e-05, %v484_v53 }
 0x151   :  { %v455_v44 = vpop.xlane.xlu1 %454  ;;  %v572_v46 = vadd.f32 %v6763_v50, %v550_v39  ;;  %v529_v47 = vmul.f32 %v5890_v41, %v6671_v7 }
 0x152   :  { %5895 = vrsqrt.f32 %v500_v43  ;;  %v485_v61 = vmul.f32 0.03125, %v455_v44 }
 0x153   :  { %v586_v48 = vpack.c.bf16 %v572_v46, %v571_v45  ;;  %v551_v56 = vmul.f32 %v6756_v6, %v529_v47 }
 0x154   :  { %v5892_v24 = vpop.eup %5891  ;;  %v501_v52 = vadd.f32 1e-05, %v485_v61 }
 0x155   :  { %v458_v54 = vpop.xlane.xlu1 %457  ;;  %5393 = vmatmul.mubr.msk.bf16.vlgmr.msra.gmra.mrb[8].mxu1 %vm331_vm0, %v586_v48  ;;  %v530_v55 = vmul.f32 %v5892_v24, %v6676_v12  ;;  %v573_v34 = vadd.f32 %v6763_v50, %v551_v56 }
 0x156   :  { %5897 = vrsqrt.f32 %v501_v52  ;;  %v486_v58 = vmul.f32 0.03125, %v458_v54 }
 0x157   :  { %v552_v59 = vmul.f32 %v6756_v6, %v530_v55  ;;  %5899 = vrsqrt.f32 %v504_v51 }
 0x158   :  { %v5894_v60 = vpop.eup %5893  ;;  %v502_v7 = vadd.f32 1e-05, %v486_v58 }
 0x159   :  { %v461_v63 = vpop.xlane.xlu1 %460  ;;  %v574_v1 = vadd.f32 %v6763_v50, %v552_v59  ;;  %v531_v4 = vmul.f32 %v5894_v60, %v6683_v21 }
 0x15a   :  { %5901 = vrsqrt.f32 %v502_v7  ;;  %v487_v5 = vmul.f32 0.03125, %v461_v63 }
 0x15b   :  { %v587_v37 = vpack.c.bf16 %v574_v1, %v573_v34  ;;  %v553_v10 = vmul.f32 %v6756_v6, %v531_v4 }
 0x15c   :  { %v5896_v12 = vpop.eup %5895  ;;  %v503_v33 = vadd.f32 1e-05, %v487_v5 }
 0x15d   :  { %v467_v2 = vpop.xlane.xlu1 %466  ;;  %5396 = vmatprep.mubr.msk.bf16.mxu1 %vm331_vm0, %v587_v37  ;;  %v532_v8 = vmul.f32 %v5896_v12, %v6691_v26  ;;  %v575_v21 = vadd.f32 %v6763_v50, %v553_v10 }
 0x15e   :  { %5903 = vrsqrt.f32 %v503_v33  ;;  %v489_v38 = vmul.f32 0.03125, %v467_v2 }
 0x15f   :  { %v554_v13 = vmul.f32 %v6756_v6, %v532_v8 }
 0x160   :  { %v5898_v14 = vpop.eup %5897  ;;  %v505_v15 = vadd.f32 1e-05, %v489_v38 }
 0x161   :  { %v470_v16 = vpop.xlane.xlu1 %469  ;;  %v576_v19 = vadd.f32 %v6763_v50, %v554_v13  ;;  %v533_v11 = vmul.f32 %v5898_v14, %v6701_v17  ;;  %v5900_v20 = vpop.eup %5899  ;;  %v732_v13 = vld [vmem:[%s9120_s30 + $0x10] sm:$0xff]  ;;  %v733_v14 = vld [vmem:[%s9120_s30 + $0x18] sm:$0xff] }
 0x162   :  { %5905 = vrsqrt.f32 %v505_v15  ;;  %v490_v22 = vmul.f32 0.03125, %v470_v16  ;;  %v536_v31 = vmul.f32 %v5900_v20, %v6688_v23  ;;  %v730_v16 = vld [vmem:[%s9120_s30] sm:$0xff] }
 0x163   :  { %v588_v9 = vpack.c.bf16 %v576_v19, %v575_v21  ;;  %v555_v18 = vmul.f32 %v6756_v6, %v533_v11  ;;  %v731_v21 = vld [vmem:[%s9120_s30 + $0x8] sm:$0xff] }
 0x164   :  { %v5902_v26 = vpop.eup %5901  ;;  %v506_v57 = vadd.f32 1e-05, %v490_v22  ;;  %v558_v42 = vmul.f32 %v6756_v6, %v536_v31  ;;  %v737_v31 = vld [vmem:[%s9120_s30 + $0x38] sm:$0xff] }
 0x165   :  { %v473_v27 = vpop.xlane.xlu1 %472  ;;  %5397 = vmatmul.mubr.msk.bf16.gmra.mrb[12].mxu1 %vm331_vm0, %v588_v9  ;;  %v534_v28 = vmul.f32 %v5902_v26, %v6706_v40  ;;  %v577_v53 = vadd.f32 %v6763_v50, %v555_v18  ;;  %v736_v18 = vld [vmem:[%s9120_s30 + $0x30] sm:$0xff] }
 0x166   :  { %5907 = vrsqrt.f32 %v506_v57  ;;  %v491_v32 = vmul.f32 0.03125, %v473_v27  ;;  %v580_v47 = vadd.f32 %v6763_v50, %v558_v42 }
 0x167   :  { %v556_v35 = vmul.f32 %v6756_v6, %v534_v28 }
 0x168   :  { %v5904_v17 = vpop.eup %5903  ;;  %v507_v29 = vadd.f32 1e-05, %v491_v32 }
 0x169   :  { %v476_v36 = vpop.xlane.xlu1 %475  ;;  %v578_v39 = vadd.f32 %v6763_v50, %v556_v35  ;;  %v535_v41 = vmul.f32 %v5904_v17, %v6713_v25  ;;  %v734_v35 = vld [vmem:[%s9120_s30 + $0x20] sm:$0xff]  ;;  %v735_v17 = vld [vmem:[%s9120_s30 + $0x28] sm:$0xff]  ;;  %s6349_s30 = smov 64  }
 0x16a   :  { %5909 = vrsqrt.f32 %v507_v29  ;;  %v492_v40 = vmul.f32 0.03125, %v476_v36 }
 0x16b   :  { %v589_v43 = vpack.c.bf16 %v578_v39, %v577_v53  ;;  %v557_v23 = vmul.f32 %v6756_v6, %v535_v41 }
 0x16c   :  { %v5906_v44 = vpop.eup %5905  ;;  %v508_v45 = vadd.f32 1e-05, %v492_v40 }
 0x16d   :  { %5400 = vmatprep.mubr.msk.bf16.mxu1 %vm331_vm0, %v589_v43  ;;  %v579_v46 = vadd.f32 %v6763_v50, %v557_v23  ;;  %v537_v61 = vmul.f32 %v5906_v44, %v6719_v49 }
 0x16e   :  { %5911 = vrsqrt.f32 %v508_v45 }
 0x16f   :  { %v590_v48 = vpack.c.bf16 %v580_v47, %v579_v46  ;;  %v559_v51 = vmul.f32 %v6756_v6, %v537_v61 }
 0x170   :  { %v5908_v25 = vpop.eup %5907 }
 0x171   :  { %5401 = vmatmul.mubr.msk.bf16.gmra.mrb[16].mxu1 %vm331_vm0, %v590_v48  ;;  %v538_v24 = vmul.f32 %v5908_v25, %v6724_v30  ;;  %v581_v55 = vadd.f32 %v6763_v50, %v559_v51 }
 0x173   :  { %v560_v52 = vmul.f32 %v6756_v6, %v538_v24 }
 0x174   :  { %v5910_v54 = vpop.eup %5909 }
 0x175   :  { %v582_v56 = vadd.f32 %v6763_v50, %v560_v52  ;;  %v539_v58 = vmul.f32 %v5910_v54, %v6734_v62  ;;  %v5055_v62 = vld [vmem:[%s9119_s0] ss:$0 sm:$0xff]  ;;  %s6352_s0 = smov 88  }
 0x177   :  { %v591_v59 = vpack.c.bf16 %v582_v56, %v581_v55  ;;  %v561_v7 = vmul.f32 %v6756_v6, %v539_v58 }
 0x178   :  { %v5912_v49 = vpop.eup %5911 }
 0x179   :  { %5404 = vmatprep.mubr.msk.bf16.mxu1 %vm331_vm0, %v591_v59  ;;  %v540_v60 = vmul.f32 %v5912_v49, %v6739_v0  ;;  %v583_v63 = vadd.f32 %v6763_v50, %v561_v7 }
 0x17b   :  { %v562_v30 = vmul.f32 %v6756_v6, %v540_v60 }
 0x17d   :  { %v584_v34 = vadd.f32 %v6763_v50, %v562_v30 }
 0x17f   :  { %v592_v1 = vpack.c.bf16 %v584_v34, %v583_v63 }
 0x181   :  { %5405 = vmatmul.mubr.msk.bf16.gmra.mrb[20].mxu1 %vm331_vm0, %v592_v1 }
 0x1d6   :  { %v316_v4 = vpop.f32.mrb[4].mxu1 }
 0x1d7   :  { %v317_v5 = vadd.f32 %v5055_v62, %v316_v4  ;;  %v5386_v37 = vpop.f32.mrb[5].mxu1 }
 0x1d8   :  { %v319_v12 = vpop.f32.mrb[6].mxu1 }
 0x1d9   :  { %vm323_vm5 = vcmp.ge.f32.partialorder %v317_v5, 0.0  ;;  %v325_v0 = vmul.f32 0.01, %v317_v5  ;;  %v320_v33 = vadd.f32 %v5055_v62, %v319_v12  ;;  %v5387_v2 = vpop.f32.mrb[7].mxu1 }
 0x1db   :  { %v6821_v6 = vsel %vm323_vm5, %v317_v5, %v325_v0  ;;  %vm324_vm6 = vcmp.ge.f32.partialorder %v320_v33, 0.0  ;;  %v326_v8 = vmul.f32 0.01, %v320_v33 }
 0x1dd   :  { %v6823_v50 = vsel %vm324_vm6, %v320_v33, %v326_v8 }
 0x1de   :  { %v2171_v10 = vpack.c.bf16 %v6823_v50, %v6821_v6 }
 0x228   :  { %v5394_v38 = vpop.f32.mrb[8].mxu1 }
 0x229   :  { %v667_v15 = vpop.f32.mrb[9].mxu1  ;;  %v740_v11 = vadd.f32 %v5394_v38, %v732_v13 }
 0x22a   :  { %v5395_v19 = vpop.f32.mrb[10].mxu1  ;;  %v738_v9 = vadd.f32 %v730_v16, %v667_v15 }
 0x22b   :  { %v741_v20 = vadd.f32 %v5395_v19, %v733_v14  ;;  %v670_v22 = vpop.f32.mrb[11].mxu1 }
 0x22c   :  { %v739_v26 = vadd.f32 %v731_v21, %v670_v22 }
 0x22d   :  { %v6839_v57 = vpack.c.bf16 %v741_v20, %v740_v11 }
 0x22e   :  { %v754_v27 = vpack.c.bf16 %v739_v26, %v738_v9 }
 0x22f   :  { %768 = vrot.lane.b32.xlu0 %v6839_v57, %s6348_s4 }
 0x230   :  { %766 = vrot.lane.b32.xlu1 %v754_v27, %s6348_s4  ;;  %5416 = vmatprep.mubr.msk.bf16.mxu1 %vm331_vm0, %v754_v27 }
 0x238   :  { %v5398_v28 = vpop.f32.mrb[12].mxu1 }
 0x239   :  { %v683_v32 = vpop.f32.mrb[13].mxu1  ;;  %v744_v36 = vadd.f32 %v5398_v28, %v736_v18 }
 0x23a   :  { %v5399_v29 = vpop.f32.mrb[14].mxu1  ;;  %v742_v41 = vadd.f32 %v734_v35, %v683_v32 }
 0x23b   :  { %v745_v53 = vadd.f32 %v5399_v29, %v737_v31  ;;  %v686_v39 = vpop.f32.mrb[15].mxu1 }
 0x23c   :  { %v743_v42 = vadd.f32 %v735_v17, %v686_v39 }
 0x23d   :  { %v6857_v40 = vpack.c.bf16 %v745_v53, %v744_v36 }
 0x23e   :  { %v756_v43 = vpack.c.bf16 %v743_v42, %v742_v41 }
 0x240   :  { %770 = vrot.lane.b32.xlu1 %v756_v43, %s6348_s4 }
 0x244   :  { %v5402_v23 = vpop.f32.mrb[16].mxu1 }
 0x245   :  { %v699_v44 = vpop.f32.mrb[17].mxu1  ;;  %v748_v46 = vadd.f32 %v5402_v23, %v732_v13 }
 0x246   :  { %v5403_v45 = vpop.f32.mrb[18].mxu1  ;;  %v746_v48 = vadd.f32 %v730_v16, %v699_v44 }
 0x247   :  { %v749_v47 = vadd.f32 %v5403_v45, %v733_v14  ;;  %v702_v61 = vpop.f32.mrb[19].mxu1 }
 0x248   :  { %v747_v25 = vadd.f32 %v731_v21, %v702_v61 }
 0x249   :  { %v6860_v24 = vpack.c.bf16 %v749_v47, %v748_v46 }
 0x24a   :  { %v6862_v51 = vpack.c.bf16 %v747_v25, %v746_v48 }
 0x24c   :  { %867 = vrot.lane.b32.xlu1 %v6862_v51, %s6348_s4  ;;  %5432 = vmatprep.mubr.msk.bf16.mxu0 %vm331_vm0, %v6862_v51 }
 0x250   :  { %772 = vrot.lane.b32.xlu1 %v6857_v40, %s6348_s4 }
 0x254   :  { %869 = vrot.lane.b32.xlu1 %v6860_v24, %s6348_s4  ;;  %v5406_v52 = vpop.f32.mrb[20].mxu1 }
 0x255   :  { %v715_v54 = vpop.f32.mrb[21].mxu1  ;;  %v752_v56 = vadd.f32 %v5406_v52, %v736_v18 }
 0x256   :  { %v5407_v55 = vpop.f32.mrb[22].mxu1  ;;  %v750_v49 = vadd.f32 %v734_v35, %v715_v54 }
 0x257   :  { %v753_v58 = vadd.f32 %v5407_v55, %v737_v31  ;;  %v718_v59 = vpop.f32.mrb[23].mxu1 }
 0x258   :  { %v751_v60 = vadd.f32 %v735_v17, %v718_v59 }
 0x259   :  { %v6872_v7 = vpack.c.bf16 %v753_v58, %v752_v56 }
 0x25a   :  { %v6874_v30 = vpack.c.bf16 %v751_v60, %v750_v49 }
 0x25b   :  { %873 = vrot.lane.b32.xlu0 %v6872_v7, %s6348_s4 }
 0x25c   :  { %871 = vrot.lane.b32.xlu1 %v6874_v30, %s6348_s4 }
 0x25f   :  { %1148 = vrot.lane.b32.xlu0 %v754_v27, %s6349_s30 }
 0x260   :  { %1150 = vrot.lane.b32.xlu1 %v6839_v57, %s6349_s30 }
 0x263   :  { %1152 = vrot.lane.b32.xlu0 %v756_v43, %s6349_s30 }
 0x267   :  { %1154 = vrot.lane.b32.xlu0 %v6857_v40, %s6349_s30 }
 0x2a1   :  { %v769_v1 = vpop.permute.xlu0 %768 }
 0x2a2   :  { %v767_v63 = vpop.permute.xlu1 %766  ;;  %v790_v62 = vsel %vm331_vm0, %v769_v1, 0 }
 0x2a3   :  { %5700 = vmatprep.subr.msk.bf16.mxu1 %vm331_vm0, %v767_v63  ;;  %v787_v34 = vsel %vm331_vm0, %v767_v63, 0 }
 0x2a4   :  { %5409 = vmatpush3.bf16.xpose.msra.mxu1 %v787_v34 }
 0x2a5   :  { %5701 = vmatprep.subr.msk.bf16.mxu1 %vm331_vm0, %v769_v1 }
 0x2ac   :  { %5411 = vmatpush3.bf16.xpose.msra.mxu1 %v790_v62 }
 0x2b2   :  { %v771_v4 = vpop.permute.xlu1 %770 }
 0x2b3   :  { %5702 = vmatprep.subr.msk.bf16.mxu1 %vm331_vm0, %v771_v4  ;;  %v793_v5 = vsel %vm331_vm0, %v771_v4, 0 }
 0x2b4   :  { %5413 = vmatpush3.bf16.xpose.msra.mxu1 %v793_v5 }
 0x2be   :  { %v868_v37 = vpop.permute.xlu1 %867 }
 0x2bf   :  { %5704 = vmatprep.subr.msk.bf16.mxu0 %vm331_vm0, %v868_v37  ;;  %v888_v12 = vsel %vm331_vm0, %v868_v37, 0 }
 0x2c0   :  { %5425 = vmatpush3.bf16.xpose.msra.mxu0 %v888_v12 }
 0x2c2   :  { %v773_v0 = vpop.permute.xlu1 %772 }
 0x2c3   :  { %5703 = vmatprep.subr.msk.bf16.mxu1 %vm331_vm0, %v773_v0  ;;  %v796_v33 = vsel %vm331_vm0, %v773_v0, 0 }
 0x2c4   :  { %5415 = vmatpush3.bf16.xpose.msra.mxu1 %v796_v33 }
 0x2c6   :  { %v870_v2 = vpop.permute.xlu1 %869 }
 0x2c7   :  { %5705 = vmatprep.subr.msk.bf16.mxu0 %vm331_vm0, %v870_v2  ;;  %v891_v8 = vsel %vm331_vm0, %v870_v2, 0 }
 0x2c8   :  { %5427 = vmatpush3.bf16.xpose.msra.mxu0 %v891_v8 }
 0x2cb   :  { %5417 = vmatmul.mubr.msk.bf16.vlgmr.msra.gmra.mrb[24].mxu1 %vm331_vm0, %v6839_v57 }
 0x2cc   :  { %5420 = vmatprep.mubr.msk.bf16.mxu1 %vm331_vm0, %v756_v43 }
 0x2cd   :  { %v874_v38 = vpop.permute.xlu0 %873 }
 0x2ce   :  { %v872_v13 = vpop.permute.xlu1 %871  ;;  %v897_v19 = vsel %vm331_vm0, %v874_v38, 0 }
 0x2cf   :  { %5706 = vmatprep.subr.msk.bf16.mxu0 %vm331_vm0, %v872_v13  ;;  %v894_v14 = vsel %vm331_vm0, %v872_v13, 0 }
 0x2d0   :  { %5429 = vmatpush3.bf16.xpose.msra.mxu0 %v894_v14 }
 0x2d1   :  { %5707 = vmatprep.subr.msk.bf16.mxu0 %vm331_vm0, %v874_v38  ;;  %v1149_v15 = vpop.permute.xlu0 %1148 }
 0x2d2   :  { %v1151_v16 = vpop.permute.xlu1 %1150  ;;  %5440 = vmatprep.subr.bf16.mxu1 %v1149_v15 }
 0x2d3   :  { %5421 = vmatmul.mubr.msk.bf16.gmra.mrb[28].mxu1 %vm331_vm0, %v6857_v40 }
 0x2d4   :  { %5441 = vmatpush3.bf16.msra.mxu1 %v1149_v15 }
 0x2d5   :  { %5442 = vmatprep.subr.bf16.mxu1 %v1151_v16  ;;  %v1153_v21 = vpop.permute.xlu0 %1152 }
 0x2d8   :  { %5443 = vmatpush3.bf16.msra.mxu1 %v1151_v16  ;;  %5431 = vmatpush3.bf16.xpose.msra.mxu0 %v897_v19 }
 0x2d9   :  { %5444 = vmatprep.subr.bf16.mxu1 %v1153_v21  ;;  %v1155_v11 = vpop.permute.xlu0 %1154 }
 0x2dc   :  { %5445 = vmatpush3.bf16.msra.mxu1 %v1153_v21 }
 0x2dd   :  { %5446 = vmatprep.subr.bf16.mxu1 %v1155_v11 }
 0x2df   :  { %5433 = vmatmul.mubr.msk.bf16.vlgmr.msra.gmra.mrb[4].mxu0 %vm331_vm0, %v6860_v24 }
 0x2e0   :  { %5447 = vmatpush3.bf16.msra.mxu1 %v1155_v11  ;;  %5436 = vmatprep.mubr.msk.bf16.mxu0 %vm331_vm0, %v6874_v30 }
 0x2e7   :  { %5437 = vmatmul.mubr.msk.bf16.gmra.mrb[8].mxu0 %vm331_vm0, %v6872_v7 }
 0x39e   :  { %v5418_v20 = vpop.f32.mrb[24].mxu1 }
 0x39f   :  { %v832_v22 = vpop.f32.mrb[25].mxu1  ;;  %v970_v9 = vsel %vm278_vm4, %v5418_v20, -inf }
 0x3a0   :  { %971 = vmax.xlane.f32.xlu0 %v970_v9  ;;  %v5419_v26 = vpop.f32.mrb[26].mxu1  ;;  %v964_v57 = vsel %vm278_vm4, %v832_v22, -inf }
 0x3a1   :  { %965 = vmax.xlane.f32.xlu1 %v964_v57  ;;  %v835_v27 = vpop.f32.mrb[27].mxu1  ;;  %v973_v18 = vsel %vm278_vm4, %v5419_v26, -inf }
 0x3a2   :  { %v967_v28 = vsel %vm278_vm4, %v835_v27, -inf }
 0x3a4   :  { %968 = vmax.xlane.f32.xlu0 %v967_v28 }
 0x3a5   :  { %974 = vmax.xlane.f32.xlu1 %v973_v18 }
 0x3a6   :  { %v5422_v31 = vpop.f32.mrb[28].mxu1 }
 0x3a7   :  { %v6917_v32 = vpop.f32.mrb[29].mxu1  ;;  %v982_v35 = vsel %vm278_vm4, %v5422_v31, -inf }
 0x3a8   :  { %983 = vmax.xlane.f32.xlu0 %v982_v35  ;;  %v5423_v17 = vpop.f32.mrb[30].mxu1  ;;  %v976_v53 = vsel %vm278_vm4, %v6917_v32, -inf }
 0x3a9   :  { %v6920_v29 = vpop.f32.mrb[31].mxu1  ;;  %v985_v36 = vsel %vm278_vm4, %v5423_v17, -inf }
 0x3aa   :  { %986 = vmax.xlane.f32.xlu1 %v985_v36  ;;  %v979_v39 = vsel %vm278_vm4, %v6920_v29, -inf }
 0x3ac   :  { %977 = vmax.xlane.f32.xlu0 %v976_v53 }
 0x3ae   :  { %980 = vmax.xlane.f32.xlu1 %v979_v39 }
 0x3b2   :  { %v6927_v41 = vpop.f32.mrb[4].mxu0 }
 0x3b3   :  { %v6929_v42 = vpop.f32.mrb[5].mxu0  ;;  %v994_v40 = vsel %vm278_vm4, %v6927_v41, -inf }
 0x3b4   :  { %995 = vmax.xlane.f32.xlu0 %v994_v40  ;;  %v6933_v43 = vpop.f32.mrb[6].mxu0  ;;  %v988_v45 = vsel %vm278_vm4, %v6929_v42, -inf }
 0x3b5   :  { %v6935_v23 = vpop.f32.mrb[7].mxu0  ;;  %v997_v44 = vsel %vm278_vm4, %v6933_v43, -inf }
 0x3b6   :  { %998 = vmax.xlane.f32.xlu1 %v997_v44  ;;  %v991_v46 = vsel %vm278_vm4, %v6935_v23, -inf }
 0x3b8   :  { %989 = vmax.xlane.f32.xlu0 %v988_v45 }
 0x3ba   :  { %992 = vmax.xlane.f32.xlu1 %v991_v46  ;;  %v6943_v47 = vpop.f32.mrb[8].mxu0 }
 0x3bb   :  { %v6945_v61 = vpop.f32.mrb[9].mxu0  ;;  %v1006_v48 = vsel %vm278_vm4, %v6943_v47, -inf }
 0x3bc   :  { %1007 = vmax.xlane.f32.xlu0 %v1006_v48  ;;  %v6949_v25 = vpop.f32.mrb[10].mxu0  ;;  %v1000_v55 = vsel %vm278_vm4, %v6945_v61, -inf }
 0x3bd   :  { %v6951_v52 = vpop.f32.mrb[11].mxu0  ;;  %v1009_v54 = vsel %vm278_vm4, %v6949_v25, -inf }
 0x3be   :  { %1010 = vmax.xlane.f32.xlu1 %v1009_v54  ;;  %v1003_v56 = vsel %vm278_vm4, %v6951_v52, -inf }
 0x3c0   :  { %1001 = vmax.xlane.f32.xlu0 %v1000_v55 }
 0x3c2   :  { %1004 = vmax.xlane.f32.xlu1 %v1003_v56 }
 0x3d3   :  { %1237 = vrot.lane.b32.xlu1 %v6862_v51, %s6349_s30 }
 0x3d6   :  { %1239 = vrot.lane.b32.xlu0 %v6860_v24, %s6349_s30 }
 0x42d   :  { %v972_v58 = vpop.xlane.xlu0 %971 }
 0x42e   :  { %v1014_v59 = vsub.f32 %v5418_v20, %v972_v58  ;;  %v966_v49 = vpop.xlane.xlu1 %965 }
 0x42f   :  { %v1012_v60 = vsub.f32 %v832_v22, %v966_v49 }
 0x430   :  { %v1032_v63 = vmul.f32 1.442695, %v1014_v59 }
 0x431   :  { %v1028_v34 = vmul.f32 1.442695, %v1012_v60  ;;  %v969_v1 = vpop.xlane.xlu0 %968 }
 0x432   :  { %5913 = vpow2.f32 %v1032_v63  ;;  %v1013_v62 = vsub.f32 %v835_v27, %v969_v1  ;;  %v975_v4 = vpop.xlane.xlu1 %974 }
 0x433   :  { %v1015_v5 = vsub.f32 %v5419_v26, %v975_v4  ;;  %5915 = vpow2.f32 %v1028_v34 }
 0x434   :  { %v1030_v37 = vmul.f32 1.442695, %v1013_v62 }
 0x435   :  { %v1034_v12 = vmul.f32 1.442695, %v1015_v5  ;;  %v984_v0 = vpop.xlane.xlu0 %983 }
 0x436   :  { %v1018_v33 = vsub.f32 %v5422_v31, %v984_v0 }
 0x437   :  { %5917 = vpow2.f32 %v1034_v12  ;;  %v987_v51 = vpop.xlane.xlu1 %986 }
 0x438   :  { %v1040_v2 = vmul.f32 1.442695, %v1018_v33  ;;  %v1019_v24 = vsub.f32 %v5423_v17, %v987_v51  ;;  %5919 = vpow2.f32 %v1030_v37 }
 0x439   :  { %v978_v8 = vpop.xlane.xlu0 %977 }
 0x43a   :  { %5921 = vpow2.f32 %v1040_v2  ;;  %v1042_v38 = vmul.f32 1.442695, %v1019_v24  ;;  %v1016_v13 = vsub.f32 %v6917_v32, %v978_v8 }
 0x43b   :  { %v981_v14 = vpop.xlane.xlu1 %980 }
 0x43c   :  { %v6964_v15 = vpop.eup %5913  ;;  %v1036_v16 = vmul.f32 1.442695, %v1016_v13  ;;  %v1017_v21 = vsub.f32 %v6920_v29, %v981_v14  ;;  %5923 = vpow2.f32 %v1042_v38 }
 0x43d   :  { %v1066_v19 = vsel %vm278_vm4, %v6964_v15, 0.0  ;;  %v6969_v11 = vpop.eup %5915 }
 0x43e   :  { %5925 = vpow2.f32 %v1036_v16  ;;  %v1038_v20 = vmul.f32 1.442695, %v1017_v21  ;;  %1067 = vadd.xlane.f32.xlu0 %v1066_v19  ;;  %v1060_v26 = vsel %vm278_vm4, %v6969_v11, 0.0 }
 0x440   :  { %5927 = vpow2.f32 %v1038_v20  ;;  %v5869_v20 = vld [vmem:[%s9064_s16] sm:$0xff]  }
 0x441   :  { %v6971_v22 = vpop.eup %5917  ;;  %v996_v9 = vpop.xlane.xlu0 %995  ;;  %5472 = vmatprep.subr.bf16.mxu1 %v5869_v20 }
 0x442   :  { %v1022_v57 = vsub.f32 %v6927_v41, %v996_v9  ;;  %1061 = vadd.xlane.f32.xlu0 %v1060_v26  ;;  %v1069_v27 = vsel %vm278_vm4, %v6971_v22, 0.0  ;;  %v6978_v28 = vpop.eup %5919 }
 0x443   :  { %v999_v18 = vpop.xlane.xlu1 %998  ;;  %1070 = vadd.xlane.f32.xlu1 %v1069_v27  ;;  %v1063_v53 = vsel %vm278_vm4, %v6978_v28, 0.0 }
 0x444   :  { %v6980_v31 = vpop.eup %5921  ;;  %v1048_v32 = vmul.f32 1.442695, %v1022_v57  ;;  %v1023_v35 = vsub.f32 %v6933_v43, %v999_v18 }
 0x445   :  { %v990_v17 = vpop.xlane.xlu0 %989  ;;  %v1078_v29 = vsel %vm278_vm4, %v6980_v31, 0.0 }
 0x446   :  { %5929 = vpow2.f32 %v1048_v32  ;;  %v1020_v36 = vsub.f32 %v6929_v42, %v990_v17  ;;  %1079 = vadd.xlane.f32.xlu0 %v1078_v29  ;;  %v6988_v39 = vpop.eup %5923  ;;  %v1050_v45 = vmul.f32 1.442695, %v1023_v35 }
 0x447   :  { %v993_v41 = vpop.xlane.xlu1 %992  ;;  %1064 = vadd.xlane.f32.xlu1 %v1063_v53  ;;  %v1081_v54 = vsel %vm278_vm4, %v6988_v39, 0.0 }
 0x448   :  { %v6990_v40 = vpop.eup %5925  ;;  %v1044_v44 = vmul.f32 1.442695, %v1020_v36  ;;  %v1021_v43 = vsub.f32 %v6935_v23, %v993_v41 }
 0x449   :  { %v1008_v46 = vpop.xlane.xlu0 %1007  ;;  %v1072_v48 = vsel %vm278_vm4, %v6990_v40, 0.0 }
 0x44a   :  { %5931 = vpow2.f32 %v1044_v44  ;;  %v1026_v42 = vsub.f32 %v6943_v47, %v1008_v46  ;;  %1073 = vadd.xlane.f32.xlu0 %v1072_v48  ;;  %v6998_v55 = vpop.eup %5927  ;;  %v1046_v23 = vmul.f32 1.442695, %v1021_v43 }
 0x44b   :  { %v1011_v56 = vpop.xlane.xlu1 %1010  ;;  %1082 = vadd.xlane.f32.xlu1 %v1081_v54  ;;  %5933 = vpow2.f32 %v1050_v45  ;;  %v1075_v47 = vsel %vm278_vm4, %v6998_v55, 0.0 }
 0x44c   :  { %v1056_v58 = vmul.f32 1.442695, %v1026_v42  ;;  %v1027_v59 = vsub.f32 %v6949_v25, %v1011_v56 }
 0x44d   :  { %v1002_v49 = vpop.xlane.xlu0 %1001 }
 0x44e   :  { %5935 = vpow2.f32 %v1056_v58  ;;  %v1024_v60 = vsub.f32 %v6945_v61, %v1002_v49  ;;  %v1058_v1 = vmul.f32 1.442695, %v1027_v59 }
 0x44f   :  { %v1005_v63 = vpop.xlane.xlu1 %1004  ;;  %1076 = vadd.xlane.f32.xlu1 %v1075_v47  ;;  %5937 = vpow2.f32 %v1046_v23 }
 0x450   :  { %v7004_v34 = vpop.eup %5929  ;;  %v1052_v62 = vmul.f32 1.442695, %v1024_v60  ;;  %v1025_v4 = vsub.f32 %v6951_v52, %v1005_v63 }
 0x451   :  { %v1090_v25 = vsel %vm278_vm4, %v7004_v34, 0.0  ;;  %v1240_v12 = vpop.permute.xlu0 %1239 }
 0x452   :  { %5939 = vpow2.f32 %v1052_v62  ;;  %v1054_v5 = vmul.f32 1.442695, %v1025_v4 }
 0x453   :  { %v1238_v37 = vpop.permute.xlu1 %1237  ;;  %1091 = vadd.xlane.f32.xlu1 %v1090_v25  ;;  %5941 = vpow2.f32 %v1058_v1 }
 0x454   :  { %v7009_v61 = vpop.eup %5931  ;;  %5456 = vmatprep.subr.bf16.mxu0 %v1238_v37  ;;  %5943 = vpow2.f32 %v1054_v5 }
 0x455   :  { %5457 = vmatpush3.bf16.msra.mxu0 %v1238_v37  ;;  %v1084_v0 = vsel %vm278_vm4, %v7009_v61, 0.0  ;;  %v7013_v52 = vpop.eup %5933 }
 0x456   :  { %5458 = vmatprep.subr.bf16.mxu0 %v1240_v12  ;;  %v1093_v2 = vsel %vm278_vm4, %v7013_v52, 0.0 }
 0x457   :  { %1085 = vadd.xlane.f32.xlu1 %v1084_v0 }
 0x458   :  { %v7015_v33 = vpop.eup %5935 }
 0x459   :  { %5459 = vmatpush3.bf16.msra.mxu0 %v1240_v12  ;;  %v1102_v51 = vsel %vm278_vm4, %v7015_v33, 0.0  ;;  %v7021_v24 = vpop.eup %5937 }
 0x45a   :  { %1103 = vadd.xlane.f32.xlu0 %v1102_v51  ;;  %v1087_v14 = vsel %vm278_vm4, %v7021_v24, 0.0 }
 0x45b   :  { %1094 = vadd.xlane.f32.xlu1 %v1093_v2 }
 0x45c   :  { %v7023_v8 = vpop.eup %5939 }
 0x45d   :  { %v1096_v38 = vsel %vm278_vm4, %v7023_v8, 0.0  ;;  %v7027_v13 = vpop.eup %5941 }
 0x45e   :  { %1097 = vadd.xlane.f32.xlu0 %v1096_v38  ;;  %v7031_v16 = vpop.eup %5943  ;;  %v1105_v21 = vsel %vm278_vm4, %v7027_v13, 0.0 }
 0x45f   :  { %1088 = vadd.xlane.f32.xlu1 %v1087_v14  ;;  %v1099_v19 = vsel %vm278_vm4, %v7031_v16, 0.0 }
 0x462   :  { %1106 = vadd.xlane.f32.xlu0 %v1105_v21 }
 0x463   :  { %1100 = vadd.xlane.f32.xlu1 %v1099_v19 }
 0x474   :  { %1241 = vrot.lane.b32.xlu1 %v6874_v30, %s6349_s30 }
 0x478   :  { %1243 = vrot.lane.b32.xlu0 %v6872_v7, %s6349_s30 }
 0x4cb   :  { %v1068_v9 = vpop.xlane.xlu0 %1067 }
 0x4cf   :  { %v1062_v26 = vpop.xlane.xlu0 %1061 }
 0x4d0   :  { %v1071_v57 = vpop.xlane.xlu1 %1070 }
 0x4d1   :  { %5945 = vrcp.f32 %v1071_v57  ;;  %v5870_v57 = vld [vmem:[%s9064_s16 + $0x8] sm:$0xff]  }
 0x4d2   :  { %5947 = vrcp.f32 %v1062_v26 }
 0x4d3   :  { %v1080_v27 = vpop.xlane.xlu0 %1079  ;;  %5949 = vrcp.f32 %v1068_v9 }
 0x4d4   :  { %v1065_v18 = vpop.xlane.xlu1 %1064 }
 0x4d5   :  { %5951 = vrcp.f32 %v1065_v18 }
 0x4d7   :  { %v1074_v32 = vpop.xlane.xlu0 %1073 }
 0x4d8   :  { %v1083_v35 = vpop.xlane.xlu1 %1082 }
 0x4d9   :  { %5953 = vrcp.f32 %v1083_v35 }
 0x4da   :  { %5955 = vrcp.f32 %v1074_v32 }
 0x4db   :  { %v5946_v30 = vpop.eup %5945  ;;  %5957 = vrcp.f32 %v1080_v27 }
 0x4dc   :  { %v1077_v7 = vpop.xlane.xlu1 %1076  ;;  %v5948_v17 = vpop.eup %5947  ;;  %v1127_v53 = vmul.f32 %v5946_v30, %v6971_v22  ;;  %v5872_v30 = vld [vmem:[%s9065_s20 + $0x8] sm:$0xff]  }
 0x4dd   :  { %5959 = vrcp.f32 %v1077_v7  ;;  %v5950_v29 = vpop.eup %5949  ;;  %v1124_v44 = vmul.f32 %v5948_v17, %v6969_v11 }
 0x4de   :  { %v1126_v43 = vmul.f32 %v5950_v29, %v6964_v15 }
 0x4df   :  { %v5952_v36 = vpop.eup %5951 }
 0x4e0   :  { %v1092_v41 = vpop.xlane.xlu1 %1091  ;;  %v1125_v45 = vmul.f32 %v5952_v36, %v6978_v28  ;;  %v1141_v48 = vpack.c.bf16 %v1127_v53, %v1126_v43 }
 0x4e2   :  { %v1140_v46 = vpack.c.bf16 %v1125_v45, %v1124_v44 }
 0x4e3   :  { %v5954_v42 = vpop.eup %5953 }
 0x4e4   :  { %v1086_v54 = vpop.xlane.xlu1 %1085  ;;  %5448 = vmatprep.mubr.msk.bf16.mxu1 %vm278_vm4, %v1140_v46  ;;  %v5956_v56 = vpop.eup %5955  ;;  %v1131_v23 = vmul.f32 %v5954_v42, %v6988_v39 }
 0x4e5   :  { %5449 = vmatmul.mubr.msk.bf16.vlgmr.msra.gmra.mrb[32].mxu1 %vm278_vm4, %v1141_v48  ;;  %v5958_v58 = vpop.eup %5957  ;;  %v1128_v28 = vmul.f32 %v5956_v56, %v6990_v40 }
 0x4e6   :  { %5473 = vmatpush3.bf16.msra.mxu1 %v5869_v20  ;;  %v1130_v49 = vmul.f32 %v5958_v58, %v6980_v31 }
 0x4e7   :  { %v5960_v59 = vpop.eup %5959  ;;  %v1104_v22 = vpop.xlane.xlu0 %1103  ;;  %5474 = vmatprep.subr.bf16.mxu1 %v5870_v57 }
 0x4e8   :  { %v1095_v11 = vpop.xlane.xlu1 %1094  ;;  %v1129_v15 = vmul.f32 %v5960_v59, %v6998_v55  ;;  %v1143_v63 = vpack.c.bf16 %v1131_v23, %v1130_v49  ;;  %v5873_v23 = vld [vmem:[%s9066_s18] sm:$0xff]  }
 0x4e9   :  { %5961 = vrcp.f32 %v1095_v11  ;;  %v5874_v11 = vld [vmem:[%s9066_s18 + $0x8] sm:$0xff]  }
 0x4ea   :  { %v1142_v60 = vpack.c.bf16 %v1129_v15, %v1128_v28  ;;  %5963 = vrcp.f32 %v1086_v54  ;;  %5475 = vmatpush3.bf16.msra.mxu1 %v5870_v57 }
 0x4eb   :  { %v1098_v47 = vpop.xlane.xlu0 %1097  ;;  %5965 = vrcp.f32 %v1092_v41  ;;  %5512 = vmatprep.subr.bf16.mxu1 %v6345_v3 }
 0x4ec   :  { %v1089_v1 = vpop.xlane.xlu1 %1088  ;;  %5452 = vmatprep.mubr.msk.bf16.mxu1 %vm278_vm4, %v1142_v60 }
 0x4ed   :  { %5967 = vrcp.f32 %v1089_v1  ;;  %5453 = vmatmul.mubr.msk.bf16.gmra.mrb[36].mxu1 %vm278_vm4, %v1143_v63 }
 0x4ee   :  { %5969 = vrcp.f32 %v1098_v47 }
 0x4ef   :  { %v1107_v39 = vpop.xlane.xlu0 %1106 }
 0x4f0   :  { %v1101_v62 = vpop.xlane.xlu1 %1100 }
 0x4f1   :  { %5971 = vrcp.f32 %v1101_v62 }
 0x4f2   :  { %5973 = vrcp.f32 %v1107_v39 }
 0x4f3   :  { %v5962_v40 = vpop.eup %5961  ;;  %5975 = vrcp.f32 %v1104_v22  ;;  %v1244_v25 = vpop.permute.xlu0 %1243 }
 0x4f4   :  { %v1242_v31 = vpop.permute.xlu1 %1241  ;;  %v5964_v55 = vpop.eup %5963  ;;  %v1135_v37 = vmul.f32 %v5962_v40, %v7013_v52 }
 0x4f5   :  { %5460 = vmatprep.subr.bf16.mxu0 %v1242_v31  ;;  %v5966_v4 = vpop.eup %5965  ;;  %v1132_v12 = vmul.f32 %v5964_v55, %v7009_v61 }
 0x4f6   :  { %5461 = vmatpush3.bf16.msra.mxu0 %v1242_v31  ;;  %v1134_v2 = vmul.f32 %v5966_v4, %v7004_v34 }
 0x4f7   :  { %v5968_v5 = vpop.eup %5967  ;;  %5462 = vmatprep.subr.bf16.mxu0 %v1244_v25 }
 0x4f8   :  { %v1133_v0 = vmul.f32 %v5968_v5, %v7021_v24  ;;  %v5970_v51 = vpop.eup %5969  ;;  %v1145_v21 = vpack.c.bf16 %v1135_v37, %v1134_v2 }
 0x4f9   :  { %v1136_v20 = vmul.f32 %v5970_v51, %v7023_v8 }
 0x4fa   :  { %5463 = vmatpush3.bf16.msra.mxu0 %v1244_v25  ;;  %v1144_v38 = vpack.c.bf16 %v1133_v0, %v1132_v12 }
 0x4fb   :  { %v5972_v14 = vpop.eup %5971  ;;  %5492 = vmatprep.subr.bf16.mxu0 %v5873_v23 }
 0x4fc   :  { %v5974_v19 = vpop.eup %5973  ;;  %5464 = vmatprep.mubr.msk.bf16.mxu0 %vm278_vm4, %v1144_v38  ;;  %v1137_v9 = vmul.f32 %v5972_v14, %v7031_v16 }
 0x4fd   :  { %5465 = vmatmul.mubr.msk.bf16.vlgmr.msra.gmra.mrb[12].mxu0 %vm278_vm4, %v1145_v21  ;;  %v5976_v52 = vpop.eup %5975  ;;  %v1139_v24 = vmul.f32 %v5974_v19, %v7027_v13 }
 0x4fe   :  { %v1146_v61 = vpack.c.bf16 %v1137_v9, %v1136_v20  ;;  %v1138_v34 = vmul.f32 %v5976_v52, %v7015_v33  ;;  %v5871_v33 = vld [vmem:[%s9065_s20] sm:$0xff]   ;;  %5493 = vmatpush3.bf16.msra.mxu0 %v5873_v23 }
 0x4ff   :  { %5494 = vmatprep.subr.bf16.mxu0 %v5874_v11 }
 0x500   :  { %5468 = vmatprep.mubr.msk.bf16.mxu0 %vm278_vm4, %v1146_v61  ;;  %v1147_v26 = vpack.c.bf16 %v1139_v24, %v1138_v34 }
 0x502   :  { %5495 = vmatpush3.bf16.msra.mxu0 %v5874_v11 }
 0x505   :  { %5469 = vmatmul.mubr.msk.bf16.gmra.mrb[16].mxu0 %vm278_vm4, %v1147_v26 }
 0x5b8   :  { %v5450_v8 = vpop.f32.mrb[32].mxu1 }
 0x5b9   :  { %v1206_v16 = vpop.f32.mrb[33].mxu1 }
 0x5ba   :  { %v5451_v27 = vpop.f32.mrb[34].mxu1 }
 0x5bb   :  { %v1327_v18 = vpack.c.bf16 %v5451_v27, %v5450_v8  ;;  %v1209_v13 = vpop.f32.mrb[35].mxu1 }
 0x5bc   :  { %v1326_v32 = vpack.c.bf16 %v1209_v13, %v1206_v16 }
 0x5be   :  { %5476 = vmatprep.mubr.msk.bf16.mxu1 %vm331_vm0, %v1326_v32 }
 0x5bf   :  { %5477 = vmatmul.mubr.msk.bf16.vlgmr.msra.gmra.mrb[40].mxu1 %vm331_vm0, %v1327_v18 }
 0x5c0   :  { %v5454_v35 = vpop.f32.mrb[36].mxu1  ;;  %5513 = vmatpush3.bf16.msra.mxu1 %v5871_v33 }
 0x5c1   :  { %v1222_v7 = vpop.f32.mrb[37].mxu1  ;;  %5514 = vmatprep.subr.bf16.mxu1 %v6345_v3 }
 0x5c2   :  { %v5455_v17 = vpop.f32.mrb[38].mxu1 }
 0x5c3   :  { %v1329_v29 = vpack.c.bf16 %v5455_v17, %v5454_v35  ;;  %v1225_v36 = vpop.f32.mrb[39].mxu1 }
 0x5c4   :  { %v1328_v53 = vpack.c.bf16 %v1225_v36, %v1222_v7  ;;  %5515 = vmatpush3.bf16.msra.mxu1 %v5872_v30 }
 0x5c6   :  { %5480 = vmatprep.mubr.msk.bf16.mxu1 %vm331_vm0, %v1328_v53 }
 0x5c7   :  { %5481 = vmatmul.mubr.msk.bf16.gmra.mrb[44].mxu1 %vm331_vm0, %v1329_v29  ;;  %v2232_v29 = vld [vmem:[%s9068_s21] sm:$0xff]  ;;  %s6358_s21 = smov 24  }
 0x5d0   :  { %v5466_v41 = vpop.f32.mrb[12].mxu0 }
 0x5d1   :  { %v1295_v44 = vpop.f32.mrb[13].mxu0 }
 0x5d2   :  { %v5467_v45 = vpop.f32.mrb[14].mxu0 }
 0x5d3   :  { %v1331_v43 = vpack.c.bf16 %v5467_v45, %v5466_v41  ;;  %v1298_v46 = vpop.f32.mrb[15].mxu0 }
 0x5d4   :  { %v1330_v48 = vpack.c.bf16 %v1298_v46, %v1295_v44 }
 0x5d6   :  { %5484 = vmatprep.mubr.msk.bf16.mxu1 %vm331_vm0, %v1330_v48 }
 0x5d7   :  { %5485 = vmatmul.mubr.msk.bf16.gmra.mrb[48].mxu1 %vm331_vm0, %v1331_v43 }
 0x5d8   :  { %v5470_v42 = vpop.f32.mrb[16].mxu0 }
 0x5d9   :  { %v1311_v54 = vpop.f32.mrb[17].mxu0 }
 0x5da   :  { %v5471_v56 = vpop.f32.mrb[18].mxu0 }
 0x5db   :  { %v1333_v58 = vpack.c.bf16 %v5471_v56, %v5470_v42  ;;  %v1314_v59 = vpop.f32.mrb[19].mxu0 }
 0x5dc   :  { %v1332_v22 = vpack.c.bf16 %v1314_v59, %v1311_v54 }
 0x5de   :  { %5488 = vmatprep.mubr.msk.bf16.mxu1 %vm331_vm0, %v1332_v22 }
 0x5df   :  { %5489 = vmatmul.mubr.msk.bf16.gmra.mrb[52].mxu1 %vm331_vm0, %v1333_v58 }
 0x5e0   :  { %5516 = vmatprep.mubr.msk.bf16.mxu1 %vm6346_vm1, %v6345_v3  ;;  %v5089_v3 = vld [vmem:[%s9067_s17] ss:$0 sm:$0xff] }
 0x5e7   :  { %5517 = vmatmul.mubr.msk.bf16.vlgmr.msra.gmra.mrb[56].mxu1 %vm331_vm0, %v2171_v10 }
 0x692   :  { %v5478_v28 = vpop.f32.mrb[40].mxu1 }
 0x693   :  { %v1415_v6 = vpop.f32.mrb[41].mxu1  ;;  %v7110_v63 = vadd.f32 %v5478_v28, %v5089_v3 }
 0x694   :  { %v7102_v50 = vadd.f32 %v5089_v3, %v1415_v6  ;;  %v5479_v10 = vpop.f32.mrb[42].mxu1 }
 0x695   :  { %v1418_v15 = vpop.f32.mrb[43].mxu1  ;;  %v7104_v49 = vadd.f32 %v5479_v10, %v5089_v3  ;;  %v1486_v4 = vsel %vm331_vm0, %v7110_v63, 0.0 }
 0x696   :  { %v7106_v60 = vadd.f32 %v5089_v3, %v1418_v15  ;;  %v1480_v47 = vsel %vm331_vm0, %v7102_v50, 0.0 }
 0x697   :  { %1481 = vadd.xlane.f32.xlu1 %v1480_v47  ;;  %v1489_v62 = vsel %vm331_vm0, %v7104_v49, 0.0 }
 0x698   :  { %v1483_v1 = vsel %vm331_vm0, %v7106_v60, 0.0 }
 0x699   :  { %1484 = vadd.xlane.f32.xlu0 %v1483_v1 }
 0x69a   :  { %v5482_v39 = vpop.f32.mrb[44].mxu1 }
 0x69b   :  { %1490 = vadd.xlane.f32.xlu1 %v1489_v62  ;;  %v1431_v40 = vpop.f32.mrb[45].mxu1  ;;  %v7122_v37 = vadd.f32 %v5482_v39, %v5089_v3 }
 0x69c   :  { %v7116_v31 = vadd.f32 %v5089_v3, %v1431_v40  ;;  %v5483_v55 = vpop.f32.mrb[46].mxu1 }
 0x69d   :  { %1487 = vadd.xlane.f32.xlu0 %v1486_v4  ;;  %v1434_v25 = vpop.f32.mrb[47].mxu1  ;;  %v7124_v12 = vadd.f32 %v5483_v55, %v5089_v3  ;;  %v1498_v38 = vsel %vm331_vm0, %v7122_v37, 0.0 }
 0x69e   :  { %v7120_v5 = vadd.f32 %v5089_v3, %v1434_v25  ;;  %v1492_v51 = vsel %vm331_vm0, %v7116_v31, 0.0 }
 0x69f   :  { %v1501_v2 = vsel %vm331_vm0, %v7124_v12, 0.0 }
 0x6a0   :  { %v1495_v0 = vsel %vm331_vm0, %v7120_v5, 0.0 }
 0x6a1   :  { %1496 = vadd.xlane.f32.xlu1 %v1495_v0  ;;  %1493 = vadd.xlane.f32.xlu0 %v1492_v51 }
 0x6a5   :  { %1502 = vadd.xlane.f32.xlu1 %v1501_v2  ;;  %1499 = vadd.xlane.f32.xlu0 %v1498_v38 }
 0x6aa   :  { %v5486_v14 = vpop.f32.mrb[48].mxu1 }
 0x6ab   :  { %v1447_v21 = vpop.f32.mrb[49].mxu1  ;;  %v7136_v52 = vadd.f32 %v5486_v14, %v5089_v3 }
 0x6ac   :  { %v7134_v19 = vadd.f32 %v5089_v3, %v1447_v21  ;;  %v5487_v20 = vpop.f32.mrb[50].mxu1 }
 0x6ad   :  { %v1450_v9 = vpop.f32.mrb[51].mxu1  ;;  %v7142_v34 = vadd.f32 %v5487_v20, %v5089_v3  ;;  %v1510_v8 = vsel %vm331_vm0, %v7136_v52, 0.0 }
 0x6ae   :  { %v7138_v61 = vadd.f32 %v5089_v3, %v1450_v9  ;;  %v1504_v24 = vsel %vm331_vm0, %v7134_v19, 0.0 }
 0x6af   :  { %1505 = vadd.xlane.f32.xlu0 %v1504_v24  ;;  %v1513_v13 = vsel %vm331_vm0, %v7142_v34, 0.0 }
 0x6b0   :  { %v1507_v26 = vsel %vm331_vm0, %v7138_v61, 0.0 }
 0x6b1   :  { %1508 = vadd.xlane.f32.xlu1 %v1507_v26 }
 0x6b2   :  { %v5490_v57 = vpop.f32.mrb[52].mxu1 }
 0x6b3   :  { %1511 = vadd.xlane.f32.xlu0 %v1510_v8  ;;  %v1463_v16 = vpop.f32.mrb[53].mxu1  ;;  %v7152_v33 = vadd.f32 %v5490_v57, %v5089_v3 }
 0x6b4   :  { %v7148_v27 = vadd.f32 %v5089_v3, %v1463_v16  ;;  %v5491_v18 = vpop.f32.mrb[54].mxu1 }
 0x6b5   :  { %1514 = vadd.xlane.f32.xlu1 %v1513_v13  ;;  %v1466_v32 = vpop.f32.mrb[55].mxu1  ;;  %v7158_v7 = vadd.f32 %v5491_v18, %v5089_v3  ;;  %v1522_v53 = vsel %vm331_vm0, %v7152_v33, 0.0 }
 0x6b6   :  { %v7154_v35 = vadd.f32 %v5089_v3, %v1466_v32  ;;  %v1516_v30 = vsel %vm331_vm0, %v7148_v27, 0.0 }
 0x6b7   :  { %1517 = vadd.xlane.f32.xlu0 %v1516_v30  ;;  %v1525_v43 = vsel %vm331_vm0, %v7158_v7, 0.0 }
 0x6b8   :  { %v1519_v17 = vsel %vm331_vm0, %v7154_v35, 0.0 }
 0x6b9   :  { %1520 = vadd.xlane.f32.xlu1 %v1519_v17 }
 0x6ba   :  { %v2225_v36 = vpop.f32.mrb[56].mxu1 }
 0x6bb   :  { %v2233_v41 = vadd.f32 %v2232_v29, %v2225_v36  ;;  %v5518_v44 = vpop.f32.mrb[57].mxu1  ;;  %1523 = vadd.xlane.f32.xlu0 %v1522_v53 }
 0x6bc   :  { %v2228_v45 = vpop.f32.mrb[58].mxu1 }
 0x6bd   :  { %v7169_v46 = vpack.c.bf16 %v2233_v41, %v2233_v41  ;;  %v2234_v48 = vadd.f32 %v2232_v29, %v2228_v45  ;;  %v5519_v42 = vpop.f32.mrb[59].mxu1  ;;  %1526 = vadd.xlane.f32.xlu1 %v1525_v43 }
 0x6bf   :  { %v7171_v54 = vpack.c.bf16 %v2234_v48, %v2234_v48  ;;  %5708 = vmatprep.subr.msk.bf16.mxu0 %vm2245_vm7, %v7169_v46 }
 0x6c1   :  { %5709 = vmatprep.subr.msk.bf16.mxu1 %vm2245_vm7, %v7171_v54  ;;  %v2339_v56 = vsel %vm2245_vm7, %v7171_v54, 0 }
 0x6c2   :  { %5531 = vmatpush3.bf16.xpose.msra.mxu1 %v2339_v56 }
 0x724   :  { %v1482_v58 = vpop.xlane.xlu1 %1481 }
 0x725   :  { %v1528_v59 = vmul.f32 0.03125, %v1482_v58 }
 0x726   :  { %v1485_v22 = vpop.xlane.xlu0 %1484 }
 0x727   :  { %v7180_v23 = vsub.f32 %v7102_v50, %v1528_v59  ;;  %v1529_v11 = vmul.f32 0.03125, %v1485_v22 }
 0x728   :  { %v1491_v3 = vpop.xlane.xlu1 %1490 }
 0x729   :  { %v7183_v28 = vsub.f32 %v7106_v60, %v1529_v11  ;;  %v1531_v6 = vmul.f32 0.03125, %v1491_v3  ;;  %v1560_v10 = vmul.f32 %v7180_v23, %v7180_v23 }
 0x72a   :  { %v1488_v15 = vpop.xlane.xlu0 %1487 }
 0x72b   :  { %v7188_v47 = vsub.f32 %v7104_v49, %v1531_v6  ;;  %v1530_v1 = vmul.f32 0.03125, %v1488_v15  ;;  %v1576_v39 = vsel %vm331_vm0, %v1560_v10, 0.0  ;;  %v1561_v50 = vmul.f32 %v7183_v28, %v7183_v28 }
 0x72c   :  { %1577 = vadd.xlane.f32.xlu0 %v1576_v39 }
 0x72d   :  { %v7194_v62 = vsub.f32 %v7110_v63, %v1530_v1  ;;  %v1579_v60 = vsel %vm331_vm0, %v1561_v50, 0.0  ;;  %v1563_v40 = vmul.f32 %v7188_v47, %v7188_v47 }
 0x72e   :  { %v1497_v55 = vpop.xlane.xlu1 %1496  ;;  %1580 = vadd.xlane.f32.xlu1 %v1579_v60  ;;  %v1494_v4 = vpop.xlane.xlu0 %1493 }
 0x72f   :  { %v1533_v49 = vmul.f32 0.03125, %v1497_v55  ;;  %v1532_v25 = vmul.f32 0.03125, %v1494_v4  ;;  %v1562_v0 = vmul.f32 %v7194_v62, %v7194_v62  ;;  %v1585_v63 = vsel %vm331_vm0, %v1563_v40, 0.0 }
 0x731   :  { %v7202_v51 = vsub.f32 %v7120_v5, %v1533_v49  ;;  %v7205_v2 = vsub.f32 %v7116_v31, %v1532_v25  ;;  %v1582_v38 = vsel %vm331_vm0, %v1562_v0, 0.0 }
 0x732   :  { %v1503_v14 = vpop.xlane.xlu1 %1502  ;;  %1586 = vadd.xlane.f32.xlu1 %v1585_v63  ;;  %1583 = vadd.xlane.f32.xlu0 %v1582_v38  ;;  %v1500_v21 = vpop.xlane.xlu0 %1499 }
 0x733   :  { %v1535_v20 = vmul.f32 0.03125, %v1503_v14  ;;  %v1534_v9 = vmul.f32 0.03125, %v1500_v21  ;;  %v1565_v24 = vmul.f32 %v7202_v51, %v7202_v51  ;;  %v1564_v5 = vmul.f32 %v7205_v2, %v7205_v2 }
 0x735   :  { %v7214_v26 = vsub.f32 %v7124_v12, %v1535_v20  ;;  %v7217_v31 = vsub.f32 %v7122_v37, %v1534_v9  ;;  %v1591_v57 = vsel %vm331_vm0, %v1565_v24, 0.0  ;;  %v1588_v8 = vsel %vm331_vm0, %v1564_v5, 0.0 }
 0x736   :  { %1592 = vadd.xlane.f32.xlu1 %v1591_v57  ;;  %1589 = vadd.xlane.f32.xlu0 %v1588_v8 }
 0x737   :  { %v1567_v16 = vmul.f32 %v7214_v26, %v7214_v26  ;;  %v1566_v18 = vmul.f32 %v7217_v31, %v7217_v31 }
 0x739   :  { %v1597_v13 = vsel %vm331_vm0, %v1567_v16, 0.0  ;;  %v1594_v12 = vsel %vm331_vm0, %v1566_v18, 0.0 }
 0x73a   :  { %1598 = vadd.xlane.f32.xlu1 %v1597_v13  ;;  %1595 = vadd.xlane.f32.xlu0 %v1594_v12 }
 0x73c   :  { %v1506_v37 = vpop.xlane.xlu0 %1505 }
 0x73d   :  { %v1536_v32 = vmul.f32 0.03125, %v1506_v37 }
 0x73e   :  { %v1509_v30 = vpop.xlane.xlu1 %1508 }
 0x73f   :  { %v7228_v17 = vsub.f32 %v7134_v19, %v1536_v32  ;;  %v1537_v29 = vmul.f32 0.03125, %v1509_v30 }
 0x740   :  { %v1512_v36 = vpop.xlane.xlu0 %1511 }
 0x741   :  { %v7231_v53 = vsub.f32 %v7138_v61, %v1537_v29  ;;  %v1538_v41 = vmul.f32 0.03125, %v1512_v36  ;;  %v1568_v44 = vmul.f32 %v7228_v17, %v7228_v17 }
 0x742   :  { %v1515_v45 = vpop.xlane.xlu1 %1514 }
 0x743   :  { %v7236_v43 = vsub.f32 %v7136_v52, %v1538_v41  ;;  %v1539_v48 = vmul.f32 0.03125, %v1515_v45  ;;  %v1600_v42 = vsel %vm331_vm0, %v1568_v44, 0.0  ;;  %v1569_v19 = vmul.f32 %v7231_v53, %v7231_v53 }
 0x744   :  { %1601 = vadd.xlane.f32.xlu0 %v1600_v42  ;;  %v1518_v56 = vpop.xlane.xlu0 %1517  ;;  %v7278_v42 = vld [vmem:[%s9069_s10] ss:$0 sm:$0xff] }
 0x745   :  { %v7242_v58 = vsub.f32 %v7142_v34, %v1539_v48  ;;  %v1540_v61 = vmul.f32 0.03125, %v1518_v56  ;;  %v1603_v59 = vsel %vm331_vm0, %v1569_v19, 0.0  ;;  %v1570_v22 = vmul.f32 %v7236_v43, %v7236_v43 }
 0x746   :  { %v1521_v11 = vpop.xlane.xlu1 %1520  ;;  %1604 = vadd.xlane.f32.xlu1 %v1603_v59 }
 0x747   :  { %v7248_v52 = vsub.f32 %v7148_v27, %v1540_v61  ;;  %v1541_v3 = vmul.f32 0.03125, %v1521_v11  ;;  %v1606_v6 = vsel %vm331_vm0, %v1570_v22, 0.0  ;;  %v1571_v10 = vmul.f32 %v7242_v58, %v7242_v58  ;;  %v7284_v22 = vld [vmem:[%s9070_s11] ss:$0 sm:$0xff] }
 0x748   :  { %1607 = vadd.xlane.f32.xlu0 %v1606_v6  ;;  %v1524_v34 = vpop.xlane.xlu0 %1523 }
 0x749   :  { %v7254_v15 = vsub.f32 %v7154_v35, %v1541_v3  ;;  %v1542_v1 = vmul.f32 0.03125, %v1524_v34  ;;  %v1609_v39 = vsel %vm331_vm0, %v1571_v10, 0.0  ;;  %v1572_v50 = vmul.f32 %v7248_v52, %v7248_v52 }
 0x74a   :  { %v1527_v60 = vpop.xlane.xlu1 %1526  ;;  %1610 = vadd.xlane.f32.xlu1 %v1609_v39 }
 0x74b   :  { %v7260_v27 = vsub.f32 %v7152_v33, %v1542_v1  ;;  %v1543_v40 = vmul.f32 0.03125, %v1527_v60  ;;  %v1612_v55 = vsel %vm331_vm0, %v1572_v50, 0.0  ;;  %v1573_v4 = vmul.f32 %v7254_v15, %v7254_v15  ;;  %v6329_v1 = vld [vmem:[%s9111_s6] sm:$0xff] }
 0x74c   :  { %1613 = vadd.xlane.f32.xlu0 %v1612_v55 }
 0x74d   :  { %v7266_v35 = vsub.f32 %v7158_v7, %v1543_v40  ;;  %v1615_v49 = vsel %vm331_vm0, %v1573_v4, 0.0  ;;  %v1574_v25 = vmul.f32 %v7260_v27, %v7260_v27  ;;  %v6330_v4 = vld [vmem:[%s9111_s6 + $0x8] sm:$0xff] }
 0x74e   :  { %1616 = vadd.xlane.f32.xlu1 %v1615_v49 }
 0x74f   :  { %v1618_v0 = vsel %vm331_vm0, %v1574_v25, 0.0  ;;  %v1575_v33 = vmul.f32 %v7266_v35, %v7266_v35 }
 0x750   :  { %1619 = vadd.xlane.f32.xlu0 %v1618_v0 }
 0x751   :  { %v1621_v63 = vsel %vm331_vm0, %v1575_v33, 0.0 }
 0x752   :  { %1622 = vadd.xlane.f32.xlu1 %v1621_v63 }
 0x7b9   :  { %v1578_v38 = vpop.xlane.xlu0 %1577 }
 0x7ba   :  { %v1624_v14 = vmul.f32 0.03125, %v1578_v38 }
 0x7bb   :  { %v1581_v21 = vpop.xlane.xlu1 %1580 }
 0x7bc   :  { %v1640_v7 = vadd.f32 1e-05, %v1624_v14  ;;  %v1625_v20 = vmul.f32 0.03125, %v1581_v21 }
 0x7be   :  { %5977 = vrsqrt.f32 %v1640_v7  ;;  %v1641_v9 = vadd.f32 1e-05, %v1625_v20 }
 0x7bf   :  { %v1587_v24 = vpop.xlane.xlu1 %1586  ;;  %v1584_v5 = vpop.xlane.xlu0 %1583 }
 0x7c0   :  { %5979 = vrsqrt.f32 %v1641_v9  ;;  %v1627_v57 = vmul.f32 0.03125, %v1587_v24  ;;  %v1626_v8 = vmul.f32 0.03125, %v1584_v5 }
 0x7c2   :  { %v1643_v16 = vadd.f32 1e-05, %v1627_v57  ;;  %v1642_v18 = vadd.f32 1e-05, %v1626_v8  ;;  %v6331_v57 = vld [vmem:[%s9111_s6 + $0x18] sm:$0xff] }
 0x7c3   :  { %v1593_v13 = vpop.xlane.xlu1 %1592  ;;  %v1590_v12 = vpop.xlane.xlu0 %1589 }
 0x7c4   :  { %5981 = vrsqrt.f32 %v1643_v16  ;;  %v1629_v37 = vmul.f32 0.03125, %v1593_v13  ;;  %v1628_v32 = vmul.f32 0.03125, %v1590_v12  ;;  %v6332_v12 = vld [vmem:[%s9111_s6 + $0x10] sm:$0xff] }
 0x7c5   :  { %5983 = vrsqrt.f32 %v1642_v18 }
 0x7c6   :  { %v1645_v30 = vadd.f32 1e-05, %v1629_v37  ;;  %v1644_v29 = vadd.f32 1e-05, %v1628_v32 }
 0x7c7   :  { %v1599_v36 = vpop.xlane.xlu1 %1598  ;;  %v1596_v41 = vpop.xlane.xlu0 %1595 }
 0x7c8   :  { %v5978_v44 = vpop.eup %5977  ;;  %5985 = vrsqrt.f32 %v1645_v30  ;;  %v1631_v45 = vmul.f32 0.03125, %v1599_v36  ;;  %v1630_v48 = vmul.f32 0.03125, %v1596_v41 }
 0x7c9   :  { %5987 = vrsqrt.f32 %v1644_v29  ;;  %v1672_v19 = vmul.f32 %v5978_v44, %v7180_v23 }
 0x7ca   :  { %v5980_v56 = vpop.eup %5979  ;;  %v1647_v61 = vadd.f32 1e-05, %v1631_v45  ;;  %v1646_v59 = vadd.f32 1e-05, %v1630_v48 }
 0x7cb   :  { %v1694_v11 = vmul.f32 %v7278_v42, %v1672_v19  ;;  %v1673_v3 = vmul.f32 %v5980_v56, %v7183_v28  ;;  %v6333_v56 = vld [vmem:[%s9111_s6 + $0x28] sm:$0xff] }
 0x7cc   :  { %5989 = vrsqrt.f32 %v1647_v61 }
 0x7cd   :  { %5991 = vrsqrt.f32 %v1646_v59  ;;  %v1716_v6 = vadd.f32 %v7284_v22, %v1694_v11  ;;  %v1695_v10 = vmul.f32 %v7278_v42, %v1673_v3 }
 0x7ce   :  { %v5982_v34 = vpop.eup %5981 }
 0x7cf   :  { %v5984_v23 = vpop.eup %5983  ;;  %v7293_v39 = vadd.f32 %v6329_v1, %v1716_v6  ;;  %v1717_v50 = vadd.f32 %v7284_v22, %v1695_v10  ;;  %v1675_v60 = vmul.f32 %v5982_v34, %v7188_v47 }
 0x7d0   :  { %v1674_v28 = vmul.f32 %v5984_v23, %v7194_v62  ;;  %v6334_v23 = vld [vmem:[%s9111_s6 + $0x20] sm:$0xff] }
 0x7d1   :  { %9121 = vst [vmem:[#allocation3_spill] sm:$0xff] %v7293_v39  ;;  %v1602_v40 = vpop.xlane.xlu0 %1601  ;;  %v1750_v55 = vsel %vm331_vm0, %v7293_v39, 0.0  ;;  %v7303_v49 = vadd.f32 %v6330_v4, %v1717_v50  ;;  %v1697_v25 = vmul.f32 %v7278_v42, %v1675_v60  ;;  %v6335_v4 = vld [vmem:[%s9111_s6 + $0x38] sm:$0xff] }
 0x7d2   :  { %v5986_v0 = vpop.eup %5985  ;;  %v1632_v33 = vmul.f32 0.03125, %v1602_v40  ;;  %1751 = vadd.xlane.f32.xlu0 %v1750_v55  ;;  %v1696_v63 = vmul.f32 %v7278_v42, %v1674_v28 }
 0x7d3   :  { %9122 = vst [vmem:[#allocation4_spill] sm:$0xff] %v7303_v49  ;;  %v5988_v47 = vpop.eup %5987  ;;  %v1605_v38 = vpop.xlane.xlu1 %1604  ;;  %v1753_v62 = vsel %vm331_vm0, %v7303_v49, 0.0  ;;  %v1719_v14 = vadd.f32 %v7284_v22, %v1697_v25  ;;  %v1677_v21 = vmul.f32 %v5986_v0, %v7202_v51 }
 0x7d4   :  { %v1648_v7 = vadd.f32 1e-05, %v1632_v33  ;;  %v1633_v20 = vmul.f32 0.03125, %v1605_v38  ;;  %1754 = vadd.xlane.f32.xlu1 %v1753_v62  ;;  %v1718_v9 = vadd.f32 %v7284_v22, %v1696_v63  ;;  %v1676_v24 = vmul.f32 %v5988_v47, %v7205_v2  ;;  %v6336_v62 = vld [vmem:[%s9111_s6 + $0x30] sm:$0xff] }
 0x7d5   :  { %v1608_v5 = vpop.xlane.xlu0 %1607  ;;  %v7316_v8 = vadd.f32 %v6331_v57, %v1719_v14  ;;  %v1699_v16 = vmul.f32 %v7278_v42, %v1677_v21 }
 0x7d6   :  { %v5990_v18 = vpop.eup %5989  ;;  %5993 = vrsqrt.f32 %v1648_v7  ;;  %v1649_v13 = vadd.f32 1e-05, %v1633_v20  ;;  %v1634_v51 = vmul.f32 0.03125, %v1608_v5  ;;  %v7322_v37 = vadd.f32 %v6332_v12, %v1718_v9 }
 0x7d7   :  { %9123 = vst [vmem:[#allocation5_spill] sm:$0xff] %v7316_v8  ;;  %v5992_v2 = vpop.eup %5991  ;;  %v1611_v32 = vpop.xlane.xlu1 %1610  ;;  %v1759_v30 = vsel %vm331_vm0, %v7316_v8, 0.0  ;;  %v1721_v29 = vadd.f32 %v7284_v22, %v1699_v16  ;;  %v1698_v36 = vmul.f32 %v7278_v42, %v1676_v24  ;;  %v1679_v41 = vmul.f32 %v5990_v18, %v7214_v26 }
 0x7d8   :  { %9124 = vst [vmem:[#allocation6_spill] sm:$0xff] %v7322_v37  ;;  %5995 = vrsqrt.f32 %v1649_v13  ;;  %v1650_v44 = vadd.f32 1e-05, %v1634_v51  ;;  %v1635_v45 = vmul.f32 0.03125, %v1611_v32  ;;  %1760 = vadd.xlane.f32.xlu1 %v1759_v30  ;;  %v1756_v48 = vsel %vm331_vm0, %v7322_v37, 0.0 }
 0x7d9   :  { %1757 = vadd.xlane.f32.xlu0 %v1756_v48  ;;  %v1614_v19 = vpop.xlane.xlu0 %1613  ;;  %v7334_v61 = vadd.f32 %v6333_v56, %v1721_v29  ;;  %v1720_v59 = vadd.f32 %v7284_v22, %v1698_v36  ;;  %v1701_v11 = vmul.f32 %v7278_v42, %v1679_v41  ;;  %v1678_v26 = vmul.f32 %v5992_v2, %v7217_v31 }
 0x7da   :  { %5997 = vrsqrt.f32 %v1650_v44  ;;  %v1651_v3 = vadd.f32 1e-05, %v1635_v45  ;;  %v1636_v6 = vmul.f32 0.03125, %v1614_v19 }
 0x7db   :  { %9125 = vst [vmem:[#allocation7_spill] sm:$0xff] %v7334_v61  ;;  %v1617_v10 = vpop.xlane.xlu1 %1616  ;;  %v1765_v34 = vsel %vm331_vm0, %v7334_v61, 0.0  ;;  %v7344_v1 = vadd.f32 %v6334_v23, %v1720_v59  ;;  %v1723_v50 = vadd.f32 %v7284_v22, %v1701_v11  ;;  %v1700_v60 = vmul.f32 %v7278_v42, %v1678_v26  ;;  %v6339_v11 = vld [vmem:[%s9111_s6 + $0x50] sm:$0xff]  ;;  %v6340_v23 = vld [vmem:[%s9111_s6 + $0x58] sm:$0xff] }
 0x7dc   :  { %5999 = vrsqrt.f32 %v1651_v3  ;;  %v1652_v28 = vadd.f32 1e-05, %v1636_v6  ;;  %v1637_v31 = vmul.f32 0.03125, %v1617_v10  ;;  %1766 = vadd.xlane.f32.xlu1 %v1765_v34 }
 0x7dd   :  { %9126 = vst [vmem:[#allocation8_spill] sm:$0xff] %v7344_v1  ;;  %v1762_v40 = vsel %vm331_vm0, %v7344_v1, 0.0  ;;  %v1620_v55 = vpop.xlane.xlu0 %1619  ;;  %v7353_v25 = vadd.f32 %v6335_v4, %v1723_v50  ;;  %v1722_v0 = vadd.f32 %v7284_v22, %v1700_v60 }
 0x7de   :  { %6001 = vrsqrt.f32 %v1652_v28  ;;  %v1653_v33 = vadd.f32 1e-05, %v1637_v31  ;;  %1763 = vadd.xlane.f32.xlu0 %v1762_v40  ;;  %v1638_v63 = vmul.f32 0.03125, %v1620_v55 }
 0x7df   :  { %9127 = vst [vmem:[#allocation9_spill] sm:$0xff] %v7353_v25  ;;  %v1623_v47 = vpop.xlane.xlu1 %1622  ;;  %v1771_v38 = vsel %vm331_vm0, %v7353_v25, 0.0  ;;  %v7361_v14 = vadd.f32 %v6336_v62, %v1722_v0 }
 0x7e0   :  { %v5994_v21 = vpop.eup %5993  ;;  %6003 = vrsqrt.f32 %v1653_v33  ;;  %v1654_v7 = vadd.f32 1e-05, %v1638_v63  ;;  %v1639_v20 = vmul.f32 0.03125, %v1623_v47  ;;  %1772 = vadd.xlane.f32.xlu1 %v1771_v38  ;;  %v6341_v33 = vld [vmem:[%s9111_s6 + $0x60] sm:$0xff] }
 0x7e1   :  { %9128 = vst [vmem:[#allocation10_spill] sm:$0xff] %v7361_v14  ;;  %v1768_v9 = vsel %vm331_vm0, %v7361_v14, 0.0  ;;  %v1680_v24 = vmul.f32 %v5994_v21, %v7228_v17  ;;  %v6337_v17 = vld [vmem:[%s9111_s6 + $0x40] sm:$0xff] }
 0x7e2   :  { %v5996_v5 = vpop.eup %5995  ;;  %6005 = vrsqrt.f32 %v1654_v7  ;;  %v1655_v57 = vadd.f32 1e-05, %v1639_v20  ;;  %1769 = vadd.xlane.f32.xlu0 %v1768_v9  ;;  %v6343_v7 = vld [vmem:[%s9111_s6 + $0x70] sm:$0xff] }
 0x7e3   :  { %v1702_v16 = vmul.f32 %v7278_v42, %v1680_v24  ;;  %v1681_v18 = vmul.f32 %v5996_v5, %v7231_v53 }
 0x7e4   :  { %v5998_v13 = vpop.eup %5997  ;;  %6007 = vrsqrt.f32 %v1655_v57 }
 0x7e5   :  { %v1724_v51 = vadd.f32 %v7284_v22, %v1702_v16  ;;  %v1703_v12 = vmul.f32 %v7278_v42, %v1681_v18  ;;  %v1682_v2 = vmul.f32 %v5998_v13, %v7236_v43  ;;  %v6338_v43 = vld [vmem:[%s9111_s6 + $0x48] sm:$0xff] }
 0x7e6   :  { %v6000_v32 = vpop.eup %5999 }
 0x7e7   :  { %v7374_v30 = vadd.f32 %v6337_v17, %v1724_v51  ;;  %v1725_v29 = vadd.f32 %v7284_v22, %v1703_v12  ;;  %v1704_v36 = vmul.f32 %v7278_v42, %v1682_v2  ;;  %v1683_v53 = vmul.f32 %v6000_v32, %v7242_v58 }
 0x7e8   :  { %v6002_v41 = vpop.eup %6001 }
 0x7e9   :  { %9129 = vst [vmem:[#allocation11_spill] sm:$0xff] %v7374_v30  ;;  %v1774_v44 = vsel %vm331_vm0, %v7374_v30, 0.0  ;;  %v7384_v45 = vadd.f32 %v6338_v43, %v1725_v29  ;;  %v1726_v48 = vadd.f32 %v7284_v22, %v1704_v36  ;;  %v1705_v19 = vmul.f32 %v7278_v42, %v1683_v53 }
 0x7ea   :  { %v6004_v56 = vpop.eup %6003  ;;  %1775 = vadd.xlane.f32.xlu0 %v1774_v44  ;;  %v1684_v59 = vmul.f32 %v6002_v41, %v7248_v52 }
 0x7eb   :  { %9130 = vst [vmem:[#allocation12_spill] sm:$0xff] %v7384_v45  ;;  %v1777_v58 = vsel %vm331_vm0, %v7384_v45, 0.0  ;;  %v7394_v26 = vadd.f32 %v6339_v11, %v1726_v48  ;;  %v1727_v3 = vadd.f32 %v7284_v22, %v1705_v19  ;;  %v1685_v6 = vmul.f32 %v6004_v56, %v7254_v15 }
 0x7ec   :  { %v6006_v10 = vpop.eup %6005  ;;  %1778 = vadd.xlane.f32.xlu1 %v1777_v58  ;;  %v1706_v34 = vmul.f32 %v7278_v42, %v1684_v59 }
 0x7ed   :  { %9131 = vst [vmem:[#allocation13_spill] sm:$0xff] %v7394_v26  ;;  %v1780_v52 = vsel %vm331_vm0, %v7394_v26, 0.0  ;;  %v7404_v50 = vadd.f32 %v6340_v23, %v1727_v3  ;;  %v1707_v60 = vmul.f32 %v7278_v42, %v1685_v6  ;;  %v1686_v28 = vmul.f32 %v6006_v10, %v7260_v27  ;;  %v6342_v27 = vld [vmem:[%s9111_s6 + $0x68] sm:$0xff] }
 0x7ee   :  { %v6008_v31 = vpop.eup %6007  ;;  %1781 = vadd.xlane.f32.xlu0 %v1780_v52  ;;  %v1728_v15 = vadd.f32 %v7284_v22, %v1706_v34 }
 0x7ef   :  { %9132 = vst [vmem:[#allocation14_spill] sm:$0xff] %v7404_v50  ;;  %v1783_v40 = vsel %vm331_vm0, %v7404_v50, 0.0  ;;  %v1729_v55 = vadd.f32 %v7284_v22, %v1707_v60  ;;  %v1708_v4 = vmul.f32 %v7278_v42, %v1686_v28  ;;  %v1687_v0 = vmul.f32 %v6008_v31, %v7266_v35 }
 0x7f0   :  { %1784 = vadd.xlane.f32.xlu1 %v1783_v40  ;;  %v7417_v63 = vadd.f32 %v6341_v33, %v1728_v15 }
 0x7f1   :  { %v7422_v47 = vadd.f32 %v6342_v27, %v1729_v55  ;;  %v1730_v38 = vadd.f32 %v7284_v22, %v1708_v4  ;;  %v1709_v62 = vmul.f32 %v7278_v42, %v1687_v0  ;;  %v6344_v42 = vld [vmem:[%s9111_s6 + $0x78] sm:$0xff]  ;;  %s6355_s6 = smov 72  }
 0x7f2   :  { %9133 = vst [vmem:[#allocation15_spill] sm:$0xff] %v7417_v63  ;;  %v1786_v35 = vsel %vm331_vm0, %v7417_v63, 0.0 }
 0x7f3   :  { %9134 = vst [vmem:[#allocation16_spill] sm:$0xff] %v7422_v47  ;;  %1787 = vadd.xlane.f32.xlu0 %v1786_v35  ;;  %v1789_v21 = vsel %vm331_vm0, %v7422_v47, 0.0  ;;  %v7433_v20 = vadd.f32 %v6343_v7, %v1730_v38  ;;  %v1731_v9 = vadd.f32 %v7284_v22, %v1709_v62 }
 0x7f4   :  { %1790 = vadd.xlane.f32.xlu1 %v1789_v21 }
 0x7f5   :  { %9135 = vst [vmem:[#allocation17_spill] sm:$0xff] %v7433_v20  ;;  %v1792_v24 = vsel %vm331_vm0, %v7433_v20, 0.0  ;;  %v7441_v5 = vadd.f32 %v6344_v42, %v1731_v9 }
 0x7f7   :  { %9136 = vst [vmem:[#allocation18_spill] sm:$0xff] %v7441_v5  ;;  %1793 = vadd.xlane.f32.xlu0 %v1792_v24  ;;  %v1795_v57 = vsel %vm331_vm0, %v7441_v5, 0.0 }
 0x7f8   :  { %1796 = vadd.xlane.f32.xlu1 %v1795_v57 }
 0x85f   :  { %v1752_v16 = vpop.xlane.xlu0 %1751 }
 0x860   :  { %v1798_v18 = vmul.f32 0.03125, %v1752_v16 }
 0x861   :  { %v1755_v13 = vpop.xlane.xlu1 %1754 }
 0x862   :  { %v7446_v22 = vsub.f32 %v7293_v39, %v1798_v18  ;;  %v1799_v51 = vmul.f32 0.03125, %v1755_v13 }
 0x864   :  { %v7449_v12 = vsub.f32 %v7303_v49, %v1799_v51  ;;  %v1830_v2 = vmul.f32 %v7446_v22, %v7446_v22 }
 0x865   :  { %v1761_v32 = vpop.xlane.xlu1 %1760 }
 0x866   :  { %v1801_v17 = vmul.f32 0.03125, %v1761_v32  ;;  %v1758_v29 = vpop.xlane.xlu0 %1757  ;;  %v1846_v36 = vsel %vm331_vm0, %v1830_v2, 0.0  ;;  %v1831_v53 = vmul.f32 %v7449_v12, %v7449_v12 }
 0x867   :  { %v1800_v41 = vmul.f32 0.03125, %v1758_v29  ;;  %1847 = vadd.xlane.f32.xlu0 %v1846_v36 }
 0x868   :  { %v7457_v44 = vsub.f32 %v7316_v8, %v1801_v17  ;;  %v1849_v43 = vsel %vm331_vm0, %v1831_v53, 0.0 }
 0x869   :  { %v7461_v48 = vsub.f32 %v7322_v37, %v1800_v41  ;;  %1850 = vadd.xlane.f32.xlu1 %v1849_v43  ;;  %v1767_v19 = vpop.xlane.xlu1 %1766 }
 0x86a   :  { %v1803_v56 = vmul.f32 0.03125, %v1767_v19  ;;  %v1833_v59 = vmul.f32 %v7457_v44, %v7457_v44 }
 0x86b   :  { %v1764_v58 = vpop.xlane.xlu0 %1763  ;;  %v1832_v11 = vmul.f32 %v7461_v48, %v7461_v48 }
 0x86c   :  { %v7468_v3 = vsub.f32 %v7334_v61, %v1803_v56  ;;  %v1802_v6 = vmul.f32 0.03125, %v1764_v58  ;;  %v1855_v10 = vsel %vm331_vm0, %v1833_v59, 0.0 }
 0x86d   :  { %1856 = vadd.xlane.f32.xlu1 %v1855_v10  ;;  %v1773_v34 = vpop.xlane.xlu1 %1772  ;;  %v1852_v52 = vsel %vm331_vm0, %v1832_v11, 0.0 }
 0x86e   :  { %v7473_v23 = vsub.f32 %v7344_v1, %v1802_v6  ;;  %v1805_v60 = vmul.f32 0.03125, %v1773_v34  ;;  %1853 = vadd.xlane.f32.xlu0 %v1852_v52  ;;  %v1835_v28 = vmul.f32 %v7468_v3, %v7468_v3 }
 0x86f   :  { %v1770_v31 = vpop.xlane.xlu0 %1769 }
 0x870   :  { %v7478_v15 = vsub.f32 %v7353_v25, %v1805_v60  ;;  %v1804_v40 = vmul.f32 0.03125, %v1770_v31  ;;  %v1861_v55 = vsel %vm331_vm0, %v1835_v28, 0.0  ;;  %v1834_v4 = vmul.f32 %v7473_v23, %v7473_v23 }
 0x871   :  { %1862 = vadd.xlane.f32.xlu1 %v1861_v55 }
 0x872   :  { %v7484_v0 = vsub.f32 %v7361_v14, %v1804_v40  ;;  %v1858_v33 = vsel %vm331_vm0, %v1834_v4, 0.0  ;;  %v1837_v27 = vmul.f32 %v7478_v15, %v7478_v15 }
 0x873   :  { %1859 = vadd.xlane.f32.xlu0 %v1858_v33 }
 0x874   :  { %v1867_v38 = vsel %vm331_vm0, %v1837_v27, 0.0  ;;  %v1836_v62 = vmul.f32 %v7484_v0, %v7484_v0 }
 0x875   :  { %1868 = vadd.xlane.f32.xlu1 %v1867_v38 }
 0x876   :  { %v1864_v35 = vsel %vm331_vm0, %v1836_v62, 0.0 }
 0x877   :  { %1865 = vadd.xlane.f32.xlu0 %v1864_v35  ;;  %v1776_v21 = vpop.xlane.xlu0 %1775 }
 0x878   :  { %v1806_v7 = vmul.f32 0.03125, %v1776_v21 }
 0x879   :  { %v1779_v9 = vpop.xlane.xlu1 %1778 }
 0x87a   :  { %v7494_v24 = vsub.f32 %v7374_v30, %v1806_v7  ;;  %v1807_v42 = vmul.f32 0.03125, %v1779_v9 }
 0x87b   :  { %v1782_v57 = vpop.xlane.xlu0 %1781 }
 0x87c   :  { %v7497_v16 = vsub.f32 %v7384_v45, %v1807_v42  ;;  %v1808_v18 = vmul.f32 0.03125, %v1782_v57  ;;  %v1838_v13 = vmul.f32 %v7494_v24, %v7494_v24 }
 0x87d   :  { %v1785_v51 = vpop.xlane.xlu1 %1784 }
 0x87e   :  { %v7502_v2 = vsub.f32 %v7394_v26, %v1808_v18  ;;  %v1809_v32 = vmul.f32 0.03125, %v1785_v51  ;;  %v1870_v17 = vsel %vm331_vm0, %v1838_v13, 0.0  ;;  %v1839_v29 = vmul.f32 %v7497_v16, %v7497_v16 }
 0x87f   :  { %1871 = vadd.xlane.f32.xlu0 %v1870_v17 }
 0x880   :  { %v7508_v36 = vsub.f32 %v7404_v50, %v1809_v32  ;;  %v1788_v53 = vpop.xlane.xlu0 %1787  ;;  %v1873_v41 = vsel %vm331_vm0, %v1839_v29, 0.0  ;;  %v1840_v43 = vmul.f32 %v7502_v2, %v7502_v2 }
 0x881   :  { %v1810_v19 = vmul.f32 0.03125, %v1788_v53  ;;  %1874 = vadd.xlane.f32.xlu1 %v1873_v41  ;;  %v1791_v56 = vpop.xlane.xlu1 %1790 }
 0x882   :  { %v1811_v59 = vmul.f32 0.03125, %v1791_v56  ;;  %v1876_v58 = vsel %vm331_vm0, %v1840_v43, 0.0  ;;  %v1841_v11 = vmul.f32 %v7508_v36, %v7508_v36 }
 0x883   :  { %v7517_v6 = vsub.f32 %v7417_v63, %v1810_v19  ;;  %1877 = vadd.xlane.f32.xlu0 %v1876_v58 }
 0x884   :  { %v7520_v10 = vsub.f32 %v7422_v47, %v1811_v59  ;;  %v1794_v34 = vpop.xlane.xlu0 %1793  ;;  %v1879_v52 = vsel %vm331_vm0, %v1841_v11, 0.0 }
 0x885   :  { %v1812_v60 = vmul.f32 0.03125, %v1794_v34  ;;  %1880 = vadd.xlane.f32.xlu1 %v1879_v52  ;;  %v1797_v28 = vpop.xlane.xlu1 %1796  ;;  %v1842_v31 = vmul.f32 %v7517_v6, %v7517_v6 }
 0x886   :  { %v1813_v40 = vmul.f32 0.03125, %v1797_v28  ;;  %v1843_v55 = vmul.f32 %v7520_v10, %v7520_v10 }
 0x887   :  { %v7528_v4 = vsub.f32 %v7433_v20, %v1812_v60  ;;  %v1882_v33 = vsel %vm331_vm0, %v1842_v31, 0.0  ;;  %v7544_v60 = vld [vmem:[%s9071_s8] ss:$0 sm:$0xff] }
 0x888   :  { %v7532_v27 = vsub.f32 %v7441_v5, %v1813_v40  ;;  %1883 = vadd.xlane.f32.xlu0 %v1882_v33  ;;  %v1885_v38 = vsel %vm331_vm0, %v1843_v55, 0.0 }
 0x889   :  { %1886 = vadd.xlane.f32.xlu1 %v1885_v38  ;;  %v1844_v62 = vmul.f32 %v7528_v4, %v7528_v4 }
 0x88a   :  { %v1845_v35 = vmul.f32 %v7532_v27, %v7532_v27 }
 0x88b   :  { %v1888_v21 = vsel %vm331_vm0, %v1844_v62, 0.0 }
 0x88c   :  { %1889 = vadd.xlane.f32.xlu0 %v1888_v21  ;;  %v1891_v7 = vsel %vm331_vm0, %v1845_v35, 0.0 }
 0x88d   :  { %1892 = vadd.xlane.f32.xlu1 %v1891_v7  ;;  %v7552_v7 = vld [vmem:[%s9072_s9] ss:$0 sm:$0xff] }
 0x8f4   :  { %v1848_v9 = vpop.xlane.xlu0 %1847 }
 0x8f5   :  { %v1894_v42 = vmul.f32 0.03125, %v1848_v9 }
 0x8f6   :  { %v1851_v57 = vpop.xlane.xlu1 %1850 }
 0x8f7   :  { %v1910_v18 = vadd.f32 1e-05, %v1894_v42  ;;  %v1895_v13 = vmul.f32 0.03125, %v1851_v57 }
 0x8f9   :  { %6009 = vrsqrt.f32 %v1910_v18  ;;  %v1911_v51 = vadd.f32 1e-05, %v1895_v13 }
 0x8fa   :  { %v1857_v32 = vpop.xlane.xlu1 %1856 }
 0x8fb   :  { %6011 = vrsqrt.f32 %v1911_v51  ;;  %v1897_v17 = vmul.f32 0.03125, %v1857_v32  ;;  %v1854_v29 = vpop.xlane.xlu0 %1853 }
 0x8fc   :  { %v1896_v53 = vmul.f32 0.03125, %v1854_v29 }
 0x8fd   :  { %v1913_v41 = vadd.f32 1e-05, %v1897_v17 }
 0x8fe   :  { %v1912_v43 = vadd.f32 1e-05, %v1896_v53  ;;  %v1863_v19 = vpop.xlane.xlu1 %1862 }
 0x8ff   :  { %6013 = vrsqrt.f32 %v1913_v41  ;;  %v1899_v56 = vmul.f32 0.03125, %v1863_v19 }
 0x900   :  { %6015 = vrsqrt.f32 %v1912_v43  ;;  %v1860_v59 = vpop.xlane.xlu0 %1859 }
 0x901   :  { %v1915_v58 = vadd.f32 1e-05, %v1899_v56  ;;  %v1898_v11 = vmul.f32 0.03125, %v1860_v59 }
 0x902   :  { %v1869_v34 = vpop.xlane.xlu1 %1868 }
 0x903   :  { %v6010_v52 = vpop.eup %6009  ;;  %6017 = vrsqrt.f32 %v1915_v58  ;;  %v1914_v28 = vadd.f32 1e-05, %v1898_v11  ;;  %v1901_v31 = vmul.f32 0.03125, %v1869_v34 }
 0x904   :  { %v1866_v40 = vpop.xlane.xlu0 %1865  ;;  %v1942_v55 = vmul.f32 %v6010_v52, %v7446_v22 }
 0x905   :  { %v6012_v33 = vpop.eup %6011  ;;  %6019 = vrsqrt.f32 %v1914_v28  ;;  %v1917_v38 = vadd.f32 1e-05, %v1901_v31  ;;  %v1900_v62 = vmul.f32 0.03125, %v1866_v40 }
 0x906   :  { %v1943_v35 = vmul.f32 %v6012_v33, %v7449_v12  ;;  %v1964_v21 = vmul.f32 %v7544_v60, %v1942_v55 }
 0x907   :  { %6021 = vrsqrt.f32 %v1917_v38  ;;  %v1916_v9 = vadd.f32 1e-05, %v1900_v62 }
 0x908   :  { %v1965_v42 = vmul.f32 %v7544_v60, %v1943_v35  ;;  %v1986_v13 = vadd.f32 %v7552_v7, %v1964_v21 }
 0x909   :  { %v6014_v57 = vpop.eup %6013  ;;  %6023 = vrsqrt.f32 %v1916_v9 }
 0x90a   :  { %v6016_v22 = vpop.eup %6015  ;;  %v1945_v18 = vmul.f32 %v6014_v57, %v7457_v44  ;;  %v1987_v12 = vadd.f32 %v7552_v7, %v1965_v42 }
 0x90b   :  { %v1944_v51 = vmul.f32 %v6016_v22, %v7461_v48 }
 0x90c   :  { %v1967_v32 = vmul.f32 %v7544_v60, %v1945_v18  ;;  %v1872_v17 = vpop.xlane.xlu0 %1871  ;;  %v2002_v29 = vpack.c.bf16 %v1987_v12, %v1986_v13 }
 0x90d   :  { %v6018_v53 = vpop.eup %6017  ;;  %v1966_v41 = vmul.f32 %v7544_v60, %v1944_v51  ;;  %v1902_v43 = vmul.f32 0.03125, %v1872_v17 }
 0x90e   :  { %v1989_v19 = vadd.f32 %v7552_v7, %v1967_v32  ;;  %v1875_v56 = vpop.xlane.xlu1 %1874  ;;  %5496 = vmatprep.mubr.msk.bf16.mxu0 %vm331_vm0, %v2002_v29  ;;  %v1947_v44 = vmul.f32 %v6018_v53, %v7468_v3 }
 0x90f   :  { %v6020_v59 = vpop.eup %6019  ;;  %v1988_v58 = vadd.f32 %v7552_v7, %v1966_v41  ;;  %v1918_v11 = vadd.f32 1e-05, %v1902_v43  ;;  %v1903_v48 = vmul.f32 0.03125, %v1875_v56 }
 0x910   :  { %v1878_v34 = vpop.xlane.xlu0 %1877  ;;  %v1946_v52 = vmul.f32 %v6020_v59, %v7473_v23  ;;  %v1969_v28 = vmul.f32 %v7544_v60, %v1947_v44  ;;  %v2259_v23 = vsel %vm2245_vm7, %v7169_v46, 0 }
 0x911   :  { %v6022_v31 = vpop.eup %6021  ;;  %6025 = vrsqrt.f32 %v1918_v11  ;;  %v1919_v40 = vadd.f32 1e-05, %v1903_v48  ;;  %v1904_v55 = vmul.f32 0.03125, %v1878_v34  ;;  %v2003_v33 = vpack.c.bf16 %v1989_v19, %v1988_v58 }
 0x912   :  { %v1881_v38 = vpop.xlane.xlu1 %1880  ;;  %v1968_v62 = vmul.f32 %v7544_v60, %v1946_v52  ;;  %v1991_v3 = vadd.f32 %v7552_v7, %v1969_v28  ;;  %v1949_v35 = vmul.f32 %v6022_v31, %v7478_v15 }
 0x913   :  { %v6024_v21 = vpop.eup %6023  ;;  %6027 = vrsqrt.f32 %v1919_v40  ;;  %v1920_v9 = vadd.f32 1e-05, %v1904_v55  ;;  %v1905_v42 = vmul.f32 0.03125, %v1881_v38  ;;  %5497 = vmatmul.mubr.msk.bf16.vlgmr.msra.gmra.mrb[20].mxu0 %vm331_vm0, %v2003_v33 }
 0x914   :  { %5521 = vmatpush3.bf16.xpose.msra.mxu0 %v2259_v23  ;;  %v1990_v57 = vadd.f32 %v7552_v7, %v1968_v62  ;;  %v1948_v22 = vmul.f32 %v6024_v21, %v7484_v0  ;;  %v1971_v18 = vmul.f32 %v7544_v60, %v1949_v35 }
 0x915   :  { %6029 = vrsqrt.f32 %v1920_v9  ;;  %v1921_v13 = vadd.f32 1e-05, %v1905_v42  ;;  %v1884_v12 = vpop.xlane.xlu0 %1883 }
 0x916   :  { %v1906_v15 = vmul.f32 0.03125, %v1884_v12  ;;  %v1887_v51 = vpop.xlane.xlu1 %1886  ;;  %v2004_v32 = vpack.c.bf16 %v1991_v3, %v1990_v57  ;;  %v1970_v17 = vmul.f32 %v7544_v60, %v1948_v22  ;;  %v1993_v29 = vadd.f32 %v7552_v7, %v1971_v18 }
 0x917   :  { %6031 = vrsqrt.f32 %v1921_v13  ;;  %v1907_v53 = vmul.f32 0.03125, %v1887_v51 }
 0x918   :  { %v1922_v41 = vadd.f32 1e-05, %v1906_v15  ;;  %5500 = vmatprep.mubr.msk.bf16.mxu0 %vm331_vm0, %v2004_v32  ;;  %v1992_v43 = vadd.f32 %v7552_v7, %v1970_v17 }
 0x919   :  { %v1923_v0 = vadd.f32 1e-05, %v1907_v53  ;;  %v1890_v19 = vpop.xlane.xlu0 %1889 }
 0x91a   :  { %6033 = vrsqrt.f32 %v1922_v41  ;;  %v1908_v56 = vmul.f32 0.03125, %v1890_v19  ;;  %v1893_v44 = vpop.xlane.xlu1 %1892  ;;  %v2005_v59 = vpack.c.bf16 %v1993_v29, %v1992_v43 }
 0x91b   :  { %v6026_v58 = vpop.eup %6025  ;;  %6035 = vrsqrt.f32 %v1923_v0  ;;  %v1909_v11 = vmul.f32 0.03125, %v1893_v44 }
 0x91c   :  { %v1924_v48 = vadd.f32 1e-05, %v1908_v56  ;;  %5501 = vmatmul.mubr.msk.bf16.gmra.mrb[24].mxu0 %vm331_vm0, %v2005_v59  ;;  %v1950_v34 = vmul.f32 %v6026_v58, %v7494_v24  ;;  %v2149_v56 = vld [vmem:[%s9073_s19 + $0x10] sm:$0xff] }
 0x91d   :  { %v6028_v52 = vpop.eup %6027  ;;  %v1925_v28 = vadd.f32 1e-05, %v1909_v11 }
 0x91e   :  { %6037 = vrsqrt.f32 %v1924_v48  ;;  %v1951_v31 = vmul.f32 %v6028_v52, %v7497_v16  ;;  %v1972_v40 = vmul.f32 %v7544_v60, %v1950_v34 }
 0x91f   :  { %v6030_v55 = vpop.eup %6029  ;;  %6039 = vrsqrt.f32 %v1925_v28 }
 0x920   :  { %v1973_v33 = vmul.f32 %v7544_v60, %v1951_v31  ;;  %v1952_v38 = vmul.f32 %v6030_v55, %v7502_v2  ;;  %v1994_v3 = vadd.f32 %v7552_v7, %v1972_v40  ;;  %v2153_v55 = vld [vmem:[%s9073_s19 + $0x30] sm:$0xff] }
 0x921   :  { %v6032_v62 = vpop.eup %6031 }
 0x922   :  { %v1995_v35 = vadd.f32 %v7552_v7, %v1973_v33  ;;  %v1953_v24 = vmul.f32 %v6032_v62, %v7508_v36  ;;  %v1974_v21 = vmul.f32 %v7544_v60, %v1952_v38  ;;  %v2154_v33 = vld [vmem:[%s9073_s19 + $0x38] sm:$0xff]  ;;  %v2151_v62 = vld [vmem:[%s9073_s19 + $0x20] sm:$0xff] }
 0x924   :  { %v6034_v9 = vpop.eup %6033  ;;  %v2006_v42 = vpack.c.bf16 %v1995_v35, %v1994_v3  ;;  %v1975_v16 = vmul.f32 %v7544_v60, %v1953_v24  ;;  %v1996_v2 = vadd.f32 %v7552_v7, %v1974_v21  ;;  %v2152_v3 = vld [vmem:[%s9073_s19 + $0x28] sm:$0xff] }
 0x925   :  { %v6036_v23 = vpop.eup %6035  ;;  %v1954_v57 = vmul.f32 %v6034_v9, %v7517_v6 }
 0x926   :  { %5504 = vmatprep.mubr.msk.bf16.mxu0 %vm331_vm0, %v2006_v42  ;;  %v1997_v22 = vadd.f32 %v7552_v7, %v1975_v16  ;;  %v1955_v18 = vmul.f32 %v6036_v23, %v7520_v10 }
 0x927   :  { %v1976_v13 = vmul.f32 %v7544_v60, %v1954_v57 }
 0x928   :  { %v6038_v36 = vpop.eup %6037  ;;  %v2007_v12 = vpack.c.bf16 %v1997_v22, %v1996_v2  ;;  %v1977_v15 = vmul.f32 %v7544_v60, %v1955_v18 }
 0x929   :  { %v6040_v51 = vpop.eup %6039  ;;  %v1956_v32 = vmul.f32 %v6038_v36, %v7528_v4  ;;  %v1998_v6 = vadd.f32 %v7552_v7, %v1976_v13 }
 0x92a   :  { %5505 = vmatmul.mubr.msk.bf16.gmra.mrb[28].mxu0 %vm331_vm0, %v2007_v12  ;;  %v1999_v17 = vadd.f32 %v7552_v7, %v1977_v15  ;;  %v1957_v29 = vmul.f32 %v6040_v51, %v7532_v27  ;;  %v2150_v27 = vld [vmem:[%s9073_s19 + $0x18] sm:$0xff] }
 0x92b   :  { %v1978_v53 = vmul.f32 %v7544_v60, %v1956_v32 }
 0x92c   :  { %v2008_v10 = vpack.c.bf16 %v1999_v17, %v1998_v6  ;;  %v1979_v41 = vmul.f32 %v7544_v60, %v1957_v29  ;;  %v2147_v60 = vld [vmem:[%s9073_s19] sm:$0xff] }
 0x92d   :  { %v2000_v43 = vadd.f32 %v7552_v7, %v1978_v53 }
 0x92e   :  { %5508 = vmatprep.mubr.msk.bf16.mxu0 %vm331_vm0, %v2008_v10  ;;  %v2001_v0 = vadd.f32 %v7552_v7, %v1979_v41  ;;  %v2148_v7 = vld [vmem:[%s9073_s19 + $0x8] sm:$0xff]  ;;  %s6350_s19 = smov 120  }
 0x930   :  { %v2009_v4 = vpack.c.bf16 %v2001_v0, %v2000_v43 }
 0x932   :  { %5509 = vmatmul.mubr.msk.bf16.gmra.mrb[32].mxu0 %vm331_vm0, %v2009_v4 }
 0x9e6   :  { %v5498_v19 = vpop.f32.mrb[20].mxu0 }
 0x9e7   :  { %v2084_v44 = vpop.f32.mrb[21].mxu0  ;;  %v2157_v58 = vadd.f32 %v5498_v19, %v2149_v56 }
 0x9e8   :  { %v5499_v59 = vpop.f32.mrb[22].mxu0  ;;  %v2155_v34 = vadd.f32 %v2147_v60, %v2084_v44 }
 0x9e9   :  { %v2158_v11 = vadd.f32 %v5499_v59, %v2150_v27  ;;  %v2087_v48 = vpop.f32.mrb[23].mxu0 }
 0x9ea   :  { %v2156_v52 = vadd.f32 %v2148_v7, %v2087_v48 }
 0x9eb   :  { %v7621_v28 = vpack.c.bf16 %v2158_v11, %v2157_v58 }
 0x9ec   :  { %v7623_v31 = vpack.c.bf16 %v2156_v52, %v2155_v34 }
 0x9ee   :  { %5522 = vmatprep.mubr.msk.bf16.mxu0 %vm2245_vm7, %v7623_v31 }
 0x9ef   :  { %v5502_v40 = vpop.f32.mrb[24].mxu0  ;;  %5523 = vmatmul.mubr.msk.bf16.vlgmr.msra.gmra.mrb[36].mxu0 %vm2245_vm7, %v7621_v28 }
 0x9f0   :  { %v2100_v38 = vpop.f32.mrb[25].mxu0  ;;  %v2161_v24 = vadd.f32 %v5502_v40, %v2153_v55 }
 0x9f1   :  { %v5503_v35 = vpop.f32.mrb[26].mxu0  ;;  %v2159_v42 = vadd.f32 %v2151_v62, %v2100_v38 }
 0x9f2   :  { %v2162_v21 = vadd.f32 %v5503_v35, %v2154_v33  ;;  %v2103_v9 = vpop.f32.mrb[27].mxu0 }
 0x9f3   :  { %v2160_v16 = vadd.f32 %v2152_v3, %v2103_v9 }
 0x9f4   :  { %v7641_v23 = vpack.c.bf16 %v2162_v21, %v2161_v24 }
 0x9f5   :  { %v7643_v57 = vpack.c.bf16 %v2160_v16, %v2159_v42 }
 0x9f7   :  { %5526 = vmatprep.mubr.msk.bf16.mxu0 %vm2245_vm7, %v7643_v57 }
 0x9f8   :  { %5527 = vmatmul.mubr.msk.bf16.gmra.mrb[40].mxu0 %vm2245_vm7, %v7641_v23 }
 0x9fd   :  { %v5506_v2 = vpop.f32.mrb[28].mxu0 }
 0x9fe   :  { %v2116_v22 = vpop.f32.mrb[29].mxu0  ;;  %v2165_v13 = vadd.f32 %v5506_v2, %v2149_v56 }
 0x9ff   :  { %v5507_v18 = vpop.f32.mrb[30].mxu0  ;;  %v2163_v15 = vadd.f32 %v2147_v60, %v2116_v22 }
 0xa00   :  { %v2166_v36 = vadd.f32 %v5507_v18, %v2150_v27  ;;  %v2119_v12 = vpop.f32.mrb[31].mxu0 }
 0xa01   :  { %v2164_v51 = vadd.f32 %v2148_v7, %v2119_v12 }
 0xa02   :  { %v7649_v32 = vpack.c.bf16 %v2166_v36, %v2165_v13 }
 0xa03   :  { %v7651_v6 = vpack.c.bf16 %v2164_v51, %v2163_v15 }
 0xa05   :  { %v5510_v17 = vpop.f32.mrb[32].mxu0  ;;  %5532 = vmatprep.mubr.msk.bf16.mxu1 %vm2245_vm7, %v7651_v6 }
 0xa06   :  { %v2132_v29 = vpop.f32.mrb[33].mxu0  ;;  %5533 = vmatmul.mubr.msk.bf16.vlgmr.msra.gmra.mrb[60].mxu1 %vm2245_vm7, %v7649_v32  ;;  %v2169_v10 = vadd.f32 %v5510_v17, %v2153_v55 }
 0xa07   :  { %v5511_v53 = vpop.f32.mrb[34].mxu0  ;;  %v2167_v0 = vadd.f32 %v2151_v62, %v2132_v29 }
 0xa08   :  { %v2170_v41 = vadd.f32 %v5511_v53, %v2154_v33  ;;  %v2135_v43 = vpop.f32.mrb[35].mxu0 }
 0xa09   :  { %v2168_v4 = vadd.f32 %v2152_v3, %v2135_v43 }
 0xa0a   :  { %v7657_v19 = vpack.c.bf16 %v2170_v41, %v2169_v10 }
 0xa0b   :  { %v7659_v56 = vpack.c.bf16 %v2168_v4, %v2167_v0 }
 0xa0d   :  { %5536 = vmatprep.mubr.msk.bf16.mxu1 %vm2245_vm7, %v7659_v56 }
 0xa0e   :  { %5537 = vmatmul.mubr.msk.bf16.gmra.mrb[64].mxu1 %vm2245_vm7, %v7657_v19 }
 0xac2   :  { %v5524_v27 = vpop.f32.mrb[36].mxu0 }
 0xac3   :  { %v7665_v44 = vpop.f32.mrb[37].mxu0  ;;  %v2412_v60 = vsel %vm2245_vm7, %v5524_v27, -inf }
 0xac4   :  { %2413 = vmax.xlane.f32.xlu0 %v2412_v60  ;;  %v5525_v7 = vpop.f32.mrb[38].mxu0  ;;  %v2406_v11 = vsel %vm2245_vm7, %v7665_v44, -inf }
 0xac5   :  { %v7668_v59 = vpop.f32.mrb[39].mxu0  ;;  %v2415_v58 = vsel %vm2245_vm7, %v5525_v7, -inf }
 0xac6   :  { %2416 = vmax.xlane.f32.xlu1 %v2415_v58  ;;  %v2409_v48 = vsel %vm2245_vm7, %v7668_v59, -inf }
 0xac8   :  { %2407 = vmax.xlane.f32.xlu0 %v2406_v11 }
 0xaca   :  { %2410 = vmax.xlane.f32.xlu1 %v2409_v48 }
 0xacb   :  { %v5528_v34 = vpop.f32.mrb[40].mxu0 }
 0xacc   :  { %v7675_v52 = vpop.f32.mrb[41].mxu0  ;;  %v2424_v40 = vsel %vm2245_vm7, %v5528_v34, -inf }
 0xacd   :  { %2425 = vmax.xlane.f32.xlu0 %v2424_v40  ;;  %v5529_v55 = vpop.f32.mrb[42].mxu0  ;;  %v2418_v62 = vsel %vm2245_vm7, %v7675_v52, -inf }
 0xace   :  { %v7678_v33 = vpop.f32.mrb[43].mxu0  ;;  %v2427_v38 = vsel %vm2245_vm7, %v5529_v55, -inf }
 0xacf   :  { %2428 = vmax.xlane.f32.xlu1 %v2427_v38  ;;  %v2421_v3 = vsel %vm2245_vm7, %v7678_v33, -inf }
 0xad1   :  { %2419 = vmax.xlane.f32.xlu0 %v2418_v62 }
 0xad3   :  { %2422 = vmax.xlane.f32.xlu1 %v2421_v3 }
 0xad9   :  { %v7685_v35 = vpop.f32.mrb[60].mxu1 }
 0xada   :  { %v7687_v24 = vpop.f32.mrb[61].mxu1  ;;  %v2436_v21 = vsel %vm2245_vm7, %v7685_v35, -inf }
 0xadb   :  { %v7691_v9 = vpop.f32.mrb[62].mxu1  ;;  %2437 = vmax.xlane.f32.xlu0 %v2436_v21  ;;  %v2430_v2 = vsel %vm2245_vm7, %v7687_v24, -inf }
 0xadc   :  { %v7693_v42 = vpop.f32.mrb[63].mxu1  ;;  %v2439_v16 = vsel %vm2245_vm7, %v7691_v9, -inf }
 0xadd   :  { %2440 = vmax.xlane.f32.xlu1 %v2439_v16  ;;  %v2433_v22 = vsel %vm2245_vm7, %v7693_v42, -inf }
 0xadf   :  { %2431 = vmax.xlane.f32.xlu0 %v2430_v2 }
 0xae1   :  { %2434 = vmax.xlane.f32.xlu1 %v2433_v22  ;;  %v7701_v18 = vpop.f32.mrb[64].mxu1 }
 0xae2   :  { %v7703_v13 = vpop.f32.mrb[65].mxu1  ;;  %v2448_v36 = vsel %vm2245_vm7, %v7701_v18, -inf }
 0xae3   :  { %2449 = vmax.xlane.f32.xlu0 %v2448_v36  ;;  %v7707_v12 = vpop.f32.mrb[66].mxu1  ;;  %v2442_v51 = vsel %vm2245_vm7, %v7703_v13, -inf }
 0xae4   :  { %v7709_v15 = vpop.f32.mrb[67].mxu1  ;;  %v2451_v17 = vsel %vm2245_vm7, %v7707_v12, -inf }
 0xae5   :  { %v2445_v29 = vsel %vm2245_vm7, %v7709_v15, -inf }
 0xae7   :  { %2443 = vmax.xlane.f32.xlu0 %v2442_v51 }
 0xaf2   :  { %2768 = vrot.lane.b32.xlu1 %v7169_v46, %s6350_s19 }
 0xafd   :  { %2591 = vrot.lane.b32.xlu0 %v7169_v46, %s6348_s4 }
 0xb01   :  { %2760 = vrot.lane.b32.xlu0 %v7623_v31, %s6350_s19 }
 0xb05   :  { %2764 = vrot.lane.b32.xlu0 %v7643_v57, %s6350_s19 }
 0xb16   :  { %2452 = vmax.xlane.f32.xlu1 %v2451_v17 }
 0xb1a   :  { %2446 = vmax.xlane.f32.xlu1 %v2445_v29 }
 0xb2b   :  { %2674 = vrot.lane.b32.xlu1 %v7171_v54, %s6348_s4  ;;  %s6351_s4 = smov 112  }
 0xb2f   :  { %2762 = vrot.lane.b32.xlu1 %v7621_v28, %s6350_s19 }
 0xb51   :  { %v2414_v53 = vpop.xlane.xlu0 %2413 }
 0xb52   :  { %v2456_v10 = vsub.f32 %v5524_v27, %v2414_v53 }
 0xb53   :  { %v2417_v41 = vpop.xlane.xlu1 %2416 }
 0xb54   :  { %v2474_v43 = vmul.f32 1.442695, %v2456_v10  ;;  %v2457_v0 = vsub.f32 %v5525_v7, %v2417_v41 }
 0xb55   :  { %v2408_v4 = vpop.xlane.xlu0 %2407 }
 0xb56   :  { %6041 = vpow2.f32 %v2474_v43  ;;  %v2476_v60 = vmul.f32 1.442695, %v2457_v0  ;;  %v2454_v58 = vsub.f32 %v7665_v44, %v2408_v4 }
 0xb57   :  { %v2411_v11 = vpop.xlane.xlu1 %2410 }
 0xb58   :  { %6043 = vpow2.f32 %v2476_v60  ;;  %v2470_v48 = vmul.f32 1.442695, %v2454_v58  ;;  %v2455_v40 = vsub.f32 %v7668_v59, %v2411_v11 }
 0xb5a   :  { %6045 = vpow2.f32 %v2470_v48  ;;  %v2472_v38 = vmul.f32 1.442695, %v2455_v40  ;;  %v2426_v62 = vpop.xlane.xlu0 %2425 }
 0xb5b   :  { %v2460_v3 = vsub.f32 %v5528_v34, %v2426_v62 }
 0xb5c   :  { %6047 = vpow2.f32 %v2472_v38  ;;  %v2429_v21 = vpop.xlane.xlu1 %2428 }
 0xb5d   :  { %v2482_v27 = vmul.f32 1.442695, %v2460_v3  ;;  %v2461_v16 = vsub.f32 %v5529_v55, %v2429_v21 }
 0xb5e   :  { %v2420_v2 = vpop.xlane.xlu0 %2419 }
 0xb5f   :  { %6049 = vpow2.f32 %v2482_v27  ;;  %v2484_v7 = vmul.f32 1.442695, %v2461_v16  ;;  %v2458_v22 = vsub.f32 %v7675_v52, %v2420_v2 }
 0xb60   :  { %v7732_v36 = vpop.eup %6041  ;;  %v2423_v44 = vpop.xlane.xlu1 %2422 }
 0xb61   :  { %6051 = vpow2.f32 %v2484_v7  ;;  %v2478_v51 = vmul.f32 1.442695, %v2458_v22  ;;  %v2459_v59 = vsub.f32 %v7678_v33, %v2423_v44  ;;  %v2508_v17 = vsel %vm2245_vm7, %v7732_v36, 0.0 }
 0xb62   :  { %v7737_v34 = vpop.eup %6043  ;;  %2509 = vadd.xlane.f32.xlu0 %v2508_v17 }
 0xb63   :  { %6053 = vpow2.f32 %v2478_v51  ;;  %v2480_v55 = vmul.f32 1.442695, %v2459_v59  ;;  %v2511_v29 = vsel %vm2245_vm7, %v7737_v34, 0.0 }
 0xb64   :  { %v7741_v53 = vpop.eup %6045  ;;  %2512 = vadd.xlane.f32.xlu1 %v2511_v29 }
 0xb65   :  { %6055 = vpow2.f32 %v2480_v55  ;;  %v2502_v52 = vsel %vm2245_vm7, %v7741_v53, 0.0 }
 0xb66   :  { %v7745_v10 = vpop.eup %6047  ;;  %2503 = vadd.xlane.f32.xlu0 %v2502_v52 }
 0xb67   :  { %v2505_v33 = vsel %vm2245_vm7, %v7745_v10, 0.0 }
 0xb68   :  { %2506 = vadd.xlane.f32.xlu1 %v2505_v33  ;;  %v2438_v41 = vpop.xlane.xlu0 %2437 }
 0xb69   :  { %v7749_v43 = vpop.eup %6049  ;;  %v2464_v0 = vsub.f32 %v7685_v35, %v2438_v41 }
 0xb6a   :  { %v2520_v4 = vsel %vm2245_vm7, %v7749_v43, 0.0  ;;  %v2441_v60 = vpop.xlane.xlu1 %2440 }
 0xb6b   :  { %v7754_v58 = vpop.eup %6051  ;;  %v2490_v11 = vmul.f32 1.442695, %v2464_v0  ;;  %2521 = vadd.xlane.f32.xlu0 %v2520_v4  ;;  %v2465_v48 = vsub.f32 %v7691_v9, %v2441_v60 }
 0xb6c   :  { %v2523_v40 = vsel %vm2245_vm7, %v7754_v58, 0.0  ;;  %v2432_v38 = vpop.xlane.xlu0 %2431 }
 0xb6d   :  { %v7759_v62 = vpop.eup %6053  ;;  %6057 = vpow2.f32 %v2490_v11  ;;  %v2492_v3 = vmul.f32 1.442695, %v2465_v48  ;;  %2524 = vadd.xlane.f32.xlu1 %v2523_v40  ;;  %v2462_v35 = vsub.f32 %v7687_v24, %v2432_v38 }
 0xb6e   :  { %v2514_v21 = vsel %vm2245_vm7, %v7759_v62, 0.0  ;;  %v2435_v27 = vpop.xlane.xlu1 %2434 }
 0xb6f   :  { %v7764_v16 = vpop.eup %6055  ;;  %6059 = vpow2.f32 %v2492_v3  ;;  %v2486_v2 = vmul.f32 1.442695, %v2462_v35  ;;  %2515 = vadd.xlane.f32.xlu0 %v2514_v21  ;;  %v2463_v9 = vsub.f32 %v7693_v42, %v2435_v27 }
 0xb70   :  { %v2517_v7 = vsel %vm2245_vm7, %v7764_v16, 0.0  ;;  %v2450_v22 = vpop.xlane.xlu0 %2449 }
 0xb71   :  { %6061 = vpow2.f32 %v2486_v2  ;;  %v2488_v44 = vmul.f32 1.442695, %v2463_v9  ;;  %2518 = vadd.xlane.f32.xlu1 %v2517_v7  ;;  %v2468_v24 = vsub.f32 %v7701_v18, %v2450_v22 }
 0xb72   :  { %v7779_v41 = vpop.permute.xlu1 %2768 }
 0xb73   :  { %6063 = vpow2.f32 %v2488_v44  ;;  %v2498_v51 = vmul.f32 1.442695, %v2468_v24 }
 0xb74   :  { %v2444_v59 = vpop.xlane.xlu0 %2443 }
 0xb75   :  { %6065 = vpow2.f32 %v2498_v51  ;;  %v2466_v17 = vsub.f32 %v7703_v13, %v2444_v59 }
 0xb77   :  { %v7771_v55 = vpop.eup %6057  ;;  %v2494_v29 = vmul.f32 1.442695, %v2466_v17 }
 0xb78   :  { %v2592_v52 = vpop.permute.xlu0 %2591  ;;  %v2532_v42 = vsel %vm2245_vm7, %v7771_v55, 0.0 }
 0xb79   :  { %v7775_v33 = vpop.eup %6059  ;;  %6067 = vpow2.f32 %v2494_v29  ;;  %2533 = vadd.xlane.f32.xlu0 %v2532_v42  ;;  %5710 = vmatprep.subr.msk.bf16.mxu0 %vm124_vm2, %v2592_v52  ;;  %v2606_v18 = vsel %vm124_vm2, %v2592_v52, 0 }
 0xb7a   :  { %5541 = vmatpush3.bf16.msra.mxu0 %v2606_v18  ;;  %v2535_v13 = vsel %vm2245_vm7, %v7775_v33, 0.0 }
 0xb7b   :  { %v7783_v0 = vpop.eup %6061  ;;  %5712 = vmatprep.subr.msk.bf16.mxu0 %vm2245_vm7, %v7779_v41  ;;  %2536 = vadd.xlane.f32.xlu1 %v2535_v13 }
 0xb7c   :  { %v2526_v4 = vsel %vm2245_vm7, %v7783_v0, 0.0 }
 0xb7d   :  { %v7789_v60 = vpop.eup %6063  ;;  %2527 = vadd.xlane.f32.xlu0 %v2526_v4 }
 0xb7e   :  { %v2529_v11 = vsel %vm2245_vm7, %v7789_v60, 0.0 }
 0xb7f   :  { %v7793_v48 = vpop.eup %6065  ;;  %2530 = vadd.xlane.f32.xlu1 %v2529_v11 }
 0xb80   :  { %v2544_v40 = vsel %vm2245_vm7, %v7793_v48, 0.0 }
 0xb81   :  { %2545 = vadd.xlane.f32.xlu0 %v2544_v40 }
 0xb83   :  { %v7797_v38 = vpop.eup %6067 }
 0xb84   :  { %v2538_v3 = vsel %vm2245_vm7, %v7797_v38, 0.0 }
 0xb85   :  { %2539 = vadd.xlane.f32.xlu0 %v2538_v3 }
 0xb9b   :  { %2862 = vrot.lane.b32.xlu0 %v7171_v54, %s6350_s19 }
 0xb9f   :  { %2856 = vrot.lane.b32.xlu0 %v7649_v32, %s6350_s19 }
 0xba3   :  { %2860 = vrot.lane.b32.xlu0 %v7657_v19, %s6350_s19  ;;  %v2453_v35 = vpop.xlane.xlu1 %2452 }
 0xba4   :  { %v2469_v21 = vsub.f32 %v7707_v12, %v2453_v35 }
 0xba6   :  { %v2500_v27 = vmul.f32 1.442695, %v2469_v21 }
 0xba7   :  { %v2447_v2 = vpop.xlane.xlu1 %2446 }
 0xba8   :  { %6069 = vpow2.f32 %v2500_v27  ;;  %v2467_v9 = vsub.f32 %v7709_v15, %v2447_v2  ;;  %v2761_v15 = vpop.permute.xlu0 %2760 }
 0xbaa   :  { %v2496_v7 = vmul.f32 1.442695, %v2467_v9 }
 0xbab   :  { %v2675_v22 = vpop.permute.xlu1 %2674 }
 0xbac   :  { %6071 = vpow2.f32 %v2496_v7  ;;  %5711 = vmatprep.subr.msk.bf16.mxu1 %vm124_vm2, %v2675_v22  ;;  %v2689_v44 = vsel %vm124_vm2, %v2675_v22, 0  ;;  %v7825_v17 = vpop.permute.xlu0 %2764 }
 0xbad   :  { %5551 = vmatpush3.bf16.msra.mxu1 %v2689_v44 }
 0xbaf   :  { %v2763_v29 = vpop.permute.xlu1 %2762 }
 0xbb2   :  { %v7811_v24 = vpop.eup %6069 }
 0xbb3   :  { %v2547_v51 = vsel %vm2245_vm7, %v7811_v24, 0.0 }
 0xbb4   :  { %2548 = vadd.xlane.f32.xlu1 %v2547_v51 }
 0xbb6   :  { %v7815_v12 = vpop.eup %6071 }
 0xbb7   :  { %v2541_v59 = vsel %vm2245_vm7, %v7815_v12, 0.0 }
 0xbb8   :  { %2542 = vadd.xlane.f32.xlu1 %v2541_v59 }
 0xbc9   :  { %2766 = vrot.lane.b32.xlu1 %v7641_v23, %s6350_s19 }
 0xbcd   :  { %2854 = vrot.lane.b32.xlu1 %v7651_v6, %s6350_s19 }
 0xbd1   :  { %2858 = vrot.lane.b32.xlu1 %v7659_v56, %s6350_s19 }
 0xbef   :  { %v2510_v52 = vpop.xlane.xlu0 %2509 }
 0xbf1   :  { %v2513_v42 = vpop.xlane.xlu1 %2512 }
 0xbf2   :  { %6073 = vrcp.f32 %v2513_v42  ;;  %v2783_v42 = vsel %vm2245_vm7, %v7779_v41, 0 }
 0xbf3   :  { %v2504_v18 = vpop.xlane.xlu0 %2503 }
 0xbf4   :  { %6075 = vrcp.f32 %v2504_v18 }
 0xbf5   :  { %6077 = vrcp.f32 %v2510_v52  ;;  %v2507_v13 = vpop.xlane.xlu1 %2506 }
 0xbf6   :  { %6079 = vrcp.f32 %v2507_v13 }
 0xbf8   :  { %v2522_v4 = vpop.xlane.xlu0 %2521 }
 0xbfa   :  { %v2525_v11 = vpop.xlane.xlu1 %2524 }
 0xbfb   :  { %6081 = vrcp.f32 %v2525_v11 }
 0xbfc   :  { %v2516_v40 = vpop.xlane.xlu0 %2515  ;;  %v6074_v3 = vpop.eup %6073 }
 0xbfd   :  { %6083 = vrcp.f32 %v2516_v40  ;;  %v2569_v9 = vmul.f32 %v6074_v3, %v7737_v34 }
 0xbfe   :  { %v6076_v35 = vpop.eup %6075  ;;  %6085 = vrcp.f32 %v2522_v4  ;;  %v2519_v21 = vpop.xlane.xlu1 %2518 }
 0xbff   :  { %v6078_v27 = vpop.eup %6077  ;;  %6087 = vrcp.f32 %v2519_v21  ;;  %v2566_v7 = vmul.f32 %v6076_v35, %v7741_v53 }
 0xc00   :  { %v6080_v2 = vpop.eup %6079  ;;  %v2568_v44 = vmul.f32 %v6078_v27, %v7732_v36 }
 0xc01   :  { %v2567_v22 = vmul.f32 %v6080_v2, %v7745_v10 }
 0xc02   :  { %v2583_v59 = vpack.c.bf16 %v2569_v9, %v2568_v44 }
 0xc03   :  { %v2582_v51 = vpack.c.bf16 %v2567_v22, %v2566_v7 }
 0xc05   :  { %5542 = vmatprep.mubr.msk.bf16.mxu0 %vm2245_vm7, %v2582_v51  ;;  %v6082_v52 = vpop.eup %6081 }
 0xc06   :  { %5543 = vmatmul.mubr.msk.bf16.vlgmr.msra.gmra.mrb[44].mxu0 %vm2245_vm7, %v2583_v59  ;;  %v2534_v18 = vpop.xlane.xlu0 %2533  ;;  %v2573_v10 = vmul.f32 %v6082_v52, %v7754_v58 }
 0xc07   :  { %v6084_v13 = vpop.eup %6083  ;;  %5561 = vmatpush3.bf16.xpose.msra.mxu0 %v2783_v42 }
 0xc08   :  { %v6086_v34 = vpop.eup %6085  ;;  %v2537_v4 = vpop.xlane.xlu1 %2536  ;;  %v2570_v11 = vmul.f32 %v6084_v13, %v7759_v62 }
 0xc09   :  { %v6088_v53 = vpop.eup %6087  ;;  %6089 = vrcp.f32 %v2537_v4  ;;  %v2572_v3 = vmul.f32 %v6086_v34, %v7749_v43 }
 0xc0a   :  { %v2528_v36 = vpop.xlane.xlu0 %2527  ;;  %v2571_v40 = vmul.f32 %v6088_v53, %v7764_v16 }
 0xc0b   :  { %6091 = vrcp.f32 %v2528_v36  ;;  %v2585_v21 = vpack.c.bf16 %v2573_v10, %v2572_v3 }
 0xc0c   :  { %6093 = vrcp.f32 %v2534_v18  ;;  %v2584_v35 = vpack.c.bf16 %v2571_v40, %v2570_v11  ;;  %v2531_v41 = vpop.xlane.xlu1 %2530 }
 0xc0d   :  { %6095 = vrcp.f32 %v2531_v41 }
 0xc0e   :  { %5546 = vmatprep.mubr.msk.bf16.mxu0 %vm2245_vm7, %v2584_v35  ;;  %v2546_v27 = vpop.xlane.xlu0 %2545 }
 0xc0f   :  { %5547 = vmatmul.mubr.msk.bf16.gmra.mrb[48].mxu0 %vm2245_vm7, %v2585_v21 }
 0xc10   :  { %5562 = vmatprep.mubr.msk.bf16.mxu0 %vm2245_vm7, %v2761_v15 }
 0xc12   :  { %v2540_v58 = vpop.xlane.xlu0 %2539 }
 0xc13   :  { %v6090_v2 = vpop.eup %6089 }
 0xc14   :  { %v2577_v43 = vmul.f32 %v6090_v2, %v7775_v33 }
 0xc15   :  { %v6092_v62 = vpop.eup %6091 }
 0xc16   :  { %v6094_v9 = vpop.eup %6093  ;;  %v2863_v16 = vpop.permute.xlu0 %2862  ;;  %v2574_v22 = vmul.f32 %v6092_v62, %v7783_v0 }
 0xc17   :  { %v6096_v7 = vpop.eup %6095  ;;  %5563 = vmatmul.mubr.msk.bf16.vlgmr.msra.gmra.mrb[52].mxu0 %vm2245_vm7, %v2763_v29  ;;  %5713 = vmatprep.subr.msk.bf16.mxu1 %vm2245_vm7, %v2863_v16  ;;  %v2576_v15 = vmul.f32 %v6094_v9, %v7771_v55  ;;  %v2877_v33 = vsel %vm2245_vm7, %v2863_v16, 0 }
 0xc18   :  { %5566 = vmatprep.mubr.msk.bf16.mxu0 %vm2245_vm7, %v7825_v17  ;;  %v2575_v44 = vmul.f32 %v6096_v7, %v7789_v60 }
 0xc19   :  { %v2587_v59 = vpack.c.bf16 %v2577_v43, %v2576_v15 }
 0xc1a   :  { %v2586_v51 = vpack.c.bf16 %v2575_v44, %v2574_v22  ;;  %v2857_v11 = vpop.permute.xlu0 %2856 }
 0xc1c   :  { %5552 = vmatprep.mubr.msk.bf16.mxu1 %vm2245_vm7, %v2586_v51 }
 0xc1d   :  { %5553 = vmatmul.mubr.msk.bf16.vlgmr.msra.gmra.mrb[68].mxu1 %vm2245_vm7, %v2587_v59 }
 0xc1e   :  { %5571 = vmatpush3.bf16.xpose.msra.mxu1 %v2877_v33 }
 0xc41   :  { %v2549_v29 = vpop.xlane.xlu1 %2548 }
 0xc42   :  { %6097 = vrcp.f32 %v2549_v29 }
 0xc43   :  { %6099 = vrcp.f32 %v2540_v58 }
 0xc44   :  { %6101 = vrcp.f32 %v2546_v27 }
 0xc45   :  { %v2543_v17 = vpop.xlane.xlu1 %2542 }
 0xc46   :  { %6103 = vrcp.f32 %v2543_v17 }
 0xc49   :  { %v2767_v0 = vpop.permute.xlu1 %2766 }
 0xc4a   :  { %5567 = vmatmul.mubr.msk.bf16.gmra.mrb[56].mxu0 %vm2245_vm7, %v2767_v0 }
 0xc4c   :  { %v6098_v60 = vpop.eup %6097 }
 0xc4d   :  { %v6100_v55 = vpop.eup %6099  ;;  %v2581_v18 = vmul.f32 %v6098_v60, %v7811_v24  ;;  %v2855_v36 = vpop.permute.xlu1 %2854 }
 0xc4e   :  { %v6102_v52 = vpop.eup %6101  ;;  %v2578_v13 = vmul.f32 %v6100_v55, %v7797_v38  ;;  %v2861_v38 = vpop.permute.xlu0 %2860 }
 0xc4f   :  { %v2580_v4 = vmul.f32 %v6102_v52, %v7793_v48 }
 0xc50   :  { %v6104_v42 = vpop.eup %6103 }
 0xc51   :  { %v2579_v34 = vmul.f32 %v6104_v42, %v7815_v12  ;;  %v2589_v10 = vpack.c.bf16 %v2581_v18, %v2580_v4  ;;  %v2859_v40 = vpop.permute.xlu1 %2858 }
 0xc53   :  { %v2588_v53 = vpack.c.bf16 %v2579_v34, %v2578_v13 }
 0xc55   :  { %5556 = vmatprep.mubr.msk.bf16.mxu1 %vm2245_vm7, %v2588_v53 }
 0xc56   :  { %5557 = vmatmul.mubr.msk.bf16.gmra.mrb[72].mxu1 %vm2245_vm7, %v2589_v10 }
 0xc57   :  { %5572 = vmatprep.mubr.msk.bf16.mxu1 %vm2245_vm7, %v2855_v36 }
 0xc5e   :  { %5573 = vmatmul.mubr.msk.bf16.vlgmr.msra.gmra.mrb[76].mxu1 %vm2245_vm7, %v2857_v11 }
 0xc5f   :  { %5576 = vmatprep.mubr.msk.bf16.mxu1 %vm2245_vm7, %v2859_v40 }
 0xc66   :  { %5577 = vmatmul.mubr.msk.bf16.gmra.mrb[80].mxu1 %vm2245_vm7, %v2861_v38 }
 0xcd9   :  { %v7864_v24 = vpop.f32.mrb[44].mxu0 }
 0xcda   :  { %9137 = vst [vmem:[#allocation19_spill] sm:$0xff] %v7864_v24  ;;  %v7866_v48 = vpop.f32.mrb[45].mxu0 }
 0xcdb   :  { %9138 = vst [vmem:[#allocation20_spill] sm:$0xff] %v7866_v48  ;;  %v7868_v12 = vpop.f32.mrb[46].mxu0 }
 0xcdc   :  { %9139 = vst [vmem:[#allocation21_spill] sm:$0xff] %v7868_v12  ;;  %v7870_v3 = vpop.f32.mrb[47].mxu0 }
 0xcdd   :  { %9140 = vst [vmem:[#allocation22_spill] sm:$0xff] %v7870_v3 }
 0xce2   :  { %v7872_v35 = vpop.f32.mrb[48].mxu0 }
 0xce3   :  { %9141 = vst [vmem:[#allocation23_spill] sm:$0xff] %v7872_v35  ;;  %v7874_v41 = vpop.f32.mrb[49].mxu0 }
 0xce4   :  { %9142 = vst [vmem:[#allocation24_spill] sm:$0xff] %v7874_v41  ;;  %v7876_v21 = vpop.f32.mrb[50].mxu0 }
 0xce5   :  { %9143 = vst [vmem:[#allocation25_spill] sm:$0xff] %v7876_v21  ;;  %v7878_v27 = vpop.f32.mrb[51].mxu0 }
 0xce6   :  { %9144 = vst [vmem:[#allocation26_spill] sm:$0xff] %v7878_v27 }
 0xcea   :  { %v7880_v58 = vpop.f32.mrb[52].mxu0 }
 0xceb   :  { %v7882_v2 = vpop.f32.mrb[53].mxu0  ;;  %v2950_v62 = vsel %vm2245_vm7, %v7880_v58, -inf }
 0xcec   :  { %2951 = vmax.xlane.f32.xlu0 %v2950_v62  ;;  %v7886_v9 = vpop.f32.mrb[54].mxu0  ;;  %v2944_v16 = vsel %vm2245_vm7, %v7882_v2, -inf }
 0xced   :  { %2945 = vmax.xlane.f32.xlu1 %v2944_v16  ;;  %v7890_v7 = vpop.f32.mrb[55].mxu0  ;;  %v2953_v22 = vsel %vm2245_vm7, %v7886_v9, -inf }
 0xcee   :  { %v2947_v43 = vsel %vm2245_vm7, %v7890_v7, -inf }
 0xcf0   :  { %2948 = vmax.xlane.f32.xlu0 %v2947_v43  ;;  %v7896_v44 = vpop.f32.mrb[68].mxu1 }
 0xcf1   :  { %9145 = vst [vmem:[#allocation27_spill] sm:$0xff] %v7896_v44  ;;  %2954 = vmax.xlane.f32.xlu1 %v2953_v22  ;;  %v7898_v15 = vpop.f32.mrb[69].mxu1 }
 0xcf2   :  { %9146 = vst [vmem:[#allocation28_spill] sm:$0xff] %v7898_v15  ;;  %v7900_v51 = vpop.f32.mrb[70].mxu1 }
 0xcf3   :  { %9147 = vst [vmem:[#allocation29_spill] sm:$0xff] %v7900_v51  ;;  %v7902_v59 = vpop.f32.mrb[71].mxu1 }
 0xcf4   :  { %9148 = vst [vmem:[#allocation30_spill] sm:$0xff] %v7902_v59 }
 0xd1d   :  { %v7904_v33 = vpop.f32.mrb[56].mxu0 }
 0xd1e   :  { %v7906_v29 = vpop.f32.mrb[57].mxu0  ;;  %v2962_v17 = vsel %vm2245_vm7, %v7904_v33, -inf }
 0xd1f   :  { %2963 = vmax.xlane.f32.xlu0 %v2962_v17  ;;  %v7910_v0 = vpop.f32.mrb[58].mxu0  ;;  %v2956_v52 = vsel %vm2245_vm7, %v7906_v29, -inf }
 0xd20   :  { %v7912_v60 = vpop.f32.mrb[59].mxu0  ;;  %v2965_v55 = vsel %vm2245_vm7, %v7910_v0, -inf }
 0xd21   :  { %2966 = vmax.xlane.f32.xlu1 %v2965_v55  ;;  %v2959_v42 = vsel %vm2245_vm7, %v7912_v60, -inf }
 0xd23   :  { %2957 = vmax.xlane.f32.xlu0 %v2956_v52 }
 0xd25   :  { %2960 = vmax.xlane.f32.xlu1 %v2959_v42 }
 0xd29   :  { %v7920_v18 = vpop.f32.mrb[72].mxu1 }
 0xd2a   :  { %9149 = vst [vmem:[#allocation31_spill] sm:$0xff] %v7920_v18  ;;  %v7922_v13 = vpop.f32.mrb[73].mxu1 }
 0xd2b   :  { %9150 = vst [vmem:[#allocation32_spill] sm:$0xff] %v7922_v13  ;;  %v7924_v34 = vpop.f32.mrb[74].mxu1 }
 0xd2c   :  { %9151 = vst [vmem:[#allocation33_spill] sm:$0xff] %v7924_v34  ;;  %v7926_v4 = vpop.f32.mrb[75].mxu1 }
 0xd2d   :  { %9152 = vst [vmem:[#allocation34_spill] sm:$0xff] %v7926_v4 }
 0xd31   :  { %v7928_v53 = vpop.f32.mrb[76].mxu1 }
 0xd32   :  { %v7930_v10 = vpop.f32.mrb[77].mxu1  ;;  %v2974_v36 = vsel %vm2245_vm7, %v7928_v53, -inf }
 0xd33   :  { %2975 = vmax.xlane.f32.xlu0 %v2974_v36  ;;  %v7934_v11 = vpop.f32.mrb[78].mxu1  ;;  %v2968_v62 = vsel %vm2245_vm7, %v7930_v10, -inf }
 0xd34   :  { %v7936_v40 = vpop.f32.mrb[79].mxu1  ;;  %v2977_v38 = vsel %vm2245_vm7, %v7934_v11, -inf }
 0xd35   :  { %2978 = vmax.xlane.f32.xlu1 %v2977_v38  ;;  %v2971_v16 = vsel %vm2245_vm7, %v7936_v40, -inf }
 0xd37   :  { %2969 = vmax.xlane.f32.xlu0 %v2968_v62 }
 0xd39   :  { %2972 = vmax.xlane.f32.xlu1 %v2971_v16  ;;  %v7944_v43 = vpop.f32.mrb[80].mxu1 }
 0xd3a   :  { %v7946_v22 = vpop.f32.mrb[81].mxu1  ;;  %v2986_v17 = vsel %vm2245_vm7, %v7944_v43, -inf }
 0xd3b   :  { %2987 = vmax.xlane.f32.xlu0 %v2986_v17  ;;  %v7950_v55 = vpop.f32.mrb[82].mxu1  ;;  %v2980_v42 = vsel %vm2245_vm7, %v7946_v22, -inf }
 0xd3c   :  { %v7952_v52 = vpop.f32.mrb[83].mxu1  ;;  %v2989_v36 = vsel %vm2245_vm7, %v7950_v55, -inf }
 0xd3d   :  { %v2983_v38 = vsel %vm2245_vm7, %v7952_v52, -inf }
 0xd3f   :  { %2981 = vmax.xlane.f32.xlu0 %v2980_v42 }
 0xd4a   :  { %3300 = vrot.lane.b32.xlu1 %v7169_v46, %s6351_s4 }
 0xd55   :  { %3128 = vrot.lane.b32.xlu0 %v7169_v46, %s6352_s0 }
 0xd59   :  { %3292 = vrot.lane.b32.xlu0 %v7623_v31, %s6351_s4 }
 0xd5d   :  { %3296 = vrot.lane.b32.xlu0 %v7643_v57, %s6351_s4 }
 0xd6e   :  { %2990 = vmax.xlane.f32.xlu1 %v2989_v36 }
 0xd72   :  { %2984 = vmax.xlane.f32.xlu1 %v2983_v38 }
 0xd79   :  { %v2952_v62 = vpop.xlane.xlu0 %2951 }
 0xd7a   :  { %v2994_v16 = vsub.f32 %v7880_v58, %v2952_v62  ;;  %v2946_v17 = vpop.xlane.xlu1 %2945 }
 0xd7b   :  { %v2992_v42 = vsub.f32 %v7882_v2, %v2946_v17 }
 0xd7c   :  { %v3012_v5 = vmul.f32 1.442695, %v2994_v16 }
 0xd7d   :  { %v3008_v47 = vmul.f32 1.442695, %v2992_v42 }
 0xd7e   :  { %6105 = vpow2.f32 %v3012_v5  ;;  %v2955_v2 = vpop.xlane.xlu1 %2954  ;;  %v2949_v5 = vpop.xlane.xlu0 %2948 }
 0xd7f   :  { %6107 = vpow2.f32 %v3008_v47  ;;  %v2995_v47 = vsub.f32 %v7886_v9, %v2955_v2  ;;  %v2993_v62 = vsub.f32 %v7890_v7, %v2949_v5 }
 0xd81   :  { %v3014_v16 = vmul.f32 1.442695, %v2995_v47  ;;  %v3010_v17 = vmul.f32 1.442695, %v2993_v62 }
 0xd83   :  { %3210 = vrot.lane.b32.xlu1 %v7171_v54, %s6352_s0  ;;  %6109 = vpow2.f32 %v3014_v16 }
 0xd84   :  { %6111 = vpow2.f32 %v3010_v17 }
 0xd87   :  { %3294 = vrot.lane.b32.xlu1 %v7621_v28, %s6351_s4 }
 0xd88   :  { %v7972_v36 = vpop.eup %6105 }
 0xd89   :  { %v3046_v38 = vsel %vm2245_vm7, %v7972_v36, 0.0  ;;  %v7976_v20 = vpop.eup %6107 }
 0xd8a   :  { %3047 = vadd.xlane.f32.xlu0 %v3046_v38  ;;  %v3040_v58 = vsel %vm2245_vm7, %v7976_v20, 0.0 }
 0xd8d   :  { %v7982_v42 = vpop.eup %6109 }
 0xd8e   :  { %3041 = vadd.xlane.f32.xlu0 %v3040_v58  ;;  %v3049_v45 = vsel %vm2245_vm7, %v7982_v42, 0.0  ;;  %v7986_v38 = vpop.eup %6111 }
 0xd8f   :  { %v3043_v9 = vsel %vm2245_vm7, %v7986_v38, 0.0 }
 0xdab   :  { %3050 = vadd.xlane.f32.xlu1 %v3049_v45 }
 0xdac   :  { %v2964_v63 = vpop.xlane.xlu0 %2963 }
 0xdad   :  { %v2998_v58 = vsub.f32 %v7904_v33, %v2964_v63 }
 0xdae   :  { %v2967_v50 = vpop.xlane.xlu1 %2966 }
 0xdaf   :  { %v3020_v7 = vmul.f32 1.442695, %v2998_v58  ;;  %v2999_v2 = vsub.f32 %v7910_v0, %v2967_v50  ;;  %3044 = vadd.xlane.f32.xlu1 %v3043_v9 }
 0xdb0   :  { %v2958_v47 = vpop.xlane.xlu0 %2957 }
 0xdb1   :  { %6113 = vpow2.f32 %v3020_v7  ;;  %v3022_v5 = vmul.f32 1.442695, %v2999_v2  ;;  %v2996_v62 = vsub.f32 %v7906_v29, %v2958_v47 }
 0xdb2   :  { %v2961_v16 = vpop.xlane.xlu1 %2960 }
 0xdb3   :  { %6115 = vpow2.f32 %v3022_v5  ;;  %v3016_v17 = vmul.f32 1.442695, %v2996_v62  ;;  %v2997_v45 = vsub.f32 %v7912_v60, %v2961_v16 }
 0xdb5   :  { %6117 = vpow2.f32 %v3016_v17  ;;  %v3018_v63 = vmul.f32 1.442695, %v2997_v45 }
 0xdb7   :  { %6119 = vpow2.f32 %v3018_v63 }
 0xdbb   :  { %v7994_v33 = vpop.eup %6113 }
 0xdbc   :  { %v3058_v58 = vsel %vm2245_vm7, %v7994_v33, 0.0 }
 0xdbd   :  { %v7998_v50 = vpop.eup %6115  ;;  %3059 = vadd.xlane.f32.xlu0 %v3058_v58 }
 0xdbe   :  { %v3061_v0 = vsel %vm2245_vm7, %v7998_v50, 0.0 }
 0xdbf   :  { %v8002_v29 = vpop.eup %6117  ;;  %3062 = vadd.xlane.f32.xlu1 %v3061_v0 }
 0xdc0   :  { %v2976_v9 = vpop.xlane.xlu0 %2975  ;;  %v3052_v60 = vsel %vm2245_vm7, %v8002_v29, 0.0 }
 0xdc1   :  { %v8006_v7 = vpop.eup %6119  ;;  %v3002_v2 = vsub.f32 %v7928_v53, %v2976_v9  ;;  %3053 = vadd.xlane.f32.xlu0 %v3052_v60 }
 0xdc2   :  { %v2979_v47 = vpop.xlane.xlu1 %2978  ;;  %v3055_v5 = vsel %vm2245_vm7, %v8006_v7, 0.0 }
 0xdc3   :  { %v3028_v62 = vmul.f32 1.442695, %v3002_v2  ;;  %v3003_v16 = vsub.f32 %v7934_v11, %v2979_v47  ;;  %3056 = vadd.xlane.f32.xlu1 %v3055_v5 }
 0xdc4   :  { %v2970_v17 = vpop.xlane.xlu0 %2969 }
 0xdc5   :  { %6121 = vpow2.f32 %v3028_v62  ;;  %v3030_v45 = vmul.f32 1.442695, %v3003_v16  ;;  %v3000_v63 = vsub.f32 %v7930_v10, %v2970_v17 }
 0xdc6   :  { %v2973_v58 = vpop.xlane.xlu1 %2972 }
 0xdc7   :  { %6123 = vpow2.f32 %v3030_v45  ;;  %v3024_v0 = vmul.f32 1.442695, %v3000_v63  ;;  %v3001_v30 = vsub.f32 %v7936_v40, %v2973_v58 }
 0xdc8   :  { %v2988_v53 = vpop.xlane.xlu0 %2987 }
 0xdc9   :  { %6125 = vpow2.f32 %v3024_v0  ;;  %v3026_v9 = vmul.f32 1.442695, %v3001_v30  ;;  %v3006_v60 = vsub.f32 %v7944_v43, %v2988_v53 }
 0xdca   :  { %v8024_v40 = vpop.permute.xlu1 %3300 }
 0xdcb   :  { %6127 = vpow2.f32 %v3026_v9  ;;  %v3036_v2 = vmul.f32 1.442695, %v3006_v60 }
 0xdcc   :  { %v2982_v61 = vpop.xlane.xlu0 %2981 }
 0xdcd   :  { %6129 = vpow2.f32 %v3036_v2  ;;  %v3004_v11 = vsub.f32 %v7946_v22, %v2982_v61 }
 0xdcf   :  { %v8016_v47 = vpop.eup %6121  ;;  %v3032_v5 = vmul.f32 1.442695, %v3004_v11 }
 0xdd0   :  { %v3129_v10 = vpop.permute.xlu0 %3128  ;;  %v3070_v62 = vsel %vm2245_vm7, %v8016_v47, 0.0 }
 0xdd1   :  { %v8020_v16 = vpop.eup %6123  ;;  %6131 = vpow2.f32 %v3032_v5  ;;  %5714 = vmatprep.subr.msk.bf16.mxu0 %vm124_vm2, %v3129_v10  ;;  %3071 = vadd.xlane.f32.xlu0 %v3070_v62  ;;  %v3143_v30 = vsel %vm124_vm2, %v3129_v10, 0 }
 0xdd2   :  { %5581 = vmatpush3.bf16.msra.mxu0 %v3143_v30  ;;  %v3073_v61 = vsel %vm2245_vm7, %v8020_v16, 0.0 }
 0xdd3   :  { %v8028_v43 = vpop.eup %6125  ;;  %3074 = vadd.xlane.f32.xlu1 %v3073_v61  ;;  %5716 = vmatprep.subr.msk.bf16.mxu0 %vm2245_vm7, %v8024_v40 }
 0xdd4   :  { %v3064_v22 = vsel %vm2245_vm7, %v8028_v43, 0.0 }
 0xdd5   :  { %v8034_v17 = vpop.eup %6127  ;;  %3065 = vadd.xlane.f32.xlu0 %v3064_v22 }
 0xdd6   :  { %v3067_v45 = vsel %vm2245_vm7, %v8034_v17, 0.0 }
 0xdd7   :  { %v8038_v63 = vpop.eup %6129  ;;  %3068 = vadd.xlane.f32.xlu1 %v3067_v45 }
 0xdd8   :  { %v3082_v58 = vsel %vm2245_vm7, %v8038_v63, 0.0 }
 0xdd9   :  { %3083 = vadd.xlane.f32.xlu0 %v3082_v58 }
 0xddb   :  { %v8042_v0 = vpop.eup %6131 }
 0xddc   :  { %v3076_v53 = vsel %vm2245_vm7, %v8042_v0, 0.0 }
 0xddd   :  { %3077 = vadd.xlane.f32.xlu0 %v3076_v53 }
 0xdf3   :  { %3390 = vrot.lane.b32.xlu0 %v7171_v54, %s6351_s4 }
 0xdf7   :  { %3384 = vrot.lane.b32.xlu0 %v7649_v32, %s6351_s4 }
 0xdfb   :  { %3388 = vrot.lane.b32.xlu0 %v7657_v19, %s6351_s4  ;;  %v2991_v9 = vpop.xlane.xlu1 %2990 }
 0xdfc   :  { %v3007_v60 = vsub.f32 %v7950_v55, %v2991_v9 }
 0xdfe   :  { %v3038_v2 = vmul.f32 1.442695, %v3007_v60 }
 0xdff   :  { %v2985_v11 = vpop.xlane.xlu1 %2984 }
 0xe00   :  { %6133 = vpow2.f32 %v3038_v2  ;;  %v3005_v5 = vsub.f32 %v7952_v52, %v2985_v11  ;;  %v3293_v52 = vpop.permute.xlu0 %3292 }
 0xe02   :  { %v3034_v10 = vmul.f32 1.442695, %v3005_v5 }
 0xe03   :  { %v3211_v62 = vpop.permute.xlu1 %3210 }
 0xe04   :  { %6135 = vpow2.f32 %v3034_v10  ;;  %5715 = vmatprep.subr.msk.bf16.mxu1 %vm124_vm2, %v3211_v62  ;;  %v3225_v30 = vsel %vm124_vm2, %v3211_v62, 0  ;;  %v3297_v58 = vpop.permute.xlu0 %3296 }
 0xe05   :  { %5591 = vmatpush3.bf16.msra.mxu1 %v3225_v30 }
 0xe07   :  { %v3295_v9 = vpop.permute.xlu1 %3294 }
 0xe0a   :  { %v8056_v61 = vpop.eup %6133 }
 0xe0b   :  { %v3085_v22 = vsel %vm2245_vm7, %v8056_v61, 0.0 }
 0xe0c   :  { %3086 = vadd.xlane.f32.xlu1 %v3085_v22 }
 0xe0e   :  { %v8060_v55 = vpop.eup %6135 }
 0xe0f   :  { %v3079_v45 = vsel %vm2245_vm7, %v8060_v55, 0.0 }
 0xe10   :  { %3080 = vadd.xlane.f32.xlu1 %v3079_v45 }
 0xe17   :  { %v3048_v53 = vpop.xlane.xlu0 %3047 }
 0xe1b   :  { %v3042_v60 = vpop.xlane.xlu0 %3041 }
 0xe21   :  { %3298 = vrot.lane.b32.xlu1 %v7641_v23, %s6351_s4 }
 0xe25   :  { %3382 = vrot.lane.b32.xlu1 %v7651_v6, %s6351_s4 }
 0xe29   :  { %3386 = vrot.lane.b32.xlu1 %v7659_v56, %s6351_s4 }
 0xe38   :  { %v3051_v2 = vpop.xlane.xlu1 %3050 }
 0xe39   :  { %6137 = vrcp.f32 %v3051_v2 }
 0xe3a   :  { %6139 = vrcp.f32 %v3042_v60  ;;  %v3315_v60 = vsel %vm2245_vm7, %v8024_v40, 0 }
 0xe3b   :  { %6141 = vrcp.f32 %v3048_v53 }
 0xe3c   :  { %v3045_v11 = vpop.xlane.xlu1 %3044 }
 0xe3d   :  { %6143 = vrcp.f32 %v3045_v11 }
 0xe43   :  { %v6138_v5 = vpop.eup %6137 }
 0xe44   :  { %v6140_v10 = vpop.eup %6139  ;;  %v3107_v22 = vmul.f32 %v6138_v5, %v7982_v42 }
 0xe45   :  { %v6142_v62 = vpop.eup %6141  ;;  %v3104_v45 = vmul.f32 %v6140_v10, %v7976_v20 }
 0xe46   :  { %v3106_v25 = vmul.f32 %v6142_v62, %v7972_v36 }
 0xe47   :  { %v6144_v30 = vpop.eup %6143 }
 0xe48   :  { %v3105_v26 = vmul.f32 %v6144_v30, %v7986_v38  ;;  %v3121_v14 = vpack.c.bf16 %v3107_v22, %v3106_v25 }
 0xe4a   :  { %v3060_v1 = vpop.xlane.xlu0 %3059  ;;  %v3120_v49 = vpack.c.bf16 %v3105_v26, %v3104_v45 }
 0xe4c   :  { %5582 = vmatprep.mubr.msk.bf16.mxu0 %vm2245_vm7, %v3120_v49  ;;  %v3063_v53 = vpop.xlane.xlu1 %3062 }
 0xe4d   :  { %5583 = vmatmul.mubr.msk.bf16.vlgmr.msra.gmra.mrb[60].mxu0 %vm2245_vm7, %v3121_v14  ;;  %6145 = vrcp.f32 %v3063_v53 }
 0xe4e   :  { %5601 = vmatpush3.bf16.xpose.msra.mxu0 %v3315_v60  ;;  %v3054_v42 = vpop.xlane.xlu0 %3053 }
 0xe4f   :  { %6147 = vrcp.f32 %v3054_v42 }
 0xe50   :  { %6149 = vrcp.f32 %v3060_v1  ;;  %v3057_v20 = vpop.xlane.xlu1 %3056 }
 0xe51   :  { %6151 = vrcp.f32 %v3057_v20 }
 0xe57   :  { %v6146_v38 = vpop.eup %6145 }
 0xe58   :  { %v3111_v25 = vmul.f32 %v6146_v38, %v7998_v50 }
 0xe59   :  { %v6148_v36 = vpop.eup %6147 }
 0xe5a   :  { %v6150_v2 = vpop.eup %6149  ;;  %v3108_v49 = vmul.f32 %v6148_v36, %v8002_v29 }
 0xe5b   :  { %v6152_v26 = vpop.eup %6151  ;;  %v3110_v11 = vmul.f32 %v6150_v2, %v7994_v33 }
 0xe5c   :  { %v3109_v14 = vmul.f32 %v6152_v26, %v8006_v7 }
 0xe5d   :  { %v3123_v10 = vpack.c.bf16 %v3111_v25, %v3110_v11 }
 0xe5e   :  { %v3072_v40 = vpop.xlane.xlu0 %3071  ;;  %v3122_v5 = vpack.c.bf16 %v3109_v14, %v3108_v49 }
 0xe60   :  { %5586 = vmatprep.mubr.msk.bf16.mxu0 %vm2245_vm7, %v3122_v5  ;;  %v3075_v1 = vpop.xlane.xlu1 %3074 }
 0xe61   :  { %5587 = vmatmul.mubr.msk.bf16.gmra.mrb[64].mxu0 %vm2245_vm7, %v3123_v10  ;;  %6153 = vrcp.f32 %v3075_v1 }
 0xe62   :  { %v3066_v62 = vpop.xlane.xlu0 %3065  ;;  %5602 = vmatprep.mubr.msk.bf16.mxu0 %vm2245_vm7, %v3293_v52 }
 0xe63   :  { %6155 = vrcp.f32 %v3066_v62 }
 0xe64   :  { %6157 = vrcp.f32 %v3072_v40  ;;  %v3069_v50 = vpop.xlane.xlu1 %3068 }
 0xe65   :  { %6159 = vrcp.f32 %v3069_v50 }
 0xe66   :  { %v3084_v29 = vpop.xlane.xlu0 %3083 }
 0xe69   :  { %5603 = vmatmul.mubr.msk.bf16.vlgmr.msra.gmra.mrb[68].mxu0 %vm2245_vm7, %v3295_v9 }
 0xe6a   :  { %v3078_v33 = vpop.xlane.xlu0 %3077  ;;  %5606 = vmatprep.mubr.msk.bf16.mxu0 %vm2245_vm7, %v3297_v58 }
 0xe6b   :  { %v6154_v7 = vpop.eup %6153 }
 0xe6c   :  { %v3115_v60 = vmul.f32 %v6154_v7, %v8020_v16 }
 0xe6d   :  { %v6156_v30 = vpop.eup %6155 }
 0xe6e   :  { %v6158_v22 = vpop.eup %6157  ;;  %v3391_v45 = vpop.permute.xlu0 %3390  ;;  %v3112_v52 = vmul.f32 %v6156_v30, %v8028_v43 }
 0xe6f   :  { %v6160_v53 = vpop.eup %6159  ;;  %5717 = vmatprep.subr.msk.bf16.mxu1 %vm2245_vm7, %v3391_v45  ;;  %v3114_v20 = vmul.f32 %v6158_v22, %v8016_v47  ;;  %v3405_v58 = vsel %vm2245_vm7, %v3391_v45, 0 }
 0xe70   :  { %v3113_v42 = vmul.f32 %v6160_v53, %v8034_v17 }
 0xe71   :  { %v3125_v9 = vpack.c.bf16 %v3115_v60, %v3114_v20 }
 0xe72   :  { %v3124_v38 = vpack.c.bf16 %v3113_v42, %v3112_v52  ;;  %v3385_v1 = vpop.permute.xlu0 %3384 }
 0xe74   :  { %5592 = vmatprep.mubr.msk.bf16.mxu1 %vm2245_vm7, %v3124_v38 }
 0xe75   :  { %5593 = vmatmul.mubr.msk.bf16.vlgmr.msra.gmra.mrb[84].mxu1 %vm2245_vm7, %v3125_v9 }
 0xe76   :  { %5611 = vmatpush3.bf16.xpose.msra.mxu1 %v3405_v58 }
 0xe99   :  { %v3087_v36 = vpop.xlane.xlu1 %3086 }
 0xe9a   :  { %6161 = vrcp.f32 %v3087_v36 }
 0xe9b   :  { %6163 = vrcp.f32 %v3078_v33 }
 0xe9c   :  { %6165 = vrcp.f32 %v3084_v29 }
 0xe9d   :  { %v3081_v16 = vpop.xlane.xlu1 %3080 }
 0xe9e   :  { %6167 = vrcp.f32 %v3081_v16 }
 0xea1   :  { %v3299_v43 = vpop.permute.xlu1 %3298 }
 0xea2   :  { %5607 = vmatmul.mubr.msk.bf16.gmra.mrb[72].mxu0 %vm2245_vm7, %v3299_v43 }
 0xea4   :  { %v6162_v17 = vpop.eup %6161 }
 0xea5   :  { %v6164_v47 = vpop.eup %6163  ;;  %v3119_v25 = vmul.f32 %v6162_v17, %v8056_v61  ;;  %v3383_v10 = vpop.permute.xlu1 %3382 }
 0xea6   :  { %v6166_v2 = vpop.eup %6165  ;;  %v3116_v49 = vmul.f32 %v6164_v47, %v8042_v0  ;;  %v3389_v0 = vpop.permute.xlu0 %3388 }
 0xea7   :  { %v3118_v11 = vmul.f32 %v6166_v2, %v8038_v63 }
 0xea8   :  { %v6168_v26 = vpop.eup %6167 }
 0xea9   :  { %v3117_v14 = vmul.f32 %v6168_v26, %v8060_v55  ;;  %v3127_v5 = vpack.c.bf16 %v3119_v25, %v3118_v11  ;;  %v3387_v62 = vpop.permute.xlu1 %3386 }
 0xeab   :  { %v3126_v40 = vpack.c.bf16 %v3117_v14, %v3116_v49 }
 0xead   :  { %5596 = vmatprep.mubr.msk.bf16.mxu1 %vm2245_vm7, %v3126_v40 }
 0xeae   :  { %5597 = vmatmul.mubr.msk.bf16.gmra.mrb[88].mxu1 %vm2245_vm7, %v3127_v5 }
 0xeaf   :  { %5612 = vmatprep.mubr.msk.bf16.mxu1 %vm2245_vm7, %v3383_v10 }
 0xeb6   :  { %5613 = vmatmul.mubr.msk.bf16.vlgmr.msra.gmra.mrb[92].mxu1 %vm2245_vm7, %v3385_v1 }
 0xeb7   :  { %5616 = vmatprep.mubr.msk.bf16.mxu1 %vm2245_vm7, %v3387_v62 }
 0xebe   :  { %5617 = vmatmul.mubr.msk.bf16.gmra.mrb[96].mxu1 %vm2245_vm7, %v3389_v0 }
 0xf20   :  { %v8106_v61 = vpop.f32.mrb[60].mxu0 }
 0xf21   :  { %v8108_v63 = vpop.f32.mrb[61].mxu0 }
 0xf22   :  { %v8110_v55 = vpop.f32.mrb[62].mxu0 }
 0xf23   :  { %v8114_v29 = vpop.f32.mrb[63].mxu0 }
 0xf34   :  { %v8118_v7 = vpop.f32.mrb[64].mxu0 }
 0xf35   :  { %v8120_v30 = vpop.f32.mrb[65].mxu0 }
 0xf36   :  { %v8122_v22 = vpop.f32.mrb[66].mxu0 }
 0xf37   :  { %v8126_v53 = vpop.f32.mrb[67].mxu0 }
 0xf3c   :  { %v8130_v52 = vpop.f32.mrb[68].mxu0 }
 0xf3d   :  { %v8132_v42 = vpop.f32.mrb[69].mxu0  ;;  %v3478_v20 = vsel %vm2245_vm7, %v8130_v52, -inf }
 0xf3e   :  { %3479 = vmax.xlane.f32.xlu0 %v3478_v20  ;;  %v8136_v38 = vpop.f32.mrb[70].mxu0  ;;  %v3472_v9 = vsel %vm2245_vm7, %v8132_v42, -inf }
 0xf3f   :  { %3473 = vmax.xlane.f32.xlu1 %v3472_v9  ;;  %v8140_v58 = vpop.f32.mrb[71].mxu0  ;;  %v3481_v16 = vsel %vm2245_vm7, %v8136_v38, -inf }
 0xf40   :  { %v3475_v36 = vsel %vm2245_vm7, %v8140_v58, -inf }
 0xf42   :  { %3476 = vmax.xlane.f32.xlu0 %v3475_v36 }
 0xf43   :  { %3482 = vmax.xlane.f32.xlu1 %v3481_v16 }
 0xf48   :  { %v8146_v43 = vpop.f32.mrb[84].mxu1 }
 0xf49   :  { %v8148_v17 = vpop.f32.mrb[85].mxu1 }
 0xf4a   :  { %v8150_v47 = vpop.f32.mrb[86].mxu1 }
 0xf4b   :  { %v8154_v26 = vpop.f32.mrb[87].mxu1 }
 0xf75   :  { %v8158_v49 = vpop.f32.mrb[72].mxu0 }
 0xf76   :  { %v8160_v14 = vpop.f32.mrb[73].mxu0  ;;  %v3490_v11 = vsel %vm2245_vm7, %v8158_v49, -inf }
 0xf77   :  { %3491 = vmax.xlane.f32.xlu0 %v3490_v11  ;;  %v8164_v40 = vpop.f32.mrb[74].mxu0  ;;  %v3484_v1 = vsel %vm2245_vm7, %v8160_v14, -inf }
 0xf78   :  { %v8166_v5 = vpop.f32.mrb[75].mxu0  ;;  %v3493_v10 = vsel %vm2245_vm7, %v8164_v40, -inf }
 0xf79   :  { %3494 = vmax.xlane.f32.xlu1 %v3493_v10  ;;  %v3487_v62 = vsel %vm2245_vm7, %v8166_v5, -inf }
 0xf7b   :  { %3485 = vmax.xlane.f32.xlu0 %v3484_v1 }
 0xf7d   :  { %3488 = vmax.xlane.f32.xlu1 %v3487_v62 }
 0xf81   :  { %v8174_v0 = vpop.f32.mrb[88].mxu1 }
 0xf82   :  { %v8176_v20 = vpop.f32.mrb[89].mxu1 }
 0xf83   :  { %v8178_v9 = vpop.f32.mrb[90].mxu1 }
 0xf84   :  { %v8182_v16 = vpop.f32.mrb[91].mxu1 }
 0xf89   :  { %v8186_v10 = vpop.f32.mrb[92].mxu1 }
 0xf8a   :  { %v8188_v1 = vpop.f32.mrb[93].mxu1  ;;  %v3502_v62 = vsel %vm2245_vm7, %v8186_v10, -inf }
 0xf8b   :  { %3503 = vmax.xlane.f32.xlu0 %v3502_v62  ;;  %v8192_v2 = vpop.f32.mrb[94].mxu1  ;;  %v3496_v45 = vsel %vm2245_vm7, %v8188_v1, -inf }
 0xf8c   :  { %v8194_v25 = vpop.f32.mrb[95].mxu1  ;;  %v3505_v36 = vsel %vm2245_vm7, %v8192_v2, -inf }
 0xf8d   :  { %3506 = vmax.xlane.f32.xlu1 %v3505_v36  ;;  %v3499_v11 = vsel %vm2245_vm7, %v8194_v25, -inf }
 0xf8f   :  { %3497 = vmax.xlane.f32.xlu0 %v3496_v45 }
 0xf91   :  { %3500 = vmax.xlane.f32.xlu1 %v3499_v11  ;;  %v8202_v60 = vpop.f32.mrb[96].mxu1 }
 0xf92   :  { %v8204_v50 = vpop.f32.mrb[97].mxu1  ;;  %v3514_v62 = vsel %vm2245_vm7, %v8202_v60, -inf }
 0xf93   :  { %3515 = vmax.xlane.f32.xlu0 %v3514_v62  ;;  %v8208_v33 = vpop.f32.mrb[98].mxu1  ;;  %v3508_v36 = vsel %vm2245_vm7, %v8204_v50, -inf }
 0xf94   :  { %v8210_v8 = vpop.f32.mrb[99].mxu1  ;;  %v3517_v45 = vsel %vm2245_vm7, %v8208_v33, -inf }
 0xf95   :  { %v3511_v11 = vsel %vm2245_vm7, %v8210_v8, -inf }
 0xf97   :  { %3509 = vmax.xlane.f32.xlu0 %v3508_v36 }
 0xfa2   :  { %3828 = vrot.lane.b32.xlu1 %v7169_v46, %s6353_s29 }
 0xfad   :  { %3656 = vrot.lane.b32.xlu0 %v7169_v46, %s6354_s2 }
 0xfb1   :  { %3820 = vrot.lane.b32.xlu0 %v7623_v31, %s6353_s29 }
 0xfb5   :  { %3824 = vrot.lane.b32.xlu0 %v7643_v57, %s6353_s29 }
 0xfc6   :  { %3518 = vmax.xlane.f32.xlu1 %v3517_v45 }
 0xfca   :  { %3512 = vmax.xlane.f32.xlu1 %v3511_v11 }
 0xfcb   :  { %v3480_v62 = vpop.xlane.xlu0 %3479 }
 0xfcc   :  { %v3522_v36 = vsub.f32 %v8130_v52, %v3480_v62  ;;  %v3474_v39 = vpop.xlane.xlu1 %3473 }
 0xfcd   :  { %v3520_v37 = vsub.f32 %v8132_v42, %v3474_v39 }
 0xfce   :  { %v3540_v13 = vmul.f32 1.442695, %v3522_v36 }
 0xfcf   :  { %v3536_v4 = vmul.f32 1.442695, %v3520_v37 }
 0xfd0   :  { %6169 = vpow2.f32 %v3540_v13  ;;  %v3483_v37 = vpop.xlane.xlu1 %3482 }
 0xfd1   :  { %6171 = vpow2.f32 %v3536_v4  ;;  %v3523_v13 = vsub.f32 %v8136_v38, %v3483_v37  ;;  %v3477_v4 = vpop.xlane.xlu0 %3476 }
 0xfd2   :  { %v3521_v52 = vsub.f32 %v8140_v58, %v3477_v4 }
 0xfd3   :  { %v3542_v42 = vmul.f32 1.442695, %v3523_v13 }
 0xfd4   :  { %v3538_v11 = vmul.f32 1.442695, %v3521_v52 }
 0xfd5   :  { %6173 = vpow2.f32 %v3542_v42 }
 0xfd6   :  { %6175 = vpow2.f32 %v3538_v11 }
 0xfda   :  { %v8227_v31 = vpop.eup %6169 }
 0xfdb   :  { %3738 = vrot.lane.b32.xlu1 %v7171_v54, %s6354_s2  ;;  %v3574_v57 = vsel %vm2245_vm7, %v8227_v31, 0.0  ;;  %v8232_v45 = vpop.eup %6171 }
 0xfdc   :  { %3575 = vadd.xlane.f32.xlu0 %v3574_v57  ;;  %v3568_v39 = vsel %vm2245_vm7, %v8232_v45, 0.0 }
 0xfdf   :  { %3822 = vrot.lane.b32.xlu1 %v7621_v28, %s6353_s29  ;;  %v8240_v62 = vpop.eup %6173 }
 0xfe0   :  { %3569 = vadd.xlane.f32.xlu0 %v3568_v39  ;;  %v3577_v36 = vsel %vm2245_vm7, %v8240_v62, 0.0  ;;  %v8244_v28 = vpop.eup %6175 }
 0xfe1   :  { %v3571_v38 = vsel %vm2245_vm7, %v8244_v28, 0.0 }
0x1003   :  { %3578 = vadd.xlane.f32.xlu1 %v3577_v36 }
0x1004   :  { %v3492_v57 = vpop.xlane.xlu0 %3491 }
0x1005   :  { %v3526_v39 = vsub.f32 %v8158_v49, %v3492_v57 }
0x1006   :  { %v3495_v18 = vpop.xlane.xlu1 %3494 }
0x1007   :  { %v3548_v58 = vmul.f32 1.442695, %v3526_v39  ;;  %v3527_v37 = vsub.f32 %v8164_v40, %v3495_v18  ;;  %3572 = vadd.xlane.f32.xlu1 %v3571_v38 }
0x1008   :  { %v3486_v13 = vpop.xlane.xlu0 %3485 }
0x1009   :  { %6177 = vpow2.f32 %v3548_v58  ;;  %v3550_v4 = vmul.f32 1.442695, %v3527_v37  ;;  %v3524_v52 = vsub.f32 %v8160_v14, %v3486_v13 }
0x100a   :  { %v3489_v42 = vpop.xlane.xlu1 %3488 }
0x100b   :  { %6179 = vpow2.f32 %v3550_v4  ;;  %v3544_v11 = vmul.f32 1.442695, %v3524_v52  ;;  %v3525_v36 = vsub.f32 %v8166_v5, %v3489_v42 }
0x100d   :  { %6181 = vpow2.f32 %v3544_v11  ;;  %v3546_v49 = vmul.f32 1.442695, %v3525_v36 }
0x100f   :  { %6183 = vpow2.f32 %v3546_v49 }
0x1013   :  { %v8252_v57 = vpop.eup %6177 }
0x1014   :  { %v3586_v39 = vsel %vm2245_vm7, %v8252_v57, 0.0 }
0x1015   :  { %v8256_v18 = vpop.eup %6179  ;;  %3587 = vadd.xlane.f32.xlu0 %v3586_v39 }
0x1016   :  { %v3589_v40 = vsel %vm2245_vm7, %v8256_v18, 0.0 }
0x1017   :  { %v8260_v14 = vpop.eup %6181  ;;  %3590 = vadd.xlane.f32.xlu1 %v3589_v40 }
0x1018   :  { %v3504_v38 = vpop.xlane.xlu0 %3503  ;;  %v3580_v5 = vsel %vm2245_vm7, %v8260_v14, 0.0 }
0x1019   :  { %v8264_v58 = vpop.eup %6183  ;;  %v3530_v37 = vsub.f32 %v8186_v10, %v3504_v38  ;;  %3581 = vadd.xlane.f32.xlu0 %v3580_v5 }
0x101a   :  { %v3507_v13 = vpop.xlane.xlu1 %3506  ;;  %v3583_v4 = vsel %vm2245_vm7, %v8264_v58, 0.0 }
0x101b   :  { %v3556_v52 = vmul.f32 1.442695, %v3530_v37  ;;  %v3531_v42 = vsub.f32 %v8192_v2, %v3507_v13  ;;  %3584 = vadd.xlane.f32.xlu1 %v3583_v4 }
0x101c   :  { %v3498_v11 = vpop.xlane.xlu0 %3497 }
0x101d   :  { %6185 = vpow2.f32 %v3556_v52  ;;  %v3558_v36 = vmul.f32 1.442695, %v3531_v42  ;;  %v3528_v49 = vsub.f32 %v8188_v1, %v3498_v11 }
0x101e   :  { %v3501_v39 = vpop.xlane.xlu1 %3500 }
0x101f   :  { %6187 = vpow2.f32 %v3558_v36  ;;  %v3552_v40 = vmul.f32 1.442695, %v3528_v49  ;;  %v3529_v34 = vsub.f32 %v8194_v25, %v3501_v39 }
0x1020   :  { %v3516_v10 = vpop.xlane.xlu0 %3515 }
0x1021   :  { %6189 = vpow2.f32 %v3552_v40  ;;  %v3554_v38 = vmul.f32 1.442695, %v3529_v34  ;;  %v3534_v5 = vsub.f32 %v8202_v60, %v3516_v10 }
0x1022   :  { %v8282_v60 = vpop.permute.xlu1 %3828 }
0x1023   :  { %6191 = vpow2.f32 %v3554_v38  ;;  %v3564_v37 = vmul.f32 1.442695, %v3534_v5 }
0x1024   :  { %v3510_v15 = vpop.xlane.xlu0 %3509 }
0x1025   :  { %6193 = vpow2.f32 %v3564_v37  ;;  %v3532_v2 = vsub.f32 %v8204_v50, %v3510_v15 }
0x1027   :  { %v8274_v13 = vpop.eup %6185  ;;  %v3560_v4 = vmul.f32 1.442695, %v3532_v2 }
0x1028   :  { %v3657_v1 = vpop.permute.xlu0 %3656  ;;  %v3598_v52 = vsel %vm2245_vm7, %v8274_v13, 0.0 }
0x1029   :  { %v8278_v42 = vpop.eup %6187  ;;  %6195 = vpow2.f32 %v3560_v4  ;;  %5718 = vmatprep.subr.msk.bf16.mxu0 %vm124_vm2, %v3657_v1  ;;  %3599 = vadd.xlane.f32.xlu0 %v3598_v52  ;;  %v3671_v34 = vsel %vm124_vm2, %v3657_v1, 0 }
0x102a   :  { %5621 = vmatpush3.bf16.msra.mxu0 %v3671_v34  ;;  %v3601_v15 = vsel %vm2245_vm7, %v8278_v42, 0.0 }
0x102b   :  { %v8286_v50 = vpop.eup %6189  ;;  %3602 = vadd.xlane.f32.xlu1 %v3601_v15  ;;  %5720 = vmatprep.subr.msk.bf16.mxu0 %vm2245_vm7, %v8282_v60 }
0x102c   :  { %v3592_v25 = vsel %vm2245_vm7, %v8286_v50, 0.0 }
0x102d   :  { %v8292_v11 = vpop.eup %6191  ;;  %3593 = vadd.xlane.f32.xlu0 %v3592_v25 }
0x102e   :  { %v3595_v36 = vsel %vm2245_vm7, %v8292_v11, 0.0 }
0x102f   :  { %v8296_v49 = vpop.eup %6193  ;;  %3596 = vadd.xlane.f32.xlu1 %v3595_v36 }
0x1030   :  { %v3610_v39 = vsel %vm2245_vm7, %v8296_v49, 0.0 }
0x1031   :  { %3611 = vadd.xlane.f32.xlu0 %v3610_v39 }
0x1033   :  { %v8300_v40 = vpop.eup %6195 }
0x1034   :  { %v3604_v10 = vsel %vm2245_vm7, %v8300_v40, 0.0 }
0x1035   :  { %3605 = vadd.xlane.f32.xlu0 %v3604_v10 }
0x104b   :  { %3918 = vrot.lane.b32.xlu0 %v7171_v54, %s6353_s29 }
0x104f   :  { %3912 = vrot.lane.b32.xlu0 %v7649_v32, %s6353_s29 }
0x1053   :  { %3916 = vrot.lane.b32.xlu0 %v7657_v19, %s6353_s29  ;;  %v3519_v38 = vpop.xlane.xlu1 %3518 }
0x1054   :  { %v3535_v5 = vsub.f32 %v8208_v33, %v3519_v38 }
0x1056   :  { %v3566_v37 = vmul.f32 1.442695, %v3535_v5 }
0x1057   :  { %v3513_v2 = vpop.xlane.xlu1 %3512 }
0x1058   :  { %6197 = vpow2.f32 %v3566_v37  ;;  %v3533_v4 = vsub.f32 %v8210_v8, %v3513_v2  ;;  %v3821_v8 = vpop.permute.xlu0 %3820 }
0x105a   :  { %v3562_v1 = vmul.f32 1.442695, %v3533_v4 }
0x105b   :  { %v3739_v52 = vpop.permute.xlu1 %3738 }
0x105c   :  { %6199 = vpow2.f32 %v3562_v1  ;;  %5719 = vmatprep.subr.msk.bf16.mxu1 %vm124_vm2, %v3739_v52  ;;  %v3753_v34 = vsel %vm124_vm2, %v3739_v52, 0  ;;  %v3825_v25 = vpop.permute.xlu0 %3824 }
0x105d   :  { %5631 = vmatpush3.bf16.msra.mxu1 %v3753_v34 }
0x105f   :  { %v3823_v39 = vpop.permute.xlu1 %3822 }
0x1062   :  { %v8314_v32 = vpop.eup %6197 }
0x1063   :  { %v3613_v19 = vsel %vm2245_vm7, %v8314_v32, 0.0 }
0x1064   :  { %3614 = vadd.xlane.f32.xlu1 %v3613_v19 }
0x1066   :  { %v8318_v33 = vpop.eup %6199 }
0x1067   :  { %v3607_v15 = vsel %vm2245_vm7, %v8318_v33, 0.0 }
0x1068   :  { %3608 = vadd.xlane.f32.xlu1 %v3607_v15 }
0x1069   :  { %v3576_v36 = vpop.xlane.xlu0 %3575 }
0x106d   :  { %v3570_v10 = vpop.xlane.xlu0 %3569 }
0x1079   :  { %3826 = vrot.lane.b32.xlu1 %v7641_v23, %s6353_s29 }
0x107d   :  { %3910 = vrot.lane.b32.xlu1 %v7651_v6, %s6353_s29 }
0x1081   :  { %3914 = vrot.lane.b32.xlu1 %v7659_v56, %s6353_s29 }
0x1090   :  { %v3579_v38 = vpop.xlane.xlu1 %3578 }
0x1091   :  { %6201 = vrcp.f32 %v3579_v38 }
0x1092   :  { %6203 = vrcp.f32 %v3570_v10  ;;  %v3843_v10 = vsel %vm2245_vm7, %v8282_v60, 0 }
0x1093   :  { %6205 = vrcp.f32 %v3576_v36 }
0x1094   :  { %v3573_v5 = vpop.xlane.xlu1 %3572 }
0x1095   :  { %6207 = vrcp.f32 %v3573_v5 }
0x109b   :  { %v6202_v37 = vpop.eup %6201 }
0x109c   :  { %v6204_v2 = vpop.eup %6203  ;;  %v3635_v6 = vmul.f32 %v6202_v37, %v8240_v62 }
0x109d   :  { %v6206_v23 = vpop.eup %6205  ;;  %v3632_v1 = vmul.f32 %v6204_v2, %v8232_v45 }
0x109e   :  { %v3634_v52 = vmul.f32 %v6206_v23, %v8227_v31 }
0x109f   :  { %v6208_v4 = vpop.eup %6207 }
0x10a0   :  { %v3633_v56 = vmul.f32 %v6208_v4, %v8244_v28  ;;  %v3649_v15 = vpack.c.bf16 %v3635_v6, %v3634_v52 }
0x10a2   :  { %v3588_v34 = vpop.xlane.xlu0 %3587  ;;  %v3648_v19 = vpack.c.bf16 %v3633_v56, %v3632_v1 }
0x10a4   :  { %5622 = vmatprep.mubr.msk.bf16.mxu0 %vm2245_vm7, %v3648_v19  ;;  %v3591_v36 = vpop.xlane.xlu1 %3590 }
0x10a5   :  { %5623 = vmatmul.mubr.msk.bf16.vlgmr.msra.gmra.mrb[76].mxu0 %vm2245_vm7, %v3649_v15  ;;  %6209 = vrcp.f32 %v3591_v36 }
0x10a6   :  { %5641 = vmatpush3.bf16.xpose.msra.mxu0 %v3843_v10  ;;  %v3582_v62 = vpop.xlane.xlu0 %3581 }
0x10a7   :  { %6211 = vrcp.f32 %v3582_v62 }
0x10a8   :  { %6213 = vrcp.f32 %v3588_v34  ;;  %v3585_v45 = vpop.xlane.xlu1 %3584 }
0x10a9   :  { %6215 = vrcp.f32 %v3585_v45 }
0x10af   :  { %v6210_v28 = vpop.eup %6209 }
0x10b0   :  { %v3639_v37 = vmul.f32 %v6210_v28, %v8256_v18 }
0x10b1   :  { %v6212_v31 = vpop.eup %6211 }
0x10b2   :  { %v6214_v38 = vpop.eup %6213  ;;  %v3636_v2 = vmul.f32 %v6212_v31, %v8260_v14 }
0x10b3   :  { %v6216_v5 = vpop.eup %6215  ;;  %v3638_v4 = vmul.f32 %v6214_v38, %v8252_v57 }
0x10b4   :  { %v3637_v23 = vmul.f32 %v6216_v5, %v8264_v58 }
0x10b5   :  { %v3651_v1 = vpack.c.bf16 %v3639_v37, %v3638_v4 }
0x10b6   :  { %v3600_v60 = vpop.xlane.xlu0 %3599  ;;  %v3650_v6 = vpack.c.bf16 %v3637_v23, %v3636_v2 }
0x10b8   :  { %5626 = vmatprep.mubr.msk.bf16.mxu0 %vm2245_vm7, %v3650_v6  ;;  %v3603_v56 = vpop.xlane.xlu1 %3602 }
0x10b9   :  { %5627 = vmatmul.mubr.msk.bf16.gmra.mrb[80].mxu0 %vm2245_vm7, %v3651_v1  ;;  %6217 = vrcp.f32 %v3603_v56 }
0x10ba   :  { %v3594_v52 = vpop.xlane.xlu0 %3593  ;;  %5642 = vmatprep.mubr.msk.bf16.mxu0 %vm2245_vm7, %v3821_v8 }
0x10bb   :  { %6219 = vrcp.f32 %v3594_v52 }
0x10bc   :  { %6221 = vrcp.f32 %v3600_v60  ;;  %v3597_v18 = vpop.xlane.xlu1 %3596 }
0x10bd   :  { %6223 = vrcp.f32 %v3597_v18 }
0x10be   :  { %v3612_v14 = vpop.xlane.xlu0 %3611 }
0x10c1   :  { %5643 = vmatmul.mubr.msk.bf16.vlgmr.msra.gmra.mrb[84].mxu0 %vm2245_vm7, %v3823_v39 }
0x10c2   :  { %v3606_v57 = vpop.xlane.xlu0 %3605  ;;  %5646 = vmatprep.mubr.msk.bf16.mxu0 %vm2245_vm7, %v3825_v25 }
0x10c3   :  { %v6218_v58 = vpop.eup %6217 }
0x10c4   :  { %v3643_v10 = vmul.f32 %v6218_v58, %v8278_v42 }
0x10c5   :  { %v6220_v34 = vpop.eup %6219 }
0x10c6   :  { %v6222_v19 = vpop.eup %6221  ;;  %v3919_v15 = vpop.permute.xlu0 %3918  ;;  %v3640_v8 = vmul.f32 %v6220_v34, %v8286_v50 }
0x10c7   :  { %v6224_v36 = vpop.eup %6223  ;;  %5721 = vmatprep.subr.msk.bf16.mxu1 %vm2245_vm7, %v3919_v15  ;;  %v3642_v45 = vmul.f32 %v6222_v19, %v8274_v13  ;;  %v3933_v25 = vsel %vm2245_vm7, %v3919_v15, 0 }
0x10c8   :  { %v3641_v62 = vmul.f32 %v6224_v36, %v8292_v11 }
0x10c9   :  { %v3653_v39 = vpack.c.bf16 %v3643_v10, %v3642_v45 }
0x10ca   :  { %v3652_v28 = vpack.c.bf16 %v3641_v62, %v3640_v8  ;;  %v3913_v56 = vpop.permute.xlu0 %3912 }
0x10cc   :  { %5632 = vmatprep.mubr.msk.bf16.mxu1 %vm2245_vm7, %v3652_v28 }
0x10cd   :  { %5633 = vmatmul.mubr.msk.bf16.vlgmr.msra.gmra.mrb[100].mxu1 %vm2245_vm7, %v3653_v39 }
0x10ce   :  { %5651 = vmatpush3.bf16.xpose.msra.mxu1 %v3933_v25 }
0x10f1   :  { %v3615_v31 = vpop.xlane.xlu1 %3614 }
0x10f2   :  { %6225 = vrcp.f32 %v3615_v31 }
0x10f3   :  { %6227 = vrcp.f32 %v3606_v57 }
0x10f4   :  { %6229 = vrcp.f32 %v3612_v14 }
0x10f5   :  { %v3609_v42 = vpop.xlane.xlu1 %3608 }
0x10f6   :  { %6231 = vrcp.f32 %v3609_v42 }
0x10f9   :  { %v3827_v50 = vpop.permute.xlu1 %3826 }
0x10fa   :  { %5647 = vmatmul.mubr.msk.bf16.gmra.mrb[88].mxu0 %vm2245_vm7, %v3827_v50 }
0x10fc   :  { %v6226_v11 = vpop.eup %6225 }
0x10fd   :  { %v6228_v13 = vpop.eup %6227  ;;  %v3647_v37 = vmul.f32 %v6226_v11, %v8314_v32  ;;  %v3911_v1 = vpop.permute.xlu1 %3910 }
0x10fe   :  { %v6230_v38 = vpop.eup %6229  ;;  %v3644_v2 = vmul.f32 %v6228_v13, %v8300_v40  ;;  %v3917_v40 = vpop.permute.xlu0 %3916 }
0x10ff   :  { %v3646_v4 = vmul.f32 %v6230_v38, %v8296_v49 }
0x1100   :  { %v6232_v5 = vpop.eup %6231 }
0x1101   :  { %v3645_v23 = vmul.f32 %v6232_v5, %v8318_v33  ;;  %v3655_v6 = vpack.c.bf16 %v3647_v37, %v3646_v4  ;;  %v3915_v52 = vpop.permute.xlu1 %3914 }
0x1103   :  { %v3654_v60 = vpack.c.bf16 %v3645_v23, %v3644_v2 }
0x1105   :  { %5636 = vmatprep.mubr.msk.bf16.mxu1 %vm2245_vm7, %v3654_v60 }
0x1106   :  { %5637 = vmatmul.mubr.msk.bf16.gmra.mrb[104].mxu1 %vm2245_vm7, %v3655_v6 }
0x1107   :  { %5652 = vmatprep.mubr.msk.bf16.mxu1 %vm2245_vm7, %v3911_v1 }
0x110e   :  { %5653 = vmatmul.mubr.msk.bf16.vlgmr.msra.gmra.mrb[108].mxu1 %vm2245_vm7, %v3913_v56 }
0x110f   :  { %5656 = vmatprep.mubr.msk.bf16.mxu1 %vm2245_vm7, %v3915_v52 }
0x1116   :  { %5657 = vmatmul.mubr.msk.bf16.gmra.mrb[112].mxu1 %vm2245_vm7, %v3917_v40 }
0x1178   :  { %v8364_v32 = vpop.f32.mrb[76].mxu0 }
0x1179   :  { %v8366_v49 = vpop.f32.mrb[77].mxu0 }
0x117a   :  { %v8368_v33 = vpop.f32.mrb[78].mxu0 }
0x117b   :  { %v8372_v14 = vpop.f32.mrb[79].mxu0 }
0x118c   :  { %v8376_v58 = vpop.f32.mrb[80].mxu0 }
0x118d   :  { %v8378_v34 = vpop.f32.mrb[81].mxu0 }
0x118e   :  { %v8380_v19 = vpop.f32.mrb[82].mxu0 }
0x118f   :  { %v8384_v36 = vpop.f32.mrb[83].mxu0 }
0x1194   :  { %v8388_v8 = vpop.f32.mrb[84].mxu0 }
0x1195   :  { %v8390_v62 = vpop.f32.mrb[85].mxu0  ;;  %v4006_v42 = vsel %vm2245_vm7, %v8388_v8, -inf }
0x1196   :  { %v8392_v45 = vpop.f32.mrb[86].mxu0  ;;  %v4000_v28 = vsel %vm2245_vm7, %v8390_v62, -inf }
0x1197   :  { %4001 = vmax.xlane.f32.xlu1 %v4000_v28  ;;  %v3882_v39 = vpop.f32.mrb[87].mxu0  ;;  %v4009_v31 = vsel %vm2245_vm7, %v8392_v45, -inf }
0x1198   :  { %v4003_v25 = vsel %vm2245_vm7, %v3882_v39, -inf }
0x1199   :  { %4004 = vmax.xlane.f32.xlu0 %v4003_v25 }
0x119b   :  { %4010 = vmax.xlane.f32.xlu1 %v4009_v31 }
0x119d   :  { %4007 = vmax.xlane.f32.xlu0 %v4006_v42 }
0x11a0   :  { %v8401_v50 = vpop.f32.mrb[100].mxu1 }
0x11a1   :  { %v8403_v11 = vpop.f32.mrb[101].mxu1 }
0x11a2   :  { %v8405_v13 = vpop.f32.mrb[102].mxu1 }
0x11a3   :  { %v8409_v5 = vpop.f32.mrb[103].mxu1 }
0x11cd   :  { %v8413_v2 = vpop.f32.mrb[88].mxu0 }
0x11ce   :  { %v8415_v23 = vpop.f32.mrb[89].mxu0  ;;  %v4018_v56 = vsel %vm2245_vm7, %v8413_v2, -inf }
0x11cf   :  { %v8417_v4 = vpop.f32.mrb[90].mxu0  ;;  %v4012_v60 = vsel %vm2245_vm7, %v8415_v23, -inf }
0x11d0   :  { %4013 = vmax.xlane.f32.xlu0 %v4012_v60  ;;  %v8421_v6 = vpop.f32.mrb[91].mxu0  ;;  %v4021_v52 = vsel %vm2245_vm7, %v8417_v4, -inf }
0x11d1   :  { %v4015_v1 = vsel %vm2245_vm7, %v8421_v6, -inf }
0x11d2   :  { %4016 = vmax.xlane.f32.xlu1 %v4015_v1 }
0x11d4   :  { %4019 = vmax.xlane.f32.xlu0 %v4018_v56 }
0x11d6   :  { %4022 = vmax.xlane.f32.xlu1 %v4021_v52 }
0x11d9   :  { %v8429_v40 = vpop.f32.mrb[104].mxu1 }
0x11da   :  { %v8431_v28 = vpop.f32.mrb[105].mxu1 }
0x11db   :  { %v8433_v25 = vpop.f32.mrb[106].mxu1 }
0x11dc   :  { %v8437_v42 = vpop.f32.mrb[107].mxu1 }
0x11e1   :  { %v8441_v1 = vpop.f32.mrb[108].mxu1 }
0x11e2   :  { %v8443_v56 = vpop.f32.mrb[109].mxu1  ;;  %v4030_v15 = vsel %vm2245_vm7, %v8441_v1, -inf }
0x11e3   :  { %v8445_v37 = vpop.f32.mrb[110].mxu1  ;;  %v4024_v52 = vsel %vm2245_vm7, %v8443_v56, -inf }
0x11e4   :  { %4025 = vmax.xlane.f32.xlu0 %v4024_v52  ;;  %v8449_v38 = vpop.f32.mrb[111].mxu1  ;;  %v4033_v10 = vsel %vm2245_vm7, %v8445_v37, -inf }
0x11e5   :  { %v4027_v31 = vsel %vm2245_vm7, %v8449_v38, -inf }
0x11e6   :  { %4028 = vmax.xlane.f32.xlu1 %v4027_v31 }
0x11e8   :  { %4031 = vmax.xlane.f32.xlu0 %v4030_v15 }
0x11e9   :  { %v8455_v60 = vpop.f32.mrb[112].mxu1 }
0x11ea   :  { %4034 = vmax.xlane.f32.xlu1 %v4033_v10  ;;  %v8459_v18 = vpop.f32.mrb[113].mxu1  ;;  %v4042_v15 = vsel %vm2245_vm7, %v8455_v60, -inf }
0x11eb   :  { %v8461_v57 = vpop.f32.mrb[114].mxu1  ;;  %v4036_v52 = vsel %vm2245_vm7, %v8459_v18, -inf }
0x11ec   :  { %4037 = vmax.xlane.f32.xlu0 %v4036_v52  ;;  %v8465_v59 = vpop.f32.mrb[115].mxu1  ;;  %v4045_v10 = vsel %vm2245_vm7, %v8461_v57, -inf }
0x11ed   :  { %v4039_v31 = vsel %vm2245_vm7, %v8465_v59, -inf }
0x11ee   :  { %4040 = vmax.xlane.f32.xlu1 %v4039_v31 }
0x11f0   :  { %4043 = vmax.xlane.f32.xlu0 %v4042_v15 }
0x11f2   :  { %4046 = vmax.xlane.f32.xlu1 %v4045_v10 }
0x1224   :  { %v4002_v44 = vpop.xlane.xlu1 %4001 }
0x1225   :  { %v4048_v52 = vsub.f32 %v8390_v62, %v4002_v44 }
0x1226   :  { %v4005_v51 = vpop.xlane.xlu0 %4004 }
0x1227   :  { %v4049_v41 = vsub.f32 %v3882_v39, %v4005_v51  ;;  %v4064_v12 = vmul.f32 1.442695, %v4048_v52 }
0x1228   :  { %v4011_v27 = vpop.xlane.xlu1 %4010 }
0x1229   :  { %v4051_v35 = vsub.f32 %v8392_v45, %v4011_v27  ;;  %v4066_v21 = vmul.f32 1.442695, %v4049_v41 }
0x122a   :  { %v4008_v48 = vpop.xlane.xlu0 %4007 }
0x122b   :  { %v4070_v3 = vmul.f32 1.442695, %v4051_v35  ;;  %v4050_v31 = vsub.f32 %v8388_v8, %v4008_v48 }
0x122d   :  { %6233 = vpow2.f32 %v4070_v3  ;;  %v4068_v15 = vmul.f32 1.442695, %v4050_v31 }
0x122e   :  { %6235 = vpow2.f32 %v4066_v21 }
0x122f   :  { %6237 = vpow2.f32 %v4068_v15 }
0x1230   :  { %6239 = vpow2.f32 %v4064_v12 }
0x1237   :  { %v8476_v10 = vpop.eup %6233 }
0x1238   :  { %v8478_v24 = vpop.eup %6235  ;;  %v4105_v44 = vsel %vm2245_vm7, %v8476_v10, 0.0 }
0x1239   :  { %v8482_v51 = vpop.eup %6237  ;;  %4106 = vadd.xlane.f32.xlu1 %v4105_v44  ;;  %v4099_v3 = vsel %vm2245_vm7, %v8478_v24, 0.0 }
0x123a   :  { %v4102_v35 = vsel %vm2245_vm7, %v8482_v51, 0.0  ;;  %v8486_v48 = vpop.eup %6239 }
0x123b   :  { %4103 = vadd.xlane.f32.xlu0 %v4102_v35  ;;  %v4096_v12 = vsel %vm2245_vm7, %v8486_v48, 0.0 }
0x123d   :  { %4100 = vadd.xlane.f32.xlu1 %v4099_v3 }
0x123f   :  { %4097 = vadd.xlane.f32.xlu0 %v4096_v12 }
0x125d   :  { %v4014_v41 = vpop.xlane.xlu0 %4013 }
0x125e   :  { %v4052_v21 = vsub.f32 %v8415_v23, %v4014_v41 }
0x125f   :  { %v4017_v27 = vpop.xlane.xlu1 %4016 }
0x1260   :  { %v4053_v62 = vsub.f32 %v8421_v6, %v4017_v27  ;;  %v4072_v39 = vmul.f32 1.442695, %v4052_v21 }
0x1261   :  { %v4020_v8 = vpop.xlane.xlu0 %4019 }
0x1262   :  { %v4054_v45 = vsub.f32 %v8413_v2, %v4020_v8  ;;  %v4074_v44 = vmul.f32 1.442695, %v4053_v62 }
0x1263   :  { %v4023_v52 = vpop.xlane.xlu1 %4022 }
0x1264   :  { %v4076_v31 = vmul.f32 1.442695, %v4054_v45  ;;  %v4055_v15 = vsub.f32 %v8417_v4, %v4023_v52 }
0x1266   :  { %6241 = vpow2.f32 %v4076_v31  ;;  %v4078_v35 = vmul.f32 1.442695, %v4055_v15 }
0x1267   :  { %6243 = vpow2.f32 %v4072_v39 }
0x1268   :  { %6245 = vpow2.f32 %v4078_v35 }
0x1269   :  { %6247 = vpow2.f32 %v4074_v44 }
0x1270   :  { %v8496_v3 = vpop.eup %6241 }
0x1271   :  { %v8498_v23 = vpop.eup %6243  ;;  %v4026_v12 = vpop.xlane.xlu0 %4025  ;;  %v4114_v6 = vsel %vm2245_vm7, %v8496_v3, 0.0 }
0x1272   :  { %v8502_v2 = vpop.eup %6245  ;;  %4115 = vadd.xlane.f32.xlu0 %v4114_v6  ;;  %v4056_v41 = vsub.f32 %v8443_v56, %v4026_v12  ;;  %v4108_v62 = vsel %vm2245_vm7, %v8498_v23, 0.0 }
0x1273   :  { %v4029_v4 = vpop.xlane.xlu1 %4028  ;;  %v4117_v21 = vsel %vm2245_vm7, %v8502_v2, 0.0  ;;  %v8507_v27 = vpop.eup %6247 }
0x1274   :  { %4118 = vadd.xlane.f32.xlu1 %v4117_v21  ;;  %v4057_v45 = vsub.f32 %v8449_v38, %v4029_v4  ;;  %v4080_v52 = vmul.f32 1.442695, %v4056_v41  ;;  %v4111_v56 = vsel %vm2245_vm7, %v8507_v27, 0.0 }
0x1275   :  { %v4032_v8 = vpop.xlane.xlu0 %4031 }
0x1276   :  { %v4058_v39 = vsub.f32 %v8441_v1, %v4032_v8  ;;  %4109 = vadd.xlane.f32.xlu0 %v4108_v62  ;;  %v4082_v12 = vmul.f32 1.442695, %v4057_v45 }
0x1277   :  { %v4035_v31 = vpop.xlane.xlu1 %4034 }
0x1278   :  { %v4084_v15 = vmul.f32 1.442695, %v4058_v39  ;;  %v4059_v44 = vsub.f32 %v8445_v37, %v4035_v31  ;;  %4112 = vadd.xlane.f32.xlu1 %v4111_v56 }
0x1279   :  { %v4038_v35 = vpop.xlane.xlu0 %4037 }
0x127a   :  { %6249 = vpow2.f32 %v4084_v15  ;;  %v4086_v6 = vmul.f32 1.442695, %v4059_v44  ;;  %v4060_v21 = vsub.f32 %v8459_v18, %v4038_v35 }
0x127b   :  { %6251 = vpow2.f32 %v4080_v52  ;;  %v4041_v38 = vpop.xlane.xlu1 %4040 }
0x127c   :  { %6253 = vpow2.f32 %v4086_v6  ;;  %v4061_v41 = vsub.f32 %v8465_v59, %v4041_v38  ;;  %v4088_v8 = vmul.f32 1.442695, %v4060_v21 }
0x127d   :  { %v4044_v1 = vpop.xlane.xlu0 %4043  ;;  %6255 = vpow2.f32 %v4082_v12 }
0x127e   :  { %v4062_v4 = vsub.f32 %v8455_v60, %v4044_v1  ;;  %v4090_v31 = vmul.f32 1.442695, %v4061_v41 }
0x127f   :  { %v4047_v62 = vpop.xlane.xlu1 %4046 }
0x1280   :  { %v4092_v39 = vmul.f32 1.442695, %v4062_v4  ;;  %v4063_v37 = vsub.f32 %v8461_v57, %v4047_v62  ;;  %v9154_v62 = vpack.i.bf16 %v8110_v55, %v8106_v61  ;;  %v9158_v61 = vpack.i.bf16 %v8122_v22, %v8118_v7 }
0x1281   :  { %v9160_v55 = vpack.i.bf16 %v8380_v19, %v8376_v58  ;;  %v9162_v7 = vpack.i.bf16 %v8150_v47, %v8146_v43 }
0x1282   :  { %6257 = vpow2.f32 %v4092_v39  ;;  %v4094_v45 = vmul.f32 1.442695, %v4063_v37  ;;  %v9155_v39 = vpack.i.bf16 %v8372_v14, %v8366_v49 }
0x1283   :  { %6259 = vpow2.f32 %v4088_v8  ;;  %v9153_v8 = vpack.i.bf16 %v8114_v29, %v8108_v63  ;;  %v9159_v63 = vpack.i.bf16 %v8384_v36, %v8378_v34  ;;  %v9161_v29 = vpack.i.bf16 %v8154_v26, %v8148_v17 }
0x1284   :  { %v8520_v52 = vpop.eup %6249  ;;  %6261 = vpow2.f32 %v4094_v45 }
0x1285   :  { %v8522_v18 = vpop.eup %6251  ;;  %v4126_v56 = vsel %vm2245_vm7, %v8520_v52, 0.0  ;;  %6263 = vpow2.f32 %v4090_v31 }
0x1286   :  { %v8526_v59 = vpop.eup %6253  ;;  %4127 = vadd.xlane.f32.xlu0 %v4126_v56  ;;  %v4120_v15 = vsel %vm2245_vm7, %v8522_v18, 0.0 }
0x1287   :  { %v4129_v60 = vsel %vm2245_vm7, %v8526_v59, 0.0  ;;  %v8530_v57 = vpop.eup %6255 }
0x1288   :  { %4130 = vadd.xlane.f32.xlu1 %v4129_v60  ;;  %v4123_v44 = vsel %vm2245_vm7, %v8530_v57, 0.0 }
0x128a   :  { %4121 = vadd.xlane.f32.xlu0 %v4120_v15 }
0x128c   :  { %v8536_v35 = vpop.eup %6257  ;;  %4124 = vadd.xlane.f32.xlu1 %v4123_v44 }
0x128d   :  { %v8538_v12 = vpop.eup %6259  ;;  %v4138_v6 = vsel %vm2245_vm7, %v8536_v35, 0.0 }
0x128e   :  { %v8542_v21 = vpop.eup %6261  ;;  %4139 = vadd.xlane.f32.xlu0 %v4138_v6  ;;  %v4132_v41 = vsel %vm2245_vm7, %v8538_v12, 0.0 }
0x128f   :  { %v4141_v38 = vsel %vm2245_vm7, %v8542_v21, 0.0  ;;  %v8546_v1 = vpop.eup %6263 }
0x1290   :  { %4142 = vadd.xlane.f32.xlu1 %v4141_v38  ;;  %v4135_v4 = vsel %vm2245_vm7, %v8546_v1, 0.0 }
0x1292   :  { %4133 = vadd.xlane.f32.xlu0 %v4132_v41 }
0x1294   :  { %4136 = vadd.xlane.f32.xlu1 %v4135_v4 }
0x12a5   :  { %4266 = vrot.lane.b32.xlu1 %v7171_v54, %s6355_s6  ;;  %v9157_v54 = vpack.i.bf16 %v8126_v53, %v8120_v30 }
0x12a8   :  { %4184 = vrot.lane.b32.xlu0 %v7169_v46, %s6355_s6  ;;  %v9156_v46 = vpack.i.bf16 %v8368_v33, %v8364_v32 }
0x12a9   :  { %5740 = vrot.lane.b32.xlu1 %v9153_v8, %s6356_s7 }
0x12ac   :  { %5745 = vrot.lane.b32.xlu0 %v9154_v62, %s6356_s7 }
0x12ad   :  { %5750 = vrot.lane.b32.xlu1 %v9155_v39, %s6357_s3 }
0x12b0   :  { %5755 = vrot.lane.b32.xlu0 %v9156_v46, %s6357_s3 }
0x12b1   :  { %5760 = vrot.lane.b32.xlu1 %v9157_v54, %s6356_s7 }
0x12b4   :  { %5765 = vrot.lane.b32.xlu0 %v9158_v61, %s6356_s7 }
0x12b5   :  { %5770 = vrot.lane.b32.xlu1 %v9159_v63, %s6357_s3 }
0x12b8   :  { %5775 = vrot.lane.b32.xlu0 %v9160_v55, %s6357_s3 }
0x12b9   :  { %5780 = vrot.lane.b32.xlu1 %v9161_v29, %s6356_s7 }
0x12bc   :  { %5785 = vrot.lane.b32.xlu0 %v9162_v7, %s6356_s7 }
0x12c6   :  { %v4107_v30 = vpop.xlane.xlu1 %4106 }
0x12c7   :  { %6265 = vrcp.f32 %v4107_v30 }
0x12c8   :  { %v4104_v22 = vpop.xlane.xlu0 %4103 }
0x12c9   :  { %6267 = vrcp.f32 %v4104_v22 }
0x12ca   :  { %v4101_v53 = vpop.xlane.xlu1 %4100 }
0x12cb   :  { %6269 = vrcp.f32 %v4101_v53 }
0x12cc   :  { %v4098_v32 = vpop.xlane.xlu0 %4097 }
0x12cd   :  { %6271 = vrcp.f32 %v4098_v32 }
0x12d1   :  { %v6266_v49 = vpop.eup %6265 }
0x12d2   :  { %v4163_v14 = vmul.f32 %v6266_v49, %v8476_v10 }
0x12d3   :  { %v6268_v33 = vpop.eup %6267 }
0x12d4   :  { %v4162_v17 = vmul.f32 %v6268_v33, %v8482_v51 }
0x12d5   :  { %v6270_v26 = vpop.eup %6269 }
0x12d6   :  { %v4177_v58 = vpack.c.bf16 %v4163_v14, %v4162_v17  ;;  %v4161_v47 = vmul.f32 %v6270_v26, %v8478_v24 }
0x12d7   :  { %v6272_v34 = vpop.eup %6271 }
0x12d8   :  { %v4160_v43 = vmul.f32 %v6272_v34, %v8486_v48 }
0x12da   :  { %v4176_v19 = vpack.c.bf16 %v4161_v47, %v4160_v43 }
0x12dc   :  { %5662 = vmatprep.mubr.msk.bf16.mxu0 %vm2245_vm7, %v4176_v19 }
0x12ff   :  { %v4116_v36 = vpop.xlane.xlu0 %4115 }
0x1301   :  { %v4119_v37 = vpop.xlane.xlu1 %4118 }
0x1303   :  { %v4110_v31 = vpop.xlane.xlu0 %4109 }
0x1304   :  { %6273 = vrcp.f32 %v4110_v31 }
0x1305   :  { %v4113_v45 = vpop.xlane.xlu1 %4112 }
0x1306   :  { %6275 = vrcp.f32 %v4113_v45 }
0x130e   :  { %v6274_v15 = vpop.eup %6273 }
0x130f   :  { %v4164_v55 = vmul.f32 %v6274_v15, %v8498_v23 }
0x1310   :  { %v6276_v6 = vpop.eup %6275 }
0x1311   :  { %v4165_v39 = vmul.f32 %v6276_v6, %v8507_v27 }
0x1313   :  { %v4128_v56 = vpop.xlane.xlu0 %4127 }
0x1315   :  { %v4131_v60 = vpop.xlane.xlu1 %4130 }
0x1316   :  { %6277 = vrcp.f32 %v4131_v60 }
0x1317   :  { %v4122_v10 = vpop.xlane.xlu0 %4121 }
0x1318   :  { %6279 = vrcp.f32 %v4122_v10 }
0x1319   :  { %6281 = vrcp.f32 %v4128_v56  ;;  %v4125_v51 = vpop.xlane.xlu1 %4124 }
0x131a   :  { %6283 = vrcp.f32 %v4125_v51 }
0x131b   :  { %v4140_v48 = vpop.xlane.xlu0 %4139  ;;  %6285 = vrcp.f32 %v4119_v37 }
0x131c   :  { %6287 = vrcp.f32 %v4116_v36 }
0x131d   :  { %v4143_v24 = vpop.xlane.xlu1 %4142 }
0x131e   :  { %6289 = vrcp.f32 %v4143_v24  ;;  %v9163_v24 = vpack.i.bf16 %v8405_v13, %v8401_v50  ;;  %v9165_v50 = vpack.i.bf16 %v8178_v9, %v8174_v0  ;;  %v9167_v13 = vpack.i.bf16 %v8433_v25, %v8429_v40 }
0x131f   :  { %v4134_v44 = vpop.xlane.xlu0 %4133 }
0x1320   :  { %6291 = vrcp.f32 %v4134_v44  ;;  %v6278_v38 = vpop.eup %6277  ;;  %v9164_v44 = vpack.i.bf16 %v8409_v5, %v8403_v11  ;;  %v9166_v11 = vpack.i.bf16 %v8182_v16, %v8176_v20  ;;  %v9168_v5 = vpack.i.bf16 %v8437_v42, %v8431_v28 }
0x1321   :  { %6293 = vrcp.f32 %v4140_v48  ;;  %v4137_v41 = vpop.xlane.xlu1 %4136  ;;  %v4171_v54 = vmul.f32 %v6278_v38, %v8526_v59  ;;  %v4178_v59 = vpack.c.bf16 %v4165_v39, %v4164_v55 }
0x1322   :  { %v6280_v4 = vpop.eup %6279  ;;  %6295 = vrcp.f32 %v4137_v41 }
0x1323   :  { %v6282_v8 = vpop.eup %6281  ;;  %v4185_v62 = vpop.permute.xlu0 %4184  ;;  %v4168_v29 = vmul.f32 %v6280_v4, %v8522_v18 }
0x1324   :  { %v6284_v46 = vpop.eup %6283  ;;  %v4199_v61 = vsel %vm124_vm2, %v4185_v62, 0  ;;  %5722 = vmatprep.subr.msk.bf16.mxu0 %vm124_vm2, %v4185_v62  ;;  %v4170_v30 = vmul.f32 %v6282_v8, %v8520_v52 }
0x1325   :  { %5661 = vmatpush3.bf16.msra.mxu0 %v4199_v61  ;;  %v4267_v63 = vpop.permute.xlu1 %4266  ;;  %v4169_v7 = vmul.f32 %v6284_v46, %v8530_v57  ;;  %v6286_v27 = vpop.eup %6285 }
0x1326   :  { %v4281_v22 = vsel %vm124_vm2, %v4267_v63, 0  ;;  %5723 = vmatprep.subr.msk.bf16.mxu1 %vm124_vm2, %v4267_v63  ;;  %v6288_v32 = vpop.eup %6287  ;;  %v4181_v49 = vpack.c.bf16 %v4171_v54, %v4170_v30  ;;  %v4167_v52 = vmul.f32 %v6286_v27, %v8502_v2  ;;  %v5876_v2 = vld [vmem:[%s9074_s22 + $0x8] sm:$0xff]  }
0x1327   :  { %5671 = vmatpush3.bf16.msra.mxu1 %v4281_v22  ;;  %v4180_v53 = vpack.c.bf16 %v4169_v7, %v4168_v29  ;;  %v4166_v14 = vmul.f32 %v6288_v32, %v8496_v3  ;;  %v5875_v3 = vld [vmem:[%s9074_s22] sm:$0xff]   ;;  %v5746_v0 = vpop.permute.xlu0 %5745 }
0x1328   :  { %5663 = vmatmul.mubr.msk.bf16.vlgmr.msra.gmra.mrb[92].mxu0 %vm2245_vm7, %v4177_v58  ;;  %v6290_v33 = vpop.eup %6289  ;;  %5680 = vmatprep.subr.bf16.mxu0 %v5875_v3  ;;  %v5747_v30 = vunpack.i.l.bf16 %v5746_v0  ;;  %v5748_v22 = vunpack.i.h.bf16 %v5746_v0 }
0x1329   :  { %5666 = vmatprep.mubr.msk.bf16.mxu0 %vm2245_vm7, %v4178_v59  ;;  %5672 = vmatprep.mubr.msk.bf16.mxu1 %vm2245_vm7, %v4180_v53  ;;  %v4175_v17 = vmul.f32 %v6290_v33, %v8542_v21  ;;  %v4179_v34 = vpack.c.bf16 %v4167_v52, %v4166_v14  ;;  %v5741_v9 = vpop.permute.xlu1 %5740  ;;  %v9172_v14 = vld [vmem:[#allocation20_spill] sm:$0xff] }
0x132a   :  { %v6292_v23 = vpop.eup %6291  ;;  %5673 = vmatmul.mubr.msk.bf16.vlgmr.msra.gmra.mrb[116].mxu1 %vm2245_vm7, %v4181_v49  ;;  %5681 = vmatpush3.bf16.msra.mxu0 %v5875_v3  ;;  %v5743_v27 = vunpack.i.h.bf16 %v5741_v9  ;;  %v5742_v40 = vunpack.i.l.bf16 %v5741_v9  ;;  %v9169_v49 = vld [vmem:[#allocation19_spill] sm:$0xff] }
0x132b   :  { %v6294_v18 = vpop.eup %6293  ;;  %v4172_v26 = vmul.f32 %v6292_v23, %v8538_v12  ;;  %5682 = vmatprep.subr.bf16.mxu0 %v5876_v2  ;;  %v5756_v63 = vpop.permute.xlu0 %5755  ;;  %v4542_v33 = vsel %vm2245_vm7, %v9169_v49, %v5747_v30  ;;  %v9170_v23 = vld [vmem:[#allocation21_spill] sm:$0xff] }
0x132c   :  { %v6296_v57 = vpop.eup %6295  ;;  %v4174_v43 = vmul.f32 %v6294_v18, %v8536_v35  ;;  %v5757_v25 = vunpack.i.l.bf16 %v5756_v63  ;;  %v5758_v28 = vunpack.i.h.bf16 %v5756_v63  ;;  %v4543_v52 = vsel %vm2245_vm7, %v9170_v23, %v5748_v22  ;;  %v9171_v18 = vld [vmem:[#allocation22_spill] sm:$0xff] }
0x132d   :  { %v4173_v58 = vmul.f32 %v6296_v57, %v8546_v1  ;;  %v5751_v55 = vpop.permute.xlu1 %5750  ;;  %v4541_v57 = vsel %vm2245_vm7, %v9171_v18, %v5743_v27 }
0x132e   :  { %v4183_v19 = vpack.c.bf16 %v4175_v17, %v4174_v43  ;;  %5683 = vmatpush3.bf16.msra.mxu0 %v5876_v2  ;;  %v5752_v42 = vunpack.i.l.bf16 %v5751_v55  ;;  %v5753_v32 = vunpack.i.h.bf16 %v5751_v55  ;;  %v4540_v17 = vsel %vm2245_vm7, %v9172_v14, %v5742_v40 }
0x132f   :  { %v4182_v47 = vpack.c.bf16 %v4173_v58, %v4172_v26  ;;  %v5766_v20 = vpop.permute.xlu0 %5765  ;;  %v4559_v26 = vsel %vm4556_vm8, %v4542_v33, %v5757_v25 }
0x1330   :  { %5667 = vmatmul.mubr.msk.bf16.gmra.mrb[96].mxu0 %vm2245_vm7, %v4179_v34  ;;  %v4560_v34 = vsel %vm4556_vm8, %v4543_v52, %v5758_v28  ;;  %v4557_v43 = vsel %vm4556_vm8, %v4540_v17, %v5752_v42  ;;  %v4558_v2 = vsel %vm4556_vm8, %v4541_v57, %v5753_v32  ;;  %v9177_v57 = vld [vmem:[#allocation29_spill] sm:$0xff]  ;;  %v9178_v17 = vld [vmem:[#allocation27_spill] sm:$0xff] }
0x1331   :  { %5676 = vmatprep.mubr.msk.bf16.mxu1 %vm2245_vm7, %v4182_v47  ;;  %v5761_v16 = vpop.permute.xlu1 %5760 }
0x1332   :  { %5677 = vmatmul.mubr.msk.bf16.gmra.mrb[120].mxu1 %vm2245_vm7, %v4183_v19 }
0x1333   :  { %v5776_v29 = vpop.permute.xlu0 %5775 }
0x1335   :  { %v5771_v7 = vpop.permute.xlu1 %5770 }
0x1337   :  { %v8652_v59 = vpop.permute.xlu0 %5785 }
0x1339   :  { %v8654_v53 = vpop.permute.xlu1 %5780 }
0x133a   :  { %v5783_v27 = vunpack.i.h.bf16 %v8654_v53  ;;  %v5782_v32 = vunpack.i.l.bf16 %v8654_v53  ;;  %v9180_v53 = vld [vmem:[#allocation28_spill] sm:$0xff] }
0x13fb   :  { %v5664_v35 = vpop.f32.mrb[92].mxu0 }
0x13fc   :  { %v4235_v12 = vpop.f32.mrb[93].mxu0 }
0x13fd   :  { %v5665_v21 = vpop.f32.mrb[94].mxu0  ;;  %v5674_v1 = vpop.f32.mrb[116].mxu1 }
0x13fe   :  { %v5789_v36 = vpack.i.bf16 %v5665_v21, %v5664_v35  ;;  %v4238_v37 = vpop.f32.mrb[95].mxu0  ;;  %v4317_v31 = vpop.f32.mrb[117].mxu1  ;;  %v5768_v35 = vunpack.i.h.bf16 %v5766_v20 }
0x13ff   :  { %v5794_v45 = vpack.i.bf16 %v4238_v37, %v4235_v12  ;;  %v5675_v56 = vpop.f32.mrb[118].mxu1 }
0x1400   :  { %v5829_v60 = vpack.i.bf16 %v5675_v56, %v5674_v1  ;;  %5790 = vrot.lane.b32.xlu0 %v5789_v36, %s6358_s21  ;;  %v4320_v10 = vpop.f32.mrb[119].mxu1  ;;  %v5767_v1 = vunpack.i.l.bf16 %v5766_v20  ;;  %v5763_v36 = vunpack.i.h.bf16 %v5761_v16 }
0x1401   :  { %v5834_v51 = vpack.i.bf16 %v4320_v10, %v4317_v31  ;;  %5795 = vrot.lane.b32.xlu1 %v5794_v45, %s6358_s21  ;;  %v5762_v45 = vunpack.i.l.bf16 %v5761_v16 }
0x1403   :  { %v5668_v48 = vpop.f32.mrb[96].mxu0 }
0x1404   :  { %5805 = vrot.lane.b32.xlu0 %v9163_v24, %s6357_s3  ;;  %v4251_v15 = vpop.f32.mrb[97].mxu0  ;;  %v5777_v24 = vunpack.i.l.bf16 %v5776_v29 }
0x1405   :  { %5800 = vrot.lane.b32.xlu1 %v9164_v44, %s6357_s3  ;;  %v5669_v6 = vpop.f32.mrb[98].mxu0  ;;  %v5678_v38 = vpop.f32.mrb[120].mxu1 }
0x1406   :  { %v5809_v41 = vpack.i.bf16 %v5669_v6, %v5668_v48  ;;  %v4254_v4 = vpop.f32.mrb[99].mxu0  ;;  %v4333_v8 = vpop.f32.mrb[121].mxu1  ;;  %v5778_v48 = vunpack.i.h.bf16 %v5776_v29  ;;  %v5773_v6 = vunpack.i.h.bf16 %v5771_v7  ;;  %v5788_v29 = vunpack.i.h.bf16 %v8652_v59 }
0x1407   :  { %v5814_v62 = vpack.i.bf16 %v4254_v4, %v4251_v15  ;;  %v5679_v39 = vpop.f32.mrb[122].mxu1 }
0x1408   :  { %v5854_v46 = vpack.i.bf16 %v5679_v39, %v5678_v38  ;;  %5810 = vrot.lane.b32.xlu0 %v5809_v41, %s6358_s21  ;;  %v4336_v54 = vpop.f32.mrb[123].mxu1  ;;  %v5772_v38 = vunpack.i.l.bf16 %v5771_v7  ;;  %v9173_v41 = vld [vmem:[#allocation25_spill] sm:$0xff]  ;;  %v9175_v39 = vld [vmem:[#allocation26_spill] sm:$0xff]  ;;  %v5787_v7 = vunpack.i.l.bf16 %v8652_v59  ;;  %v4551_v14 = vsel %vm2245_vm7, %v9177_v57, %v5788_v29 }
0x1409   :  { %v5849_v61 = vpack.i.bf16 %v4336_v54, %v4333_v8  ;;  %5815 = vrot.lane.b32.xlu1 %v5814_v62, %s6358_s21  ;;  %v4547_v4 = vsel %vm2245_vm7, %v9173_v41, %v5768_v35  ;;  %v9174_v8 = vld [vmem:[#allocation23_spill] sm:$0xff]  ;;  %v9176_v54 = vld [vmem:[#allocation24_spill] sm:$0xff] }
0x140a   :  { %v4546_v62 = vsel %vm2245_vm7, %v9174_v8, %v5767_v1 }
0x140c   :  { %5825 = vrot.lane.b32.xlu0 %v9165_v50, %s6356_s7 }
0x140d   :  { %5820 = vrot.lane.b32.xlu1 %v9166_v11, %s6356_s7  ;;  %v4563_v11 = vsel %vm4556_vm8, %v4546_v62, %v5777_v24 }
0x1410   :  { %5830 = vrot.lane.b32.xlu0 %v5829_v60, %s6358_s21 }
0x1411   :  { %5835 = vrot.lane.b32.xlu1 %v5834_v51, %s6358_s21 }
0x1414   :  { %5845 = vrot.lane.b32.xlu0 %v9167_v13, %s6357_s3  ;;  %v4564_v13 = vsel %vm4556_vm8, %v4547_v4, %v5778_v48 }
0x1415   :  { %5840 = vrot.lane.b32.xlu1 %v9168_v5, %s6357_s3 }
0x1418   :  { %5855 = vrot.lane.b32.xlu0 %v5854_v46, %s6358_s21  ;;  %v4545_v46 = vsel %vm2245_vm7, %v9175_v39, %v5763_v36  ;;  %v9181_v39 = vld [vmem:[#allocation33_spill] sm:$0xff] }
0x1419   :  { %5850 = vrot.lane.b32.xlu1 %v5849_v61, %s6358_s21  ;;  %v4544_v61 = vsel %vm2245_vm7, %v9176_v54, %v5762_v45  ;;  %v4562_v55 = vsel %vm4556_vm8, %v4545_v46, %v5773_v6  ;;  %v9182_v54 = vld [vmem:[#allocation31_spill] sm:$0xff] }
0x141a   :  { %v4561_v63 = vsel %vm4556_vm8, %v4544_v61, %v5772_v38 }
0x1472   :  { %v5791_v58 = vpop.permute.xlu0 %5790 }
0x1473   :  { %v5793_v47 = vunpack.i.h.bf16 %v5791_v58  ;;  %v5792_v19 = vunpack.i.l.bf16 %v5791_v58  ;;  %v5796_v3 = vpop.permute.xlu1 %5795  ;;  %v9179_v58 = vld [vmem:[#allocation30_spill] sm:$0xff] }
0x1474   :  { %v5798_v12 = vunpack.i.h.bf16 %v5796_v3  ;;  %v5797_v21 = vunpack.i.l.bf16 %v5796_v3 }
0x1475   :  { %v4576_v37 = vsel %vm120_vm3, %v4560_v34, %v5793_v47  ;;  %v4575_v31 = vsel %vm120_vm3, %v4559_v26, %v5792_v19  ;;  %v4550_v26 = vsel %vm2245_vm7, %v9178_v17, %v5787_v7  ;;  %v4549_v34 = vsel %vm2245_vm7, %v9179_v58, %v5783_v27 }
0x1476   :  { %v4590_v56 = vpack.c.bf16 %v4576_v37, %v4575_v31  ;;  %v4573_v60 = vsel %vm120_vm3, %v4557_v43, %v5797_v21  ;;  %v4574_v10 = vsel %vm120_vm3, %v4558_v2, %v5798_v12  ;;  %v5806_v51 = vpop.permute.xlu0 %5805  ;;  %v4548_v47 = vsel %vm2245_vm7, %v9180_v53, %v5782_v32 }
0x1477   :  { %v4589_v15 = vpack.c.bf16 %v4574_v10, %v4573_v60  ;;  %v5801_v44 = vpop.permute.xlu1 %5800  ;;  %v5808_v49 = vunpack.i.h.bf16 %v5806_v51  ;;  %v5807_v52 = vunpack.i.l.bf16 %v5806_v51 }
0x1478   :  { %v5802_v18 = vunpack.i.l.bf16 %v5801_v44  ;;  %v5803_v59 = vunpack.i.h.bf16 %v5801_v44 }
0x1479   :  { %5684 = vmatprep.mubr.msk.bf16.mxu0 %vm331_vm0, %v4589_v15  ;;  %v4568_v19 = vsel %vm4556_vm8, %v4551_v14, %v5808_v49  ;;  %v4567_v12 = vsel %vm4556_vm8, %v4550_v26, %v5807_v52  ;;  %v5181_v49 = vld [vmem:[%s9075_s23] ss:$0 sm:$0xff] }
0x147a   :  { %v5811_v50 = vpop.permute.xlu0 %5810  ;;  %5685 = vmatmul.mubr.msk.bf16.vlgmr.msra.gmra.mrb[100].mxu0 %vm331_vm0, %v4590_v56  ;;  %v4565_v21 = vsel %vm4556_vm8, %v4548_v47, %v5802_v18  ;;  %v4566_v37 = vsel %vm4556_vm8, %v4549_v34, %v5803_v59 }
0x147b   :  { %v5813_v5 = vunpack.i.h.bf16 %v5811_v50  ;;  %v5812_v0 = vunpack.i.l.bf16 %v5811_v50  ;;  %v5816_v9 = vpop.permute.xlu1 %5815 }
0x147c   :  { %v5818_v20 = vunpack.i.h.bf16 %v5816_v9  ;;  %v5817_v16 = vunpack.i.l.bf16 %v5816_v9 }
0x147d   :  { %v4580_v30 = vsel %vm120_vm3, %v4564_v13, %v5813_v5  ;;  %v4579_v22 = vsel %vm120_vm3, %v4563_v11, %v5812_v0  ;;  %v9183_v11 = vld [vmem:[#allocation34_spill] sm:$0xff]  ;;  %v9184_v5 = vld [vmem:[#allocation32_spill] sm:$0xff] }
0x147e   :  { %v4592_v40 = vpack.c.bf16 %v4580_v30, %v4579_v22  ;;  %v4577_v25 = vsel %vm120_vm3, %v4561_v63, %v5817_v16  ;;  %v4578_v28 = vsel %vm120_vm3, %v4562_v55, %v5818_v20  ;;  %v5826_v42 = vpop.permute.xlu0 %5825 }
0x147f   :  { %v4591_v33 = vpack.c.bf16 %v4578_v28, %v4577_v25  ;;  %v5821_v23 = vpop.permute.xlu1 %5820  ;;  %v5828_v31 = vunpack.i.h.bf16 %v5826_v42  ;;  %v5827_v60 = vunpack.i.l.bf16 %v5826_v42 }
0x1480   :  { %v5823_v15 = vunpack.i.h.bf16 %v5821_v23  ;;  %v5822_v44 = vunpack.i.l.bf16 %v5821_v23 }
0x1481   :  { %5688 = vmatprep.mubr.msk.bf16.mxu0 %vm331_vm0, %v4591_v33  ;;  %v4555_v46 = vsel %vm2245_vm7, %v9181_v39, %v5828_v31  ;;  %v4554_v61 = vsel %vm2245_vm7, %v9182_v54, %v5827_v60 }
0x1482   :  { %v5831_v43 = vpop.permute.xlu0 %5830  ;;  %5689 = vmatmul.mubr.msk.bf16.gmra.mrb[104].mxu0 %vm331_vm0, %v4592_v40  ;;  %v4553_v13 = vsel %vm2245_vm7, %v9183_v11, %v5823_v15  ;;  %v4552_v0 = vsel %vm2245_vm7, %v9184_v5, %v5822_v44 }
0x1483   :  { %v5833_v3 = vunpack.i.h.bf16 %v5831_v43  ;;  %v5832_v2 = vunpack.i.l.bf16 %v5831_v43  ;;  %v5836_v35 = vpop.permute.xlu1 %5835 }
0x1484   :  { %v5838_v1 = vunpack.i.h.bf16 %v5836_v35  ;;  %v5837_v36 = vunpack.i.l.bf16 %v5836_v35 }
0x1485   :  { %v4584_v45 = vsel %vm120_vm3, %v4568_v19, %v5833_v3  ;;  %v4583_v56 = vsel %vm120_vm3, %v4567_v12, %v5832_v2 }
0x1486   :  { %v4594_v10 = vpack.c.bf16 %v4584_v45, %v4583_v56  ;;  %v4581_v51 = vsel %vm120_vm3, %v4565_v21, %v5837_v36  ;;  %v4582_v48 = vsel %vm120_vm3, %v4566_v37, %v5838_v1  ;;  %v5846_v24 = vpop.permute.xlu0 %5845 }
0x1487   :  { %v4593_v6 = vpack.c.bf16 %v4582_v48, %v4581_v51  ;;  %v5841_v38 = vpop.permute.xlu1 %5840  ;;  %v5848_v41 = vunpack.i.h.bf16 %v5846_v24  ;;  %v5847_v4 = vunpack.i.l.bf16 %v5846_v24 }
0x1488   :  { %v5843_v8 = vunpack.i.h.bf16 %v5841_v38  ;;  %v5842_v62 = vunpack.i.l.bf16 %v5841_v38 }
0x1489   :  { %5692 = vmatprep.mubr.msk.bf16.mxu0 %vm331_vm0, %v4593_v6  ;;  %v4572_v20 = vsel %vm4556_vm8, %v4555_v46, %v5848_v41  ;;  %v4571_v16 = vsel %vm4556_vm8, %v4554_v61, %v5847_v4 }
0x148a   :  { %v5856_v50 = vpop.permute.xlu0 %5855  ;;  %5693 = vmatmul.mubr.msk.bf16.gmra.mrb[108].mxu0 %vm331_vm0, %v4594_v10  ;;  %v4569_v30 = vsel %vm4556_vm8, %v4552_v0, %v5842_v62  ;;  %v4570_v22 = vsel %vm4556_vm8, %v4553_v13, %v5843_v8 }
0x148b   :  { %v5858_v9 = vunpack.i.h.bf16 %v5856_v50  ;;  %v5857_v63 = vunpack.i.l.bf16 %v5856_v50  ;;  %v5851_v55 = vpop.permute.xlu1 %5850 }
0x148c   :  { %v5853_v29 = vunpack.i.h.bf16 %v5851_v55  ;;  %v5852_v7 = vunpack.i.l.bf16 %v5851_v55 }
0x148d   :  { %v4588_v27 = vsel %vm120_vm3, %v4572_v20, %v5858_v9  ;;  %v4587_v40 = vsel %vm120_vm3, %v4571_v16, %v5857_v63 }
0x148e   :  { %v4596_v25 = vpack.c.bf16 %v4588_v27, %v4587_v40  ;;  %v4585_v28 = vsel %vm120_vm3, %v4569_v30, %v5852_v7  ;;  %v4586_v42 = vsel %vm120_vm3, %v4570_v22, %v5853_v29 }
0x148f   :  { %v4595_v32 = vpack.c.bf16 %v4586_v42, %v4585_v28 }
0x1491   :  { %5696 = vmatprep.mubr.msk.bf16.mxu0 %vm331_vm0, %v4595_v32 }
0x1492   :  { %5697 = vmatmul.mubr.msk.bf16.gmra.mrb[112].mxu0 %vm331_vm0, %v4596_v25 }
0x154d   :  { %v5686_v33 = vpop.f32.mrb[100].mxu0 }
0x154e   :  { %v8735_v23 = vadd.f32 %v5686_v33, %v5181_v49  ;;  %v4678_v52 = vpop.f32.mrb[101].mxu0 }
0x154f   :  { %v8737_v18 = vadd.f32 %v5181_v49, %v4678_v52  ;;  %v5687_v59 = vpop.f32.mrb[102].mxu0 }
0x1550   :  { %v4681_v57 = vpop.f32.mrb[103].mxu0  ;;  %v4749_v14 = vsel %vm331_vm0, %v8735_v23, 0.0  ;;  %v8741_v17 = vadd.f32 %v5687_v59, %v5181_v49 }
0x1551   :  { %v8743_v26 = vadd.f32 %v5181_v49, %v4681_v57  ;;  %4750 = vadd.xlane.f32.xlu0 %v4749_v14  ;;  %v4743_v58 = vsel %vm331_vm0, %v8737_v18, 0.0 }
0x1552   :  { %4744 = vadd.xlane.f32.xlu1 %v4743_v58  ;;  %v4752_v53 = vsel %vm331_vm0, %v8741_v17, 0.0 }
0x1553   :  { %v4746_v34 = vsel %vm331_vm0, %v8743_v26, 0.0 }
0x1555   :  { %v5690_v43 = vpop.f32.mrb[104].mxu0  ;;  %4747 = vadd.xlane.f32.xlu0 %v4746_v34 }
0x1556   :  { %v8751_v47 = vadd.f32 %v5690_v43, %v5181_v49  ;;  %v4694_v19 = vpop.f32.mrb[105].mxu0  ;;  %4753 = vadd.xlane.f32.xlu1 %v4752_v53 }
0x1557   :  { %v5691_v3 = vpop.f32.mrb[106].mxu0  ;;  %v8753_v2 = vadd.f32 %v5181_v49, %v4694_v19 }
0x1558   :  { %v8755_v35 = vadd.f32 %v5691_v3, %v5181_v49  ;;  %v4697_v12 = vpop.f32.mrb[107].mxu0  ;;  %v4761_v21 = vsel %vm331_vm0, %v8751_v47, 0.0 }
0x1559   :  { %4762 = vadd.xlane.f32.xlu0 %v4761_v21  ;;  %v8759_v1 = vadd.f32 %v5181_v49, %v4697_v12  ;;  %v4755_v37 = vsel %vm331_vm0, %v8753_v2, 0.0 }
0x155a   :  { %v4764_v36 = vsel %vm331_vm0, %v8755_v35, 0.0 }
0x155b   :  { %4765 = vadd.xlane.f32.xlu1 %v4764_v36  ;;  %v4758_v60 = vsel %vm331_vm0, %v8759_v1, 0.0 }
0x155d   :  { %v5694_v31 = vpop.f32.mrb[108].mxu0  ;;  %4756 = vadd.xlane.f32.xlu0 %v4755_v37 }
0x155e   :  { %v8765_v45 = vadd.f32 %v5694_v31, %v5181_v49  ;;  %v4710_v56 = vpop.f32.mrb[109].mxu0 }
0x155f   :  { %v5695_v10 = vpop.f32.mrb[110].mxu0  ;;  %4759 = vadd.xlane.f32.xlu1 %v4758_v60  ;;  %v8769_v51 = vadd.f32 %v5181_v49, %v4710_v56 }
0x1560   :  { %v8771_v48 = vadd.f32 %v5695_v10, %v5181_v49  ;;  %v4713_v24 = vpop.f32.mrb[111].mxu0  ;;  %v4773_v15 = vsel %vm331_vm0, %v8765_v45, 0.0 }
0x1561   :  { %4774 = vadd.xlane.f32.xlu0 %v4773_v15  ;;  %v8775_v44 = vadd.f32 %v5181_v49, %v4713_v24  ;;  %v4767_v38 = vsel %vm331_vm0, %v8769_v51, 0.0 }
0x1562   :  { %v4776_v6 = vsel %vm331_vm0, %v8771_v48, 0.0 }
0x1563   :  { %4777 = vadd.xlane.f32.xlu1 %v4776_v6  ;;  %v4770_v8 = vsel %vm331_vm0, %v8775_v44, 0.0 }
0x1565   :  { %v5698_v41 = vpop.f32.mrb[112].mxu0  ;;  %4768 = vadd.xlane.f32.xlu0 %v4767_v38 }
0x1566   :  { %v4726_v4 = vpop.f32.mrb[113].mxu0  ;;  %v8785_v54 = vadd.f32 %v5698_v41, %v5181_v49 }
0x1567   :  { %v8783_v62 = vadd.f32 %v5181_v49, %v4726_v4  ;;  %v5699_v39 = vpop.f32.mrb[114].mxu0  ;;  %4771 = vadd.xlane.f32.xlu1 %v4770_v8 }
0x1568   :  { %v4729_v46 = vpop.f32.mrb[115].mxu0  ;;  %v8791_v11 = vadd.f32 %v5699_v39, %v5181_v49  ;;  %v4785_v5 = vsel %vm331_vm0, %v8785_v54, 0.0 }
0x1569   :  { %v8787_v61 = vadd.f32 %v5181_v49, %v4729_v46  ;;  %v4779_v50 = vsel %vm331_vm0, %v8783_v62, 0.0 }
0x156a   :  { %4780 = vadd.xlane.f32.xlu0 %v4779_v50  ;;  %v4788_v0 = vsel %vm331_vm0, %v8791_v11, 0.0 }
0x156b   :  { %v4782_v13 = vsel %vm331_vm0, %v8787_v61, 0.0 }
0x156c   :  { %4783 = vadd.xlane.f32.xlu1 %v4782_v13 }
0x156e   :  { %4786 = vadd.xlane.f32.xlu0 %v4785_v5 }
0x1570   :  { %4789 = vadd.xlane.f32.xlu1 %v4788_v0 }
0x15de   :  { %v4751_v9 = vpop.xlane.xlu0 %4750 }
0x15df   :  { %v4793_v63 = vmul.f32 0.03125, %v4751_v9  ;;  %v4745_v55 = vpop.xlane.xlu1 %4744 }
0x15e0   :  { %v4791_v20 = vmul.f32 0.03125, %v4745_v55 }
0x15e1   :  { %v8800_v16 = vsub.f32 %v8735_v23, %v4793_v63 }
0x15e2   :  { %v8803_v29 = vsub.f32 %v8737_v18, %v4791_v20  ;;  %v4748_v7 = vpop.xlane.xlu0 %4747 }
0x15e3   :  { %v4792_v30 = vmul.f32 0.03125, %v4748_v7  ;;  %v4754_v22 = vpop.xlane.xlu1 %4753  ;;  %v4825_v27 = vmul.f32 %v8800_v16, %v8800_v16 }
0x15e4   :  { %v4794_v40 = vmul.f32 0.03125, %v4754_v22  ;;  %v4823_v28 = vmul.f32 %v8803_v29, %v8803_v29 }
0x15e5   :  { %v4845_v25 = vsel %vm331_vm0, %v4825_v27, 0.0  ;;  %v8811_v42 = vsub.f32 %v8743_v26, %v4792_v30 }
0x15e6   :  { %v8814_v32 = vsub.f32 %v8741_v17, %v4794_v40  ;;  %4846 = vadd.xlane.f32.xlu0 %v4845_v25  ;;  %v4763_v49 = vpop.xlane.xlu0 %4762  ;;  %v4839_v57 = vsel %vm331_vm0, %v4823_v28, 0.0 }
0x15e7   :  { %v4797_v33 = vmul.f32 0.03125, %v4763_v49  ;;  %v4824_v17 = vmul.f32 %v8811_v42, %v8811_v42 }
0x15e8   :  { %v4766_v23 = vpop.xlane.xlu1 %4765  ;;  %v4826_v52 = vmul.f32 %v8814_v32, %v8814_v32 }
0x15e9   :  { %v8819_v18 = vsub.f32 %v8751_v47, %v4797_v33  ;;  %v4798_v59 = vmul.f32 0.03125, %v4766_v23  ;;  %v4842_v21 = vsel %vm331_vm0, %v4824_v17, 0.0 }
0x15ea   :  { %v4757_v14 = vpop.xlane.xlu0 %4756  ;;  %4840 = vadd.xlane.f32.xlu0 %v4839_v57  ;;  %v4848_v26 = vsel %vm331_vm0, %v4826_v52, 0.0 }
0x15eb   :  { %v8826_v58 = vsub.f32 %v8755_v35, %v4798_v59  ;;  %v4795_v34 = vmul.f32 0.03125, %v4757_v14  ;;  %4849 = vadd.xlane.f32.xlu1 %v4848_v26  ;;  %v4829_v43 = vmul.f32 %v8819_v18, %v8819_v18 }
0x15ec   :  { %v4760_v53 = vpop.xlane.xlu1 %4759 }
0x15ed   :  { %v8831_v47 = vsub.f32 %v8753_v2, %v4795_v34  ;;  %v4796_v19 = vmul.f32 0.03125, %v4760_v53  ;;  %v4857_v3 = vsel %vm331_vm0, %v4829_v43, 0.0  ;;  %v4830_v35 = vmul.f32 %v8826_v58, %v8826_v58 }
0x15ee   :  { %v4775_v12 = vpop.xlane.xlu0 %4774  ;;  %4858 = vadd.xlane.f32.xlu0 %v4857_v3 }
0x15ef   :  { %v8838_v36 = vsub.f32 %v8759_v1, %v4796_v19  ;;  %v4801_v37 = vmul.f32 0.03125, %v4775_v12  ;;  %4843 = vadd.xlane.f32.xlu1 %v4842_v21  ;;  %v4827_v31 = vmul.f32 %v8831_v47, %v8831_v47  ;;  %v4860_v15 = vsel %vm331_vm0, %v4830_v35, 0.0 }
0x15f0   :  { %v4778_v2 = vpop.xlane.xlu1 %4777 }
0x15f1   :  { %v8843_v56 = vsub.f32 %v8765_v45, %v4801_v37  ;;  %v4802_v60 = vmul.f32 0.03125, %v4778_v2  ;;  %v4851_v10 = vsel %vm331_vm0, %v4827_v31, 0.0  ;;  %v4828_v1 = vmul.f32 %v8838_v36, %v8838_v36 }
0x15f2   :  { %v4769_v24 = vpop.xlane.xlu0 %4768  ;;  %4852 = vadd.xlane.f32.xlu0 %v4851_v10 }
0x15f3   :  { %v8850_v6 = vsub.f32 %v8771_v48, %v4802_v60  ;;  %v4799_v38 = vmul.f32 0.03125, %v4769_v24  ;;  %4861 = vadd.xlane.f32.xlu1 %v4860_v15  ;;  %v4833_v41 = vmul.f32 %v8843_v56, %v8843_v56  ;;  %v4854_v46 = vsel %vm331_vm0, %v4828_v1, 0.0 }
0x15f4   :  { %v4772_v45 = vpop.xlane.xlu1 %4771 }
0x15f5   :  { %v8855_v4 = vsub.f32 %v8769_v51, %v4799_v38  ;;  %v4800_v8 = vmul.f32 0.03125, %v4772_v45  ;;  %v4869_v39 = vsel %vm331_vm0, %v4833_v41, 0.0  ;;  %v4834_v50 = vmul.f32 %v8850_v6, %v8850_v6  ;;  %v8898_v38 = vld [vmem:[%s9076_s12] ss:$0 sm:$0xff] }
0x15f6   :  { %4870 = vadd.xlane.f32.xlu0 %v4869_v39 }
0x15f7   :  { %v8862_v48 = vsub.f32 %v8775_v44, %v4800_v8  ;;  %v4781_v13 = vpop.xlane.xlu0 %4780  ;;  %4855 = vadd.xlane.f32.xlu1 %v4854_v46  ;;  %v4831_v5 = vmul.f32 %v8855_v4, %v8855_v4  ;;  %v4872_v44 = vsel %vm331_vm0, %v4834_v50, 0.0  ;;  %v8904_v46 = vld [vmem:[%s9077_s13] ss:$0 sm:$0xff] }
0x15f8   :  { %v4803_v0 = vmul.f32 0.03125, %v4781_v13 }
0x15f9   :  { %v4784_v51 = vpop.xlane.xlu1 %4783  ;;  %v4863_v9 = vsel %vm331_vm0, %v4831_v5, 0.0  ;;  %v4832_v63 = vmul.f32 %v8862_v48, %v8862_v48 }
0x15fa   :  { %v8870_v55 = vsub.f32 %v8783_v62, %v4803_v0  ;;  %v4804_v20 = vmul.f32 0.03125, %v4784_v51  ;;  %4864 = vadd.xlane.f32.xlu0 %v4863_v9  ;;  %v8910_v9 = vstv %s9078_s24 }
0x15fb   :  { %v4787_v7 = vpop.xlane.xlu0 %4786  ;;  %4873 = vadd.xlane.f32.xlu1 %v4872_v44  ;;  %v4866_v25 = vsel %vm331_vm0, %v4832_v63, 0.0 }
0x15fc   :  { %v8874_v30 = vsub.f32 %v8787_v61, %v4804_v20  ;;  %v4805_v22 = vmul.f32 0.03125, %v4787_v7  ;;  %v4835_v27 = vmul.f32 %v8870_v55, %v8870_v55 }
0x15fd   :  { %v4790_v40 = vpop.xlane.xlu1 %4789 }
0x15fe   :  { %v8880_v28 = vsub.f32 %v8785_v54, %v4805_v22  ;;  %v4806_v62 = vmul.f32 0.03125, %v4790_v40  ;;  %v4875_v49 = vsel %vm331_vm0, %v4835_v27, 0.0  ;;  %v4836_v33 = vmul.f32 %v8874_v30, %v8874_v30 }
0x15ff   :  { %4876 = vadd.xlane.f32.xlu0 %v4875_v49  ;;  %4867 = vadd.xlane.f32.xlu1 %v4866_v25 }
0x1600   :  { %v8886_v61 = vsub.f32 %v8791_v11, %v4806_v62  ;;  %v4837_v23 = vmul.f32 %v8880_v28, %v8880_v28  ;;  %v4878_v59 = vsel %vm331_vm0, %v4836_v33, 0.0 }
0x1602   :  { %v4881_v52 = vsel %vm331_vm0, %v4837_v23, 0.0  ;;  %v4838_v54 = vmul.f32 %v8886_v61, %v8886_v61 }
0x1603   :  { %4882 = vadd.xlane.f32.xlu0 %v4881_v52  ;;  %4879 = vadd.xlane.f32.xlu1 %v4878_v59 }
0x1604   :  { %v4884_v57 = vsel %vm331_vm0, %v4838_v54, 0.0 }
0x1607   :  { %4885 = vadd.xlane.f32.xlu1 %v4884_v57  ;;  %v9185_v57 = vld [vmem:[#allocation6_spill] sm:$0xff] }
0x1673   :  { %v4847_v14 = vpop.xlane.xlu0 %4846 }
0x1674   :  { %v4889_v26 = vmul.f32 0.03125, %v4847_v14 }
0x1676   :  { %v4905_v17 = vadd.f32 1e-05, %v4889_v26 }
0x1677   :  { %v4841_v11 = vpop.xlane.xlu0 %4840 }
0x1678   :  { %6297 = vrsqrt.f32 %v4905_v17  ;;  %v4887_v34 = vmul.f32 0.03125, %v4841_v11  ;;  %v4850_v43 = vpop.xlane.xlu1 %4849 }
0x1679   :  { %v4890_v53 = vmul.f32 0.03125, %v4850_v43 }
0x167a   :  { %v4903_v19 = vadd.f32 1e-05, %v4887_v34 }
0x167b   :  { %v4906_v3 = vadd.f32 1e-05, %v4890_v53  ;;  %v4859_v12 = vpop.xlane.xlu0 %4858 }
0x167c   :  { %6299 = vrsqrt.f32 %v4903_v19  ;;  %v4893_v21 = vmul.f32 0.03125, %v4859_v12  ;;  %v4844_v35 = vpop.xlane.xlu1 %4843 }
0x167d   :  { %6301 = vrsqrt.f32 %v4906_v3  ;;  %v4888_v37 = vmul.f32 0.03125, %v4844_v35 }
0x167e   :  { %v4909_v31 = vadd.f32 1e-05, %v4893_v21 }
0x167f   :  { %v4904_v2 = vadd.f32 1e-05, %v4888_v37  ;;  %v4853_v60 = vpop.xlane.xlu0 %4852  ;;  %v9186_v37 = vld [vmem:[#allocation3_spill] sm:$0xff] }
0x1680   :  { %6303 = vrsqrt.f32 %v4909_v31  ;;  %v4891_v10 = vmul.f32 0.03125, %v4853_v60  ;;  %v4862_v24 = vpop.xlane.xlu1 %4861 }
0x1681   :  { %6305 = vrsqrt.f32 %v4904_v2  ;;  %v4894_v15 = vmul.f32 0.03125, %v4862_v24  ;;  %v9187_v24 = vld [vmem:[#allocation5_spill] sm:$0xff] }
0x1682   :  { %v6298_v1 = vpop.eup %6297  ;;  %v4907_v41 = vadd.f32 1e-05, %v4891_v10 }
0x1683   :  { %v4937_v45 = vmul.f32 %v6298_v1, %v8800_v16  ;;  %v4910_v8 = vadd.f32 1e-05, %v4894_v15  ;;  %v4871_v39 = vpop.xlane.xlu0 %4870 }
0x1684   :  { %6307 = vrsqrt.f32 %v4907_v41  ;;  %v4897_v50 = vmul.f32 0.03125, %v4871_v39  ;;  %v4856_v13 = vpop.xlane.xlu1 %4855 }
0x1685   :  { %v4959_v5 = vmul.f32 %v8898_v38, %v4937_v45  ;;  %6309 = vrsqrt.f32 %v4910_v8  ;;  %v4892_v0 = vmul.f32 0.03125, %v4856_v13 }
0x1686   :  { %v6300_v51 = vpop.eup %6299  ;;  %v4913_v16 = vadd.f32 1e-05, %v4897_v50 }
0x1687   :  { %v6302_v63 = vpop.eup %6301  ;;  %v4981_v20 = vadd.f32 %v8904_v46, %v4959_v5  ;;  %v4935_v44 = vmul.f32 %v6300_v51, %v8803_v29  ;;  %v4908_v7 = vadd.f32 1e-05, %v4892_v0  ;;  %v4865_v22 = vpop.xlane.xlu0 %4864 }
0x1688   :  { %v4938_v27 = vmul.f32 %v6302_v63, %v8814_v32  ;;  %6311 = vrsqrt.f32 %v4913_v16  ;;  %v4895_v40 = vmul.f32 0.03125, %v4865_v22  ;;  %v4874_v25 = vpop.xlane.xlu1 %4873  ;;  %v9188_v63 = vld [vmem:[#allocation10_spill] sm:$0xff] }
0x1689   :  { %v4999_v62 = vmul.f32 %v8910_v9, %v4981_v20  ;;  %v4957_v49 = vmul.f32 %v8898_v38, %v4935_v44  ;;  %6313 = vrsqrt.f32 %v4908_v7  ;;  %v4898_v33 = vmul.f32 0.03125, %v4874_v25 }
0x168a   :  { %v6304_v23 = vpop.eup %6303  ;;  %v4960_v52 = vmul.f32 %v8898_v38, %v4938_v27  ;;  %v4911_v59 = vadd.f32 1e-05, %v4895_v40  ;;  %v9189_v27 = vld [vmem:[#allocation4_spill] sm:$0xff] }
0x168b   :  { %v6306_v54 = vpop.eup %6305  ;;  %v5015_v29 = vadd.f32 %v4999_v62, %v9185_v57  ;;  %v4979_v14 = vadd.f32 %v8904_v46, %v4957_v49  ;;  %v4941_v32 = vmul.f32 %v6304_v23, %v8819_v18  ;;  %v4914_v26 = vadd.f32 1e-05, %v4898_v33 }
0x168c   :  { %v4982_v17 = vadd.f32 %v8904_v46, %v4960_v52  ;;  %v4936_v11 = vmul.f32 %v6306_v54, %v8811_v42  ;;  %6315 = vrsqrt.f32 %v4911_v59  ;;  %v4877_v34 = vpop.xlane.xlu0 %4876  ;;  %v4868_v43 = vpop.xlane.xlu1 %4867 }
0x168d   :  { %5031 = vst.msk [vmem:[%s9079_s25 + $0x10] sm:$0xff] %vm331_vm0, %v5015_v29  ;;  %v4997_v53 = vmul.f32 %v8910_v9, %v4979_v14  ;;  %v4963_v19 = vmul.f32 %v8898_v38, %v4941_v32  ;;  %6317 = vrsqrt.f32 %v4914_v26  ;;  %v4899_v3 = vmul.f32 0.03125, %v4877_v34  ;;  %v9190_v29 = vld [vmem:[#allocation8_spill] sm:$0xff] }
0x168e   :  { %v6308_v18 = vpop.eup %6307  ;;  %v5000_v12 = vmul.f32 %v8910_v9, %v4982_v17  ;;  %v4958_v21 = vmul.f32 %v8898_v38, %v4936_v11  ;;  %v4896_v42 = vmul.f32 0.03125, %v4868_v43  ;;  %v9191_v11 = vld [vmem:[#allocation9_spill] sm:$0xff] }
0x168f   :  { %v6310_v35 = vpop.eup %6309  ;;  %v5013_v31 = vadd.f32 %v4997_v53, %v9186_v37  ;;  %v4985_v2 = vadd.f32 %v8904_v46, %v4963_v19  ;;  %v4939_v60 = vmul.f32 %v6308_v18, %v8831_v47  ;;  %v4915_v10 = vadd.f32 1e-05, %v4899_v3  ;;  %v9193_v37 = vld [vmem:[#allocation7_spill] sm:$0xff] }
0x1690   :  { %v5016_v15 = vadd.f32 %v5000_v12, %v9187_v24  ;;  %v4980_v1 = vadd.f32 %v8904_v46, %v4958_v21  ;;  %v4942_v41 = vmul.f32 %v6310_v35, %v8826_v58  ;;  %v4912_v45 = vadd.f32 1e-05, %v4896_v42  ;;  %v4883_v8 = vpop.xlane.xlu0 %4882  ;;  %v4880_v39 = vpop.xlane.xlu1 %4879  ;;  %v9192_v12 = vld [vmem:[#allocation13_spill] sm:$0xff] }
0x1691   :  { %5029 = vst.msk [vmem:[%s9079_s25] sm:$0xff] %vm331_vm0, %v5013_v31  ;;  %v5003_v50 = vmul.f32 %v8910_v9, %v4985_v2  ;;  %v4961_v13 = vmul.f32 %v8898_v38, %v4939_v60  ;;  %6319 = vrsqrt.f32 %v4915_v10  ;;  %v4901_v47 = vmul.f32 0.03125, %v4883_v8 }
0x1692   :  { %v6312_v5 = vpop.eup %6311  ;;  %5032 = vst.msk [vmem:[%s9079_s25 + $0x18] sm:$0xff] %vm331_vm0, %v5016_v15  ;;  %v4998_v58 = vmul.f32 %v8910_v9, %v4980_v1  ;;  %v4964_v0 = vmul.f32 %v8898_v38, %v4942_v41  ;;  %6321 = vrsqrt.f32 %v4912_v45  ;;  %v4900_v51 = vmul.f32 0.03125, %v4880_v39 }
0x1693   :  { %v6314_v16 = vpop.eup %6313  ;;  %v5019_v20 = vadd.f32 %v5003_v50, %v9188_v63  ;;  %v4983_v44 = vadd.f32 %v8904_v46, %v4961_v13  ;;  %v4945_v7 = vmul.f32 %v6312_v5, %v8843_v56  ;;  %v4917_v22 = vadd.f32 1e-05, %v4901_v47  ;;  %v9195_v50 = vld [vmem:[#allocation14_spill] sm:$0xff] }
0x1694   :  { %v5014_v40 = vadd.f32 %v4998_v58, %v9189_v27  ;;  %v4986_v25 = vadd.f32 %v8904_v46, %v4964_v0  ;;  %v4940_v62 = vmul.f32 %v6314_v16, %v8838_v36  ;;  %v4916_v49 = vadd.f32 1e-05, %v4900_v51  ;;  %v4886_v33 = vpop.xlane.xlu1 %4885 }
0x1695   :  { %5035 = vst.msk [vmem:[%s9079_s25 + $0x30] sm:$0xff] %vm331_vm0, %v5019_v20  ;;  %v5001_v23 = vmul.f32 %v8910_v9, %v4983_v44  ;;  %v4967_v52 = vmul.f32 %v8898_v38, %v4945_v7  ;;  %6323 = vrsqrt.f32 %v4917_v22  ;;  %v4902_v56 = vmul.f32 0.03125, %v4886_v33  ;;  %v9196_v20 = vld [vmem:[#allocation15_spill] sm:$0xff]  ;;  %v9197_v22 = vld [vmem:[#allocation12_spill] sm:$0xff] }
0x1696   :  { %v6316_v59 = vpop.eup %6315  ;;  %5030 = vst.msk [vmem:[%s9079_s25 + $0x8] sm:$0xff] %vm331_vm0, %v5014_v40  ;;  %v5004_v36 = vmul.f32 %v8910_v9, %v4986_v25  ;;  %v4962_v54 = vmul.f32 %v8898_v38, %v4940_v62  ;;  %6325 = vrsqrt.f32 %v4916_v49  ;;  %v9198_v49 = vld [vmem:[#allocation17_spill] sm:$0xff] }
0x1697   :  { %v6318_v57 = vpop.eup %6317  ;;  %v5017_v14 = vadd.f32 %v5001_v23, %v9190_v29  ;;  %v4989_v32 = vadd.f32 %v8904_v46, %v4967_v52  ;;  %v4943_v26 = vmul.f32 %v6316_v59, %v8855_v4  ;;  %v4918_v17 = vadd.f32 1e-05, %v4902_v56  ;;  %v9199_v52 = vld [vmem:[#allocation16_spill] sm:$0xff]  ;;  %v9200_v59 = vld [vmem:[#allocation18_spill] sm:$0xff] }
0x1698   :  { %v5020_v34 = vadd.f32 %v5004_v36, %v9191_v11  ;;  %v4984_v43 = vadd.f32 %v8904_v46, %v4962_v54  ;;  %v4946_v53 = vmul.f32 %v6318_v57, %v8850_v6 }
0x1699   :  { %5033 = vst.msk [vmem:[%s9079_s25 + $0x20] sm:$0xff] %vm331_vm0, %v5017_v14  ;;  %v5007_v19 = vmul.f32 %v8910_v9, %v4989_v32  ;;  %v4965_v3 = vmul.f32 %v8898_v38, %v4943_v26  ;;  %6327 = vrsqrt.f32 %v4918_v17 }
0x169a   :  { %5036 = vst.msk [vmem:[%s9079_s25 + $0x38] sm:$0xff] %vm331_vm0, %v5020_v34  ;;  %v5002_v4 = vmul.f32 %v8910_v9, %v4984_v43  ;;  %v4968_v18 = vmul.f32 %v8898_v38, %v4946_v53 }
0x169b   :  { %v6320_v6 = vpop.eup %6319  ;;  %v5023_v21 = vadd.f32 %v5007_v19, %v9192_v12  ;;  %v4987_v42 = vadd.f32 %v8904_v46, %v4965_v3 }
0x169c   :  { %v6322_v35 = vpop.eup %6321  ;;  %v5018_v31 = vadd.f32 %v5002_v4, %v9193_v37  ;;  %v4990_v2 = vadd.f32 %v8904_v46, %v4968_v18  ;;  %v4947_v60 = vmul.f32 %v6320_v6, %v8870_v55  ;;  %v9194_v55 = vld [vmem:[#allocation11_spill] sm:$0xff] }
0x169d   :  { %5039 = vst.msk [vmem:[%s9079_s25 + $0x50] sm:$0xff] %vm331_vm0, %v5023_v21  ;;  %v5005_v10 = vmul.f32 %v8910_v9, %v4987_v42  ;;  %v4944_v24 = vmul.f32 %v6322_v35, %v8862_v48 }
0x169e   :  { %5034 = vst.msk [vmem:[%s9079_s25 + $0x28] sm:$0xff] %vm331_vm0, %v5018_v31  ;;  %v5008_v15 = vmul.f32 %v8910_v9, %v4990_v2  ;;  %v4969_v1 = vmul.f32 %v8898_v38, %v4947_v60 }
0x169f   :  { %v6324_v41 = vpop.eup %6323  ;;  %v5021_v45 = vadd.f32 %v5005_v10, %v9194_v55  ;;  %v4966_v8 = vmul.f32 %v8898_v38, %v4944_v24 }
0x16a0   :  { %v6326_v39 = vpop.eup %6325  ;;  %v5024_v13 = vadd.f32 %v5008_v15, %v9195_v50  ;;  %v4991_v47 = vadd.f32 %v8904_v46, %v4969_v1  ;;  %v4949_v48 = vmul.f32 %v6324_v41, %v8880_v28 }
0x16a1   :  { %5037 = vst.msk [vmem:[%s9079_s25 + $0x40] sm:$0xff] %vm331_vm0, %v5021_v45  ;;  %v4988_v5 = vadd.f32 %v8904_v46, %v4966_v8  ;;  %v4948_v58 = vmul.f32 %v6326_v39, %v8874_v30 }
0x16a2   :  { %5040 = vst.msk [vmem:[%s9079_s25 + $0x58] sm:$0xff] %vm331_vm0, %v5024_v13  ;;  %v5009_v0 = vmul.f32 %v8910_v9, %v4991_v47  ;;  %v4971_v51 = vmul.f32 %v8898_v38, %v4949_v48 }
0x16a3   :  { %v6328_v16 = vpop.eup %6327  ;;  %v5006_v28 = vmul.f32 %v8910_v9, %v4988_v5  ;;  %v4970_v63 = vmul.f32 %v8898_v38, %v4948_v58 }
0x16a4   :  { %v5025_v44 = vadd.f32 %v5009_v0, %v9196_v20  ;;  %v4993_v7 = vadd.f32 %v8904_v46, %v4971_v51  ;;  %v4950_v30 = vmul.f32 %v6328_v16, %v8886_v61 }
0x16a5   :  { %v5022_v27 = vadd.f32 %v5006_v28, %v9197_v22  ;;  %v4992_v40 = vadd.f32 %v8904_v46, %v4970_v63 }
0x16a6   :  { %5041 = vst.msk [vmem:[%s9079_s25 + $0x60] sm:$0xff] %vm331_vm0, %v5025_v44  ;;  %v5011_v25 = vmul.f32 %v8910_v9, %v4993_v7  ;;  %v4972_v62 = vmul.f32 %v8898_v38, %v4950_v30 }
0x16a7   :  { %5038 = vst.msk [vmem:[%s9079_s25 + $0x48] sm:$0xff] %vm331_vm0, %v5022_v27  ;;  %v5010_v61 = vmul.f32 %v8910_v9, %v4992_v40 }
0x16a8   :  { %v5027_v33 = vadd.f32 %v5011_v25, %v9198_v49  ;;  %v4994_v23 = vadd.f32 %v8904_v46, %v4972_v62 }
0x16a9   :  { %v5026_v56 = vadd.f32 %v5010_v61, %v9199_v52 }
0x16aa   :  { %5043 = vst.msk [vmem:[%s9079_s25 + $0x70] sm:$0xff] %vm331_vm0, %v5027_v33  ;;  %v5012_v38 = vmul.f32 %v8910_v9, %v4994_v23 }
0x16ab   :  { %5042 = vst.msk [vmem:[%s9079_s25 + $0x68] sm:$0xff] %vm331_vm0, %v5026_v56 }
0x16ac   :  { %v5028_v36 = vadd.f32 %v5012_v38, %v9200_v59 }
0x16ae   :  { %5044 = vst.msk [vmem:[%s9079_s25 + $0x78] sm:$0xff] %vm331_vm0, %v5028_v36 }

</bundles_post_ra>
